<compile_context>
chip_gen: v7x
topology: tpu7x:2x2x1
jax: 0.10.0
libtpu: 0.0.40
codegen_flags: <defaults>
</compile_context>

<pallas_src>
import math

import jax
import jax.numpy as jnp
from jax.experimental import pallas as pl
from jax.experimental.pallas import tpu as pltpu

# ---------------- model config (scaled-down but structurally faithful) ----------
B = 2            # batch
CIN = 1          # input channels (N_channels == 1)
L = 128          # input sequence length (original module expects 2570)
CONV_K = 8       # Conv1D kernel size
CONV_STRIDE = 8
POOL = 2         # MaxPool1d kernel
EMSIZE = 32      # d_model (emsize)
NHEAD = 4
NHID = 64        # transformer FFN hidden (nhid)
NLAYERS = 2
NCLASSES = 26
NCLASSES_PAD = 128   # lane-dense padded head output; sliced back to 26 outside

L_CONV = (L - CONV_K) // CONV_STRIDE + 1      # 16
SEQ = L_CONV // POOL                          # 8
DH = EMSIZE // NHEAD                          # 8
SCALE = 1.0 / math.sqrt(DH)
LN_EPS = 1e-5
# TODO(synk): models_2020.Conv1DNet (conv_model_max) is unavailable; modeled as
# Conv1d(1, emsize, k, stride) + ReLU + MaxPool1d(2).  The original hard-coded
# nn.Linear(emsize*256, 512) is sized emsize*SEQ -> 512 for the scaled config.
LIN1_IN = EMSIZE * SEQ
LIN1_OUT = 512
LIN2_OUT = 64


# ---------------- fused Pallas kernel --------------------------------------------

def _layernorm(y, gamma, beta):
    mean = jnp.mean(y, axis=-1, keepdims=True)
    c = y - mean
    var = jnp.mean(c * c, axis=-1, keepdims=True)
    return c * jax.lax.rsqrt(var + LN_EPS) * gamma + beta


def _fused_forward_kernel(
        patch_ref, wcb_ref, bcb_ref, pe_ref, mask_ref,
        wqkv_ref, bqkv_ref, wo_ref, bo_ref,
        g1_ref, be1_ref, wf1_ref, bf1_ref, wf2_ref, bf2_ref, g2_ref, be2_ref,
        l1w_ref, l1b_ref, l2w_ref, l2b_ref, l3w_ref, l3b_ref,
        o_ref):
    # ---- front end: Conv1d(+bias,ReLU) for both pool slots in ONE matmul ----
    # (block-diagonal conv weight), MaxPool1d(2) as a lane-half max, then
    # positional encoding (dropout layers act as identity, eval semantics).
    conv = jnp.dot(patch_ref[...], wcb_ref[...],
                   preferred_element_type=jnp.float32) + bcb_ref[...]
    conv = jnp.maximum(conv, 0.0)                               # (B*SEQ, POOL*E)
    pooled = jnp.maximum(conv[:, :EMSIZE], conv[:, EMSIZE:])    # (B*SEQ, E)
    x = pooled + pe_ref[...]
    # TODO(synk): reference forward does not scale conv output by sqrt(emsize)
    # before the positional encoding, so it is not applied here either.

    # additive attention mask, broadcast ONCE (JAX does not CSE broadcast_in_dim)
    mask_b = jnp.broadcast_to(mask_ref[...][None], (B, SEQ, SEQ))

    # ---- TransformerEncoder: post-norm, ReLU FFN, static unroll over layers ----
    for l in range(NLAYERS):
        qkv = jnp.dot(x, wqkv_ref[l],
                      preferred_element_type=jnp.float32) + bqkv_ref[l]
        q = qkv[:, :EMSIZE] * SCALE
        k = qkv[:, EMSIZE:2 * EMSIZE]
        v = qkv[:, 2 * EMSIZE:]
        wo_l = wo_ref[l]                                        # (E, E)

        # Heads accumulate straight through their (DH, E) slab of the output
        # projection -> no jnp.concatenate / lane re-insertion.
        attn = bo_ref[l]                                        # (1, E), broadcasts
        for h in range(NHEAD):                                  # static unroll
            sl = slice(h * DH, (h + 1) * DH)
            qh = q[:, sl].reshape(B, SEQ, DH)
            kh = k[:, sl].reshape(B, SEQ, DH)
            vh = v[:, sl].reshape(B, SEQ, DH)
            s = jnp.einsum('bqd,bkd->bqk', qh, kh,
                           preferred_element_type=jnp.float32) + mask_b
            s = s - jnp.max(s, axis=-1, keepdims=True)
            p = jnp.exp(s)
            p = p / jnp.sum(p, axis=-1, keepdims=True)          # exact softmax
            ctx = jnp.einsum('bqk,bkd->bqd', p, vh,
                             preferred_element_type=jnp.float32)
            attn = attn + jnp.dot(ctx.reshape(B * SEQ, DH), wo_l[sl, :],
                                  preferred_element_type=jnp.float32)

        y = _layernorm(x + attn, g1_ref[l], be1_ref[l])         # residual + LN1

        h1 = jnp.dot(y, wf1_ref[l],
                     preferred_element_type=jnp.float32) + bf1_ref[l]
        h1 = jnp.maximum(h1, 0.0)
        ff = jnp.dot(h1, wf2_ref[l],
                     preferred_element_type=jnp.float32) + bf2_ref[l]
        x = _layernorm(y + ff, g2_ref[l], be2_ref[l])           # residual + LN2

    # ---- head MLP: linear -> linear2 -> (dropout=id) -> linear3 ----
    # Per-sample flatten (B*SEQ, E) -> (B, SEQ*E) realized as a sum over seq
    # positions against pre-reshaped lin1 weights (SEQ, E, 512): avoids a
    # minor-dim-changing reshape of the activations inside the kernel.
    # TODO(synk): flatten order assumes batch-major (b, s, e) features; the
    # reference nn.TransformerEncoder default layout is (S, B, E).
    x3 = x.reshape(B, SEQ, EMSIZE)                              # sublane-aligned split
    hm = l1b_ref[...]                                           # (1, 512), broadcasts
    for s in range(SEQ):                                        # static unroll
        hm = hm + jnp.dot(x3[:, s, :], l1w_ref[s],
                          preferred_element_type=jnp.float32)
    hm = jnp.dot(hm, l2w_ref[...],
                 preferred_element_type=jnp.float32) + l2b_ref[...]
    # lin3 zero-padded to 128 output lanes -> lane-dense final store.
    o_ref[...] = jnp.dot(hm, l3w_ref[...],
                         preferred_element_type=jnp.float32) + l3b_ref[...]


_VMEM = pl.BlockSpec(memory_space=pltpu.MemorySpace.VMEM)


# ---------------- parameters & constants -----------------------------------------

def _dense_init(key, out_dim, in_dim):
    kw, kb = jax.random.split(key)
    bound = 1.0 / math.sqrt(in_dim)
    w = jax.random.uniform(kw, (out_dim, in_dim), jnp.float32, -bound, bound)
    b = jax.random.uniform(kb, (out_dim,), jnp.float32, -bound, bound)
    return w, b


def make_pe(d_model, max_len=3000):
    position = jnp.arange(max_len, dtype=jnp.float32)[:, None]
    div_term = jnp.exp(jnp.arange(0, d_model, 2, dtype=jnp.float32)
                       * (-math.log(10000.0) / d_model))
    pe = jnp.zeros((max_len, d_model), jnp.float32)
    pe = pe.at[:, 0::2].set(jnp.sin(position * div_term))
    pe = pe.at[:, 1::2].set(jnp.cos(position * div_term))
    return pe  # (max_len, d_model)


def init_params(key):
    """All weights pre-transposed / stacked / padded here (one-time cost)."""
    keys = jax.random.split(key, 4 + NLAYERS)
    p = {}

    # Conv1d(CIN, EMSIZE, CONV_K, stride=CONV_STRIDE); PyTorch layout (E, CIN, K).
    cw, cb = _dense_init(keys[0], EMSIZE, CIN * CONV_K)
    wc = cw.T                                                   # (CIN*K, E)
    # Block-diagonal weight: both MaxPool slots' conv windows in one matmul.
    wblk = jnp.zeros((POOL * CIN * CONV_K, POOL * EMSIZE), jnp.float32)
    for pp in range(POOL):
        wblk = wblk.at[pp * CIN * CONV_K:(pp + 1) * CIN * CONV_K,
                       pp * EMSIZE:(pp + 1) * EMSIZE].set(wc)
    p["conv_w_blk"] = wblk
    p["conv_b_blk"] = jnp.tile(cb.reshape(1, EMSIZE), (1, POOL))

    # Encoder layers: pre-transposed, stacked along a leading layer axis.
    stacks = {n: [] for n in ("wqkv", "bqkv", "wo", "bo", "ln1_g", "ln1_b",
                              "ffn_w1", "ffn_b1", "ffn_w2", "ffn_b2",
                              "ln2_g", "ln2_b")}
    for i in range(NLAYERS):
        k = jax.random.split(keys[1 + i], 4)
        in_w, in_b = _dense_init(k[0], 3 * EMSIZE, EMSIZE)
        out_w, out_b = _dense_init(k[1], EMSIZE, EMSIZE)
        f1w, f1b = _dense_init(k[2], NHID, EMSIZE)
        f2w, f2b = _dense_init(k[3], EMSIZE, NHID)
        stacks["wqkv"].append(in_w.T)
        stacks["bqkv"].append(in_b.reshape(1, 3 * EMSIZE))
        stacks["wo"].append(out_w.T)
        stacks["bo"].append(out_b.reshape(1, EMSIZE))
        stacks["ln1_g"].append(jnp.ones((1, EMSIZE), jnp.float32))
        stacks["ln1_b"].append(jnp.zeros((1, EMSIZE), jnp.float32))
        stacks["ffn_w1"].append(f1w.T)
        stacks["ffn_b1"].append(f1b.reshape(1, NHID))
        stacks["ffn_w2"].append(f2w.T)
        stacks["ffn_b2"].append(f2b.reshape(1, EMSIZE))
        stacks["ln2_g"].append(jnp.ones((1, EMSIZE), jnp.float32))
        stacks["ln2_b"].append(jnp.zeros((1, EMSIZE), jnp.float32))
    for n, v in stacks.items():
        p[n] = jnp.stack(v)

    # Head MLP.
    l1w, l1b = _dense_init(keys[1 + NLAYERS], LIN1_OUT, LIN1_IN)
    l2w, l2b = _dense_init(keys[2 + NLAYERS], LIN2_OUT, LIN1_OUT)
    l3w, l3b = _dense_init(keys[3 + NLAYERS], NCLASSES, LIN2_OUT)
    # lin1 pre-reshaped (SEQ, E, 512) for the in-kernel per-position accumulation.
    p["lin1_w"] = l1w.T.reshape(SEQ, EMSIZE, LIN1_OUT)
    p["lin1_b"] = l1b.reshape(1, LIN1_OUT)
    p["lin2_w"] = l2w.T
    p["lin2_b"] = l2b.reshape(1, LIN2_OUT)
    # lin3 zero-padded to 128 output lanes (lane-dense final store).
    p["lin3_w"] = jnp.zeros((LIN2_OUT, NCLASSES_PAD),
                            jnp.float32).at[:, :NCLASSES].set(l3w.T)
    p["lin3_b"] = jnp.zeros((1, NCLASSES_PAD),
                            jnp.float32).at[:, :NCLASSES].set(l3b)
    # Positional encoding pre-tiled batch-major: row b*SEQ + s -> pe[s].
    p["pe"] = jnp.tile(make_pe(EMSIZE)[:SEQ], (B, 1))
    return p


# ---------------- forward pass ----------------------------------------------------

def forward(params, src, src_mask):
    """Full forward = reshape(src) + ONE fused pallas_call + class slice."""
    src = src.astype(jnp.float32)
    # im2col is a plain reshape: kernel_size == stride and the two MaxPool'd
    # conv windows of output position s are adjacent -> row (b*SEQ+s) holds
    # both POOL windows back to back.
    patches = src.reshape(B * SEQ, POOL * CIN * CONV_K)          # (16, 16)
    mask = src_mask.astype(jnp.float32)

    args = (
        patches, params["conv_w_blk"], params["conv_b_blk"], params["pe"], mask,
        params["wqkv"], params["bqkv"], params["wo"], params["bo"],
        params["ln1_g"], params["ln1_b"],
        params["ffn_w1"], params["ffn_b1"], params["ffn_w2"], params["ffn_b2"],
        params["ln2_g"], params["ln2_b"],
        params["lin1_w"], params["lin1_b"], params["lin2_w"], params["lin2_b"],
        params["lin3_w"], params["lin3_b"],
    )
    out_pad = pl.pallas_call(
        _fused_forward_kernel,
        out_shape=jax.ShapeDtypeStruct((B, NCLASSES_PAD), jnp.float32),
        in_specs=[_VMEM] * len(args),
        out_specs=_VMEM,
    )(*args)
    return out_pad[:, :NCLASSES]                                 # (B, 26)


if __name__ == "__main__":
    key = jax.random.PRNGKey(0)
    pkey, xkey = jax.random.split(key)
    params = init_params(pkey)
    src = jax.random.normal(xkey, (B, CIN, L), jnp.float32)
    # generate_square_subsequent_mask in the reference returns zeros(sz, sz)
    src_mask = jnp.zeros((SEQ, SEQ), jnp.float32)

    out = jax.jit(forward)(params, src, src_mask)
    out = jax.block_until_ready(out)
    assert out.shape == (B, NCLASSES) and out.dtype == jnp.float32
    print("KERNEL_OK")
</pallas_src>

<mosaic_0001>
module attributes {stable_mosaic.version = 11 : i64} {
  func.func @_fused_forward_kernel(%arg0: memref<16x16xf32, #tpu.memory_space<vmem>>, %arg1: memref<16x64xf32, #tpu.memory_space<vmem>>, %arg2: memref<1x64xf32, #tpu.memory_space<vmem>>, %arg3: memref<16x32xf32, #tpu.memory_space<vmem>>, %arg4: memref<8x8xf32, #tpu.memory_space<vmem>>, %arg5: memref<2x32x96xf32, #tpu.memory_space<vmem>>, %arg6: memref<2x1x96xf32, #tpu.memory_space<vmem>>, %arg7: memref<2x32x32xf32, #tpu.memory_space<vmem>>, %arg8: memref<2x1x32xf32, #tpu.memory_space<vmem>>, %arg9: memref<2x1x32xf32, #tpu.memory_space<vmem>>, %arg10: memref<2x1x32xf32, #tpu.memory_space<vmem>>, %arg11: memref<2x32x64xf32, #tpu.memory_space<vmem>>, %arg12: memref<2x1x64xf32, #tpu.memory_space<vmem>>, %arg13: memref<2x64x32xf32, #tpu.memory_space<vmem>>, %arg14: memref<2x1x32xf32, #tpu.memory_space<vmem>>, %arg15: memref<2x1x32xf32, #tpu.memory_space<vmem>>, %arg16: memref<2x1x32xf32, #tpu.memory_space<vmem>>, %arg17: memref<8x32x512xf32, #tpu.memory_space<vmem>>, %arg18: memref<1x512xf32, #tpu.memory_space<vmem>>, %arg19: memref<512x64xf32, #tpu.memory_space<vmem>>, %arg20: memref<1x64xf32, #tpu.memory_space<vmem>>, %arg21: memref<64x128xf32, #tpu.memory_space<vmem>>, %arg22: memref<1x128xf32, #tpu.memory_space<vmem>>, %arg23: memref<2x128xf32, #tpu.memory_space<vmem>>) attributes {dimension_semantics = [], scalar_prefetch = 0 : i64, scratch_operands = 0 : i64, tpu.core_type = #tpu.core_type<tc>} {
    %c0 = arith.constant 0 : index
    %c0_0 = arith.constant 0 : index
    %0 = vector.load %arg0[%c0, %c0_0] : memref<16x16xf32, #tpu.memory_space<vmem>>, vector<16x16xf32>
    %c0_1 = arith.constant 0 : index
    %c0_2 = arith.constant 0 : index
    %1 = vector.load %arg1[%c0_1, %c0_2] : memref<16x64xf32, #tpu.memory_space<vmem>>, vector<16x64xf32>
    %cst = arith.constant dense<0.000000e+00> : vector<16x64xf32>
    %2 = tpu.matmul %0, %1, %cst {dimension_numbers = #tpu.dot_dimension_numbers<[1], [0], [0], [1], [0, 0, 1, 1], [], []>} : vector<16x16xf32>, vector<16x64xf32>, vector<16x64xf32> -> vector<16x64xf32>
    %c0_3 = arith.constant 0 : index
    %c0_4 = arith.constant 0 : index
    %3 = vector.load %arg2[%c0_3, %c0_4] : memref<1x64xf32, #tpu.memory_space<vmem>>, vector<1x64xf32>
    %4 = vector.broadcast %3 : vector<1x64xf32> to vector<16x64xf32>
    %5 = arith.addf %2, %4 : vector<16x64xf32>
    %cst_5 = arith.constant 0.000000e+00 : f32
    %6 = vector.broadcast %cst_5 : f32 to vector<16x64xf32>
    %7 = arith.maximumf %5, %6 : vector<16x64xf32>
    %8 = vector.extract_strided_slice %7 {offsets = [0, 0], sizes = [16, 32], strides = [1, 1]} : vector<16x64xf32> to vector<16x32xf32>
    %9 = vector.extract_strided_slice %7 {offsets = [0, 32], sizes = [16, 32], strides = [1, 1]} : vector<16x64xf32> to vector<16x32xf32>
    %10 = arith.maximumf %8, %9 : vector<16x32xf32>
    %c0_6 = arith.constant 0 : index
    %c0_7 = arith.constant 0 : index
    %11 = vector.load %arg3[%c0_6, %c0_7] : memref<16x32xf32, #tpu.memory_space<vmem>>, vector<16x32xf32>
    %12 = arith.addf %10, %11 : vector<16x32xf32>
    %c0_8 = arith.constant 0 : index
    %c0_9 = arith.constant 0 : index
    %13 = vector.load %arg4[%c0_8, %c0_9] : memref<8x8xf32, #tpu.memory_space<vmem>>, vector<8x8xf32>
    %14 = vector.shape_cast %13 : vector<8x8xf32> to vector<1x8x8xf32>
    %15 = vector.shape_cast %14 : vector<1x8x8xf32> to vector<1x8x8xf32>
    %16 = vector.broadcast %15 : vector<1x8x8xf32> to vector<2x8x8xf32>
    %c0_10 = arith.constant 0 : index
    %c0_11 = arith.constant 0 : index
    %c0_12 = arith.constant 0 : index
    %17 = vector.load %arg5[%c0_10, %c0_11, %c0_12] : memref<2x32x96xf32, #tpu.memory_space<vmem>>, vector<1x32x96xf32>
    %18 = vector.shape_cast %17 : vector<1x32x96xf32> to vector<32x96xf32>
    %cst_13 = arith.constant dense<0.000000e+00> : vector<16x96xf32>
    %19 = tpu.matmul %12, %18, %cst_13 {dimension_numbers = #tpu.dot_dimension_numbers<[1], [0], [0], [1], [0, 0, 1, 1], [], []>} : vector<16x32xf32>, vector<32x96xf32>, vector<16x96xf32> -> vector<16x96xf32>
    %c0_14 = arith.constant 0 : index
    %c0_15 = arith.constant 0 : index
    %c0_16 = arith.constant 0 : index
    %20 = vector.load %arg6[%c0_14, %c0_15, %c0_16] : memref<2x1x96xf32, #tpu.memory_space<vmem>>, vector<1x1x96xf32>
    %21 = vector.shape_cast %20 : vector<1x1x96xf32> to vector<1x96xf32>
    %22 = vector.broadcast %21 : vector<1x96xf32> to vector<16x96xf32>
    %23 = arith.addf %19, %22 : vector<16x96xf32>
    %24 = vector.extract_strided_slice %23 {offsets = [0, 0], sizes = [16, 32], strides = [1, 1]} : vector<16x96xf32> to vector<16x32xf32>
    %cst_17 = arith.constant 0.353553385 : f32
    %25 = vector.broadcast %cst_17 : f32 to vector<16x32xf32>
    %26 = arith.mulf %24, %25 : vector<16x32xf32>
    %27 = vector.extract_strided_slice %23 {offsets = [0, 32], sizes = [16, 32], strides = [1, 1]} : vector<16x96xf32> to vector<16x32xf32>
    %28 = vector.extract_strided_slice %23 {offsets = [0, 64], sizes = [16, 32], strides = [1, 1]} : vector<16x96xf32> to vector<16x32xf32>
    %c0_18 = arith.constant 0 : index
    %c0_19 = arith.constant 0 : index
    %c0_20 = arith.constant 0 : index
    %29 = vector.load %arg7[%c0_18, %c0_19, %c0_20] : memref<2x32x32xf32, #tpu.memory_space<vmem>>, vector<1x32x32xf32>
    %30 = vector.shape_cast %29 : vector<1x32x32xf32> to vector<32x32xf32>
    %c0_21 = arith.constant 0 : index
    %c0_22 = arith.constant 0 : index
    %c0_23 = arith.constant 0 : index
    %31 = vector.load %arg8[%c0_21, %c0_22, %c0_23] : memref<2x1x32xf32, #tpu.memory_space<vmem>>, vector<1x1x32xf32>
    %32 = vector.shape_cast %31 : vector<1x1x32xf32> to vector<1x32xf32>
    %33 = vector.extract_strided_slice %26 {offsets = [0, 0], sizes = [16, 8], strides = [1, 1]} : vector<16x32xf32> to vector<16x8xf32>
    %34 = vector.shape_cast %33 : vector<16x8xf32> to vector<2x8x8xf32>
    %35 = vector.extract_strided_slice %27 {offsets = [0, 0], sizes = [16, 8], strides = [1, 1]} : vector<16x32xf32> to vector<16x8xf32>
    %36 = vector.shape_cast %35 : vector<16x8xf32> to vector<2x8x8xf32>
    %37 = vector.extract_strided_slice %28 {offsets = [0, 0], sizes = [16, 8], strides = [1, 1]} : vector<16x32xf32> to vector<16x8xf32>
    %38 = vector.shape_cast %37 : vector<16x8xf32> to vector<2x8x8xf32>
    "tpu.trace_start"() <{level = 10 : i32, message = "bqd,bkd->bqk"}> : () -> ()
    %cst_24 = arith.constant dense<0.000000e+00> : vector<2x8x8xf32>
    %39 = tpu.matmul %34, %36, %cst_24 {dimension_numbers = #tpu.dot_dimension_numbers<[2], [2], [1], [1], [0, 0, 0, 1, 1, 1], [0], [0]>} : vector<2x8x8xf32>, vector<2x8x8xf32>, vector<2x8x8xf32> -> vector<2x8x8xf32>
    "tpu.trace_stop"() : () -> ()
    %40 = arith.addf %39, %16 : vector<2x8x8xf32>
    %cst_25 = arith.constant dense<0xFF800000> : vector<2x8xf32>
    %41 = vector.multi_reduction <maximumf>, %40, %cst_25 [2] : vector<2x8x8xf32> to vector<2x8xf32>
    %42 = vector.shape_cast %41 : vector<2x8xf32> to vector<2x8x1xf32>
    %43 = vector.broadcast %42 : vector<2x8x1xf32> to vector<2x8x8xf32>
    %44 = arith.subf %40, %43 : vector<2x8x8xf32>
    %45 = math.exp %44 : vector<2x8x8xf32>
    %cst_26 = arith.constant dense<0.000000e+00> : vector<2x8xf32>
    %46 = vector.multi_reduction <add>, %45, %cst_26 [2] : vector<2x8x8xf32> to vector<2x8xf32>
    %47 = vector.shape_cast %46 : vector<2x8xf32> to vector<2x8x1xf32>
    %48 = vector.broadcast %47 : vector<2x8x1xf32> to vector<2x8x8xf32>
    %49 = arith.divf %45, %48 : vector<2x8x8xf32>
    "tpu.trace_start"() <{level = 10 : i32, message = "bqk,bkd->bqd"}> : () -> ()
    %cst_27 = arith.constant dense<0.000000e+00> : vector<2x8x8xf32>
    %50 = tpu.matmul %49, %38, %cst_27 {dimension_numbers = #tpu.dot_dimension_numbers<[2], [1], [1], [2], [0, 0, 0, 1, 1, 2], [0], [0]>} : vector<2x8x8xf32>, vector<2x8x8xf32>, vector<2x8x8xf32> -> vector<2x8x8xf32>
    "tpu.trace_stop"() : () -> ()
    %51 = vector.shape_cast %50 : vector<2x8x8xf32> to vector<16x8xf32>
    %52 = vector.extract_strided_slice %30 {offsets = [0, 0], sizes = [8, 32], strides = [1, 1]} : vector<32x32xf32> to vector<8x32xf32>
    %cst_28 = arith.constant dense<0.000000e+00> : vector<16x32xf32>
    %53 = tpu.matmul %51, %52, %cst_28 {dimension_numbers = #tpu.dot_dimension_numbers<[1], [0], [0], [1], [0, 0, 1, 1], [], []>} : vector<16x8xf32>, vector<8x32xf32>, vector<16x32xf32> -> vector<16x32xf32>
    %54 = vector.broadcast %32 : vector<1x32xf32> to vector<16x32xf32>
    %55 = arith.addf %54, %53 : vector<16x32xf32>
    %56 = vector.extract_strided_slice %26 {offsets = [0, 8], sizes = [16, 8], strides = [1, 1]} : vector<16x32xf32> to vector<16x8xf32>
    %57 = vector.shape_cast %56 : vector<16x8xf32> to vector<2x8x8xf32>
    %58 = vector.extract_strided_slice %27 {offsets = [0, 8], sizes = [16, 8], strides = [1, 1]} : vector<16x32xf32> to vector<16x8xf32>
    %59 = vector.shape_cast %58 : vector<16x8xf32> to vector<2x8x8xf32>
    %60 = vector.extract_strided_slice %28 {offsets = [0, 8], sizes = [16, 8], strides = [1, 1]} : vector<16x32xf32> to vector<16x8xf32>
    %61 = vector.shape_cast %60 : vector<16x8xf32> to vector<2x8x8xf32>
    "tpu.trace_start"() <{level = 10 : i32, message = "bqd,bkd->bqk"}> : () -> ()
    %cst_29 = arith.constant dense<0.000000e+00> : vector<2x8x8xf32>
    %62 = tpu.matmul %57, %59, %cst_29 {dimension_numbers = #tpu.dot_dimension_numbers<[2], [2], [1], [1], [0, 0, 0, 1, 1, 1], [0], [0]>} : vector<2x8x8xf32>, vector<2x8x8xf32>, vector<2x8x8xf32> -> vector<2x8x8xf32>
    "tpu.trace_stop"() : () -> ()
    %63 = arith.addf %62, %16 : vector<2x8x8xf32>
    %cst_30 = arith.constant dense<0xFF800000> : vector<2x8xf32>
    %64 = vector.multi_reduction <maximumf>, %63, %cst_30 [2] : vector<2x8x8xf32> to vector<2x8xf32>
    %65 = vector.shape_cast %64 : vector<2x8xf32> to vector<2x8x1xf32>
    %66 = vector.broadcast %65 : vector<2x8x1xf32> to vector<2x8x8xf32>
    %67 = arith.subf %63, %66 : vector<2x8x8xf32>
    %68 = math.exp %67 : vector<2x8x8xf32>
    %cst_31 = arith.constant dense<0.000000e+00> : vector<2x8xf32>
    %69 = vector.multi_reduction <add>, %68, %cst_31 [2] : vector<2x8x8xf32> to vector<2x8xf32>
    %70 = vector.shape_cast %69 : vector<2x8xf32> to vector<2x8x1xf32>
    %71 = vector.broadcast %70 : vector<2x8x1xf32> to vector<2x8x8xf32>
    %72 = arith.divf %68, %71 : vector<2x8x8xf32>
    "tpu.trace_start"() <{level = 10 : i32, message = "bqk,bkd->bqd"}> : () -> ()
    %cst_32 = arith.constant dense<0.000000e+00> : vector<2x8x8xf32>
    %73 = tpu.matmul %72, %61, %cst_32 {dimension_numbers = #tpu.dot_dimension_numbers<[2], [1], [1], [2], [0, 0, 0, 1, 1, 2], [0], [0]>} : vector<2x8x8xf32>, vector<2x8x8xf32>, vector<2x8x8xf32> -> vector<2x8x8xf32>
    "tpu.trace_stop"() : () -> ()
    %74 = vector.shape_cast %73 : vector<2x8x8xf32> to vector<16x8xf32>
    %75 = vector.extract_strided_slice %30 {offsets = [8, 0], sizes = [8, 32], strides = [1, 1]} : vector<32x32xf32> to vector<8x32xf32>
    %cst_33 = arith.constant dense<0.000000e+00> : vector<16x32xf32>
    %76 = tpu.matmul %74, %75, %cst_33 {dimension_numbers = #tpu.dot_dimension_numbers<[1], [0], [0], [1], [0, 0, 1, 1], [], []>} : vector<16x8xf32>, vector<8x32xf32>, vector<16x32xf32> -> vector<16x32xf32>
    %77 = arith.addf %55, %76 : vector<16x32xf32>
    %78 = vector.extract_strided_slice %26 {offsets = [0, 16], sizes = [16, 8], strides = [1, 1]} : vector<16x32xf32> to vector<16x8xf32>
    %79 = vector.shape_cast %78 : vector<16x8xf32> to vector<2x8x8xf32>
    %80 = vector.extract_strided_slice %27 {offsets = [0, 16], sizes = [16, 8], strides = [1, 1]} : vector<16x32xf32> to vector<16x8xf32>
    %81 = vector.shape_cast %80 : vector<16x8xf32> to vector<2x8x8xf32>
    %82 = vector.extract_strided_slice %28 {offsets = [0, 16], sizes = [16, 8], strides = [1, 1]} : vector<16x32xf32> to vector<16x8xf32>
    %83 = vector.shape_cast %82 : vector<16x8xf32> to vector<2x8x8xf32>
    "tpu.trace_start"() <{level = 10 : i32, message = "bqd,bkd->bqk"}> : () -> ()
    %cst_34 = arith.constant dense<0.000000e+00> : vector<2x8x8xf32>
    %84 = tpu.matmul %79, %81, %cst_34 {dimension_numbers = #tpu.dot_dimension_numbers<[2], [2], [1], [1], [0, 0, 0, 1, 1, 1], [0], [0]>} : vector<2x8x8xf32>, vector<2x8x8xf32>, vector<2x8x8xf32> -> vector<2x8x8xf32>
    "tpu.trace_stop"() : () -> ()
    %85 = arith.addf %84, %16 : vector<2x8x8xf32>
    %cst_35 = arith.constant dense<0xFF800000> : vector<2x8xf32>
    %86 = vector.multi_reduction <maximumf>, %85, %cst_35 [2] : vector<2x8x8xf32> to vector<2x8xf32>
    %87 = vector.shape_cast %86 : vector<2x8xf32> to vector<2x8x1xf32>
    %88 = vector.broadcast %87 : vector<2x8x1xf32> to vector<2x8x8xf32>
    %89 = arith.subf %85, %88 : vector<2x8x8xf32>
    %90 = math.exp %89 : vector<2x8x8xf32>
    %cst_36 = arith.constant dense<0.000000e+00> : vector<2x8xf32>
    %91 = vector.multi_reduction <add>, %90, %cst_36 [2] : vector<2x8x8xf32> to vector<2x8xf32>
    %92 = vector.shape_cast %91 : vector<2x8xf32> to vector<2x8x1xf32>
    %93 = vector.broadcast %92 : vector<2x8x1xf32> to vector<2x8x8xf32>
    %94 = arith.divf %90, %93 : vector<2x8x8xf32>
    "tpu.trace_start"() <{level = 10 : i32, message = "bqk,bkd->bqd"}> : () -> ()
    %cst_37 = arith.constant dense<0.000000e+00> : vector<2x8x8xf32>
    %95 = tpu.matmul %94, %83, %cst_37 {dimension_numbers = #tpu.dot_dimension_numbers<[2], [1], [1], [2], [0, 0, 0, 1, 1, 2], [0], [0]>} : vector<2x8x8xf32>, vector<2x8x8xf32>, vector<2x8x8xf32> -> vector<2x8x8xf32>
    "tpu.trace_stop"() : () -> ()
    %96 = vector.shape_cast %95 : vector<2x8x8xf32> to vector<16x8xf32>
    %97 = vector.extract_strided_slice %30 {offsets = [16, 0], sizes = [8, 32], strides = [1, 1]} : vector<32x32xf32> to vector<8x32xf32>
    %cst_38 = arith.constant dense<0.000000e+00> : vector<16x32xf32>
    %98 = tpu.matmul %96, %97, %cst_38 {dimension_numbers = #tpu.dot_dimension_numbers<[1], [0], [0], [1], [0, 0, 1, 1], [], []>} : vector<16x8xf32>, vector<8x32xf32>, vector<16x32xf32> -> vector<16x32xf32>
    %99 = arith.addf %77, %98 : vector<16x32xf32>
    %100 = vector.extract_strided_slice %26 {offsets = [0, 24], sizes = [16, 8], strides = [1, 1]} : vector<16x32xf32> to vector<16x8xf32>
    %101 = vector.shape_cast %100 : vector<16x8xf32> to vector<2x8x8xf32>
    %102 = vector.extract_strided_slice %27 {offsets = [0, 24], sizes = [16, 8], strides = [1, 1]} : vector<16x32xf32> to vector<16x8xf32>
    %103 = vector.shape_cast %102 : vector<16x8xf32> to vector<2x8x8xf32>
    %104 = vector.extract_strided_slice %28 {offsets = [0, 24], sizes = [16, 8], strides = [1, 1]} : vector<16x32xf32> to vector<16x8xf32>
    %105 = vector.shape_cast %104 : vector<16x8xf32> to vector<2x8x8xf32>
    "tpu.trace_start"() <{level = 10 : i32, message = "bqd,bkd->bqk"}> : () -> ()
    %cst_39 = arith.constant dense<0.000000e+00> : vector<2x8x8xf32>
    %106 = tpu.matmul %101, %103, %cst_39 {dimension_numbers = #tpu.dot_dimension_numbers<[2], [2], [1], [1], [0, 0, 0, 1, 1, 1], [0], [0]>} : vector<2x8x8xf32>, vector<2x8x8xf32>, vector<2x8x8xf32> -> vector<2x8x8xf32>
    "tpu.trace_stop"() : () -> ()
    %107 = arith.addf %106, %16 : vector<2x8x8xf32>
    %cst_40 = arith.constant dense<0xFF800000> : vector<2x8xf32>
    %108 = vector.multi_reduction <maximumf>, %107, %cst_40 [2] : vector<2x8x8xf32> to vector<2x8xf32>
    %109 = vector.shape_cast %108 : vector<2x8xf32> to vector<2x8x1xf32>
    %110 = vector.broadcast %109 : vector<2x8x1xf32> to vector<2x8x8xf32>
    %111 = arith.subf %107, %110 : vector<2x8x8xf32>
    %112 = math.exp %111 : vector<2x8x8xf32>
    %cst_41 = arith.constant dense<0.000000e+00> : vector<2x8xf32>
    %113 = vector.multi_reduction <add>, %112, %cst_41 [2] : vector<2x8x8xf32> to vector<2x8xf32>
    %114 = vector.shape_cast %113 : vector<2x8xf32> to vector<2x8x1xf32>
    %115 = vector.broadcast %114 : vector<2x8x1xf32> to vector<2x8x8xf32>
    %116 = arith.divf %112, %115 : vector<2x8x8xf32>
    "tpu.trace_start"() <{level = 10 : i32, message = "bqk,bkd->bqd"}> : () -> ()
    %cst_42 = arith.constant dense<0.000000e+00> : vector<2x8x8xf32>
    %117 = tpu.matmul %116, %105, %cst_42 {dimension_numbers = #tpu.dot_dimension_numbers<[2], [1], [1], [2], [0, 0, 0, 1, 1, 2], [0], [0]>} : vector<2x8x8xf32>, vector<2x8x8xf32>, vector<2x8x8xf32> -> vector<2x8x8xf32>
    "tpu.trace_stop"() : () -> ()
    %118 = vector.shape_cast %117 : vector<2x8x8xf32> to vector<16x8xf32>
    %119 = vector.extract_strided_slice %30 {offsets = [24, 0], sizes = [8, 32], strides = [1, 1]} : vector<32x32xf32> to vector<8x32xf32>
    %cst_43 = arith.constant dense<0.000000e+00> : vector<16x32xf32>
    %120 = tpu.matmul %118, %119, %cst_43 {dimension_numbers = #tpu.dot_dimension_numbers<[1], [0], [0], [1], [0, 0, 1, 1], [], []>} : vector<16x8xf32>, vector<8x32xf32>, vector<16x32xf32> -> vector<16x32xf32>
    %121 = arith.addf %99, %120 : vector<16x32xf32>
    %122 = arith.addf %12, %121 : vector<16x32xf32>
    %c0_44 = arith.constant 0 : index
    %c0_45 = arith.constant 0 : index
    %c0_46 = arith.constant 0 : index
    %123 = vector.load %arg9[%c0_44, %c0_45, %c0_46] : memref<2x1x32xf32, #tpu.memory_space<vmem>>, vector<1x1x32xf32>
    %124 = vector.shape_cast %123 : vector<1x1x32xf32> to vector<1x32xf32>
    %c0_47 = arith.constant 0 : index
    %c0_48 = arith.constant 0 : index
    %c0_49 = arith.constant 0 : index
    %125 = vector.load %arg10[%c0_47, %c0_48, %c0_49] : memref<2x1x32xf32, #tpu.memory_space<vmem>>, vector<1x1x32xf32>
    %126 = vector.shape_cast %125 : vector<1x1x32xf32> to vector<1x32xf32>
    %cst_50 = arith.constant dense<0.000000e+00> : vector<16xf32>
    %127 = vector.multi_reduction <add>, %122, %cst_50 [1] : vector<16x32xf32> to vector<16xf32>
    %128 = vector.shape_cast %127 : vector<16xf32> to vector<16x1xf32>
    %cst_51 = arith.constant 3.200000e+01 : f32
    %129 = vector.broadcast %cst_51 : f32 to vector<16x1xf32>
    %130 = arith.divf %128, %129 : vector<16x1xf32>
    %131 = vector.broadcast %130 : vector<16x1xf32> to vector<16x32xf32>
    %132 = arith.subf %122, %131 : vector<16x32xf32>
    %133 = arith.mulf %132, %132 : vector<16x32xf32>
    %cst_52 = arith.constant dense<0.000000e+00> : vector<16xf32>
    %134 = vector.multi_reduction <add>, %133, %cst_52 [1] : vector<16x32xf32> to vector<16xf32>
    %135 = vector.shape_cast %134 : vector<16xf32> to vector<16x1xf32>
    %cst_53 = arith.constant 3.200000e+01 : f32
    %136 = vector.broadcast %cst_53 : f32 to vector<16x1xf32>
    %137 = arith.divf %135, %136 : vector<16x1xf32>
    %cst_54 = arith.constant 9.99999974E-6 : f32
    %138 = vector.broadcast %cst_54 : f32 to vector<16x1xf32>
    %139 = arith.addf %137, %138 : vector<16x1xf32>
    %140 = math.rsqrt %139 : vector<16x1xf32>
    %141 = vector.broadcast %140 : vector<16x1xf32> to vector<16x32xf32>
    %142 = arith.mulf %132, %141 : vector<16x32xf32>
    %143 = vector.broadcast %124 : vector<1x32xf32> to vector<16x32xf32>
    %144 = arith.mulf %142, %143 : vector<16x32xf32>
    %145 = vector.broadcast %126 : vector<1x32xf32> to vector<16x32xf32>
    %146 = arith.addf %144, %145 : vector<16x32xf32>
    %c0_55 = arith.constant 0 : index
    %c0_56 = arith.constant 0 : index
    %c0_57 = arith.constant 0 : index
    %147 = vector.load %arg11[%c0_55, %c0_56, %c0_57] : memref<2x32x64xf32, #tpu.memory_space<vmem>>, vector<1x32x64xf32>
    %148 = vector.shape_cast %147 : vector<1x32x64xf32> to vector<32x64xf32>
    %cst_58 = arith.constant dense<0.000000e+00> : vector<16x64xf32>
    %149 = tpu.matmul %146, %148, %cst_58 {dimension_numbers = #tpu.dot_dimension_numbers<[1], [0], [0], [1], [0, 0, 1, 1], [], []>} : vector<16x32xf32>, vector<32x64xf32>, vector<16x64xf32> -> vector<16x64xf32>
    %c0_59 = arith.constant 0 : index
    %c0_60 = arith.constant 0 : index
    %c0_61 = arith.constant 0 : index
    %150 = vector.load %arg12[%c0_59, %c0_60, %c0_61] : memref<2x1x64xf32, #tpu.memory_space<vmem>>, vector<1x1x64xf32>
    %151 = vector.shape_cast %150 : vector<1x1x64xf32> to vector<1x64xf32>
    %152 = vector.broadcast %151 : vector<1x64xf32> to vector<16x64xf32>
    %153 = arith.addf %149, %152 : vector<16x64xf32>
    %cst_62 = arith.constant 0.000000e+00 : f32
    %154 = vector.broadcast %cst_62 : f32 to vector<16x64xf32>
    %155 = arith.maximumf %153, %154 : vector<16x64xf32>
    %c0_63 = arith.constant 0 : index
    %c0_64 = arith.constant 0 : index
    %c0_65 = arith.constant 0 : index
    %156 = vector.load %arg13[%c0_63, %c0_64, %c0_65] : memref<2x64x32xf32, #tpu.memory_space<vmem>>, vector<1x64x32xf32>
    %157 = vector.shape_cast %156 : vector<1x64x32xf32> to vector<64x32xf32>
    %cst_66 = arith.constant dense<0.000000e+00> : vector<16x32xf32>
    %158 = tpu.matmul %155, %157, %cst_66 {dimension_numbers = #tpu.dot_dimension_numbers<[1], [0], [0], [1], [0, 0, 1, 1], [], []>} : vector<16x64xf32>, vector<64x32xf32>, vector<16x32xf32> -> vector<16x32xf32>
    %c0_67 = arith.constant 0 : index
    %c0_68 = arith.constant 0 : index
    %c0_69 = arith.constant 0 : index
    %159 = vector.load %arg14[%c0_67, %c0_68, %c0_69] : memref<2x1x32xf32, #tpu.memory_space<vmem>>, vector<1x1x32xf32>
    %160 = vector.shape_cast %159 : vector<1x1x32xf32> to vector<1x32xf32>
    %161 = vector.broadcast %160 : vector<1x32xf32> to vector<16x32xf32>
    %162 = arith.addf %158, %161 : vector<16x32xf32>
    %163 = arith.addf %146, %162 : vector<16x32xf32>
    %c0_70 = arith.constant 0 : index
    %c0_71 = arith.constant 0 : index
    %c0_72 = arith.constant 0 : index
    %164 = vector.load %arg15[%c0_70, %c0_71, %c0_72] : memref<2x1x32xf32, #tpu.memory_space<vmem>>, vector<1x1x32xf32>
    %165 = vector.shape_cast %164 : vector<1x1x32xf32> to vector<1x32xf32>
    %c0_73 = arith.constant 0 : index
    %c0_74 = arith.constant 0 : index
    %c0_75 = arith.constant 0 : index
    %166 = vector.load %arg16[%c0_73, %c0_74, %c0_75] : memref<2x1x32xf32, #tpu.memory_space<vmem>>, vector<1x1x32xf32>
    %167 = vector.shape_cast %166 : vector<1x1x32xf32> to vector<1x32xf32>
    %cst_76 = arith.constant dense<0.000000e+00> : vector<16xf32>
    %168 = vector.multi_reduction <add>, %163, %cst_76 [1] : vector<16x32xf32> to vector<16xf32>
    %169 = vector.shape_cast %168 : vector<16xf32> to vector<16x1xf32>
    %cst_77 = arith.constant 3.200000e+01 : f32
    %170 = vector.broadcast %cst_77 : f32 to vector<16x1xf32>
    %171 = arith.divf %169, %170 : vector<16x1xf32>
    %172 = vector.broadcast %171 : vector<16x1xf32> to vector<16x32xf32>
    %173 = arith.subf %163, %172 : vector<16x32xf32>
    %174 = arith.mulf %173, %173 : vector<16x32xf32>
    %cst_78 = arith.constant dense<0.000000e+00> : vector<16xf32>
    %175 = vector.multi_reduction <add>, %174, %cst_78 [1] : vector<16x32xf32> to vector<16xf32>
    %176 = vector.shape_cast %175 : vector<16xf32> to vector<16x1xf32>
    %cst_79 = arith.constant 3.200000e+01 : f32
    %177 = vector.broadcast %cst_79 : f32 to vector<16x1xf32>
    %178 = arith.divf %176, %177 : vector<16x1xf32>
    %cst_80 = arith.constant 9.99999974E-6 : f32
    %179 = vector.broadcast %cst_80 : f32 to vector<16x1xf32>
    %180 = arith.addf %178, %179 : vector<16x1xf32>
    %181 = math.rsqrt %180 : vector<16x1xf32>
    %182 = vector.broadcast %181 : vector<16x1xf32> to vector<16x32xf32>
    %183 = arith.mulf %173, %182 : vector<16x32xf32>
    %184 = vector.broadcast %165 : vector<1x32xf32> to vector<16x32xf32>
    %185 = arith.mulf %183, %184 : vector<16x32xf32>
    %186 = vector.broadcast %167 : vector<1x32xf32> to vector<16x32xf32>
    %187 = arith.addf %185, %186 : vector<16x32xf32>
    %c1 = arith.constant 1 : index
    %c0_81 = arith.constant 0 : index
    %c0_82 = arith.constant 0 : index
    %188 = vector.load %arg5[%c1, %c0_81, %c0_82] : memref<2x32x96xf32, #tpu.memory_space<vmem>>, vector<1x32x96xf32>
    %189 = vector.shape_cast %188 : vector<1x32x96xf32> to vector<32x96xf32>
    %cst_83 = arith.constant dense<0.000000e+00> : vector<16x96xf32>
    %190 = tpu.matmul %187, %189, %cst_83 {dimension_numbers = #tpu.dot_dimension_numbers<[1], [0], [0], [1], [0, 0, 1, 1], [], []>} : vector<16x32xf32>, vector<32x96xf32>, vector<16x96xf32> -> vector<16x96xf32>
    %c1_84 = arith.constant 1 : index
    %c0_85 = arith.constant 0 : index
    %c0_86 = arith.constant 0 : index
    %191 = vector.load %arg6[%c1_84, %c0_85, %c0_86] : memref<2x1x96xf32, #tpu.memory_space<vmem>>, vector<1x1x96xf32>
    %192 = vector.shape_cast %191 : vector<1x1x96xf32> to vector<1x96xf32>
    %193 = vector.broadcast %192 : vector<1x96xf32> to vector<16x96xf32>
    %194 = arith.addf %190, %193 : vector<16x96xf32>
    %195 = vector.extract_strided_slice %194 {offsets = [0, 0], sizes = [16, 32], strides = [1, 1]} : vector<16x96xf32> to vector<16x32xf32>
    %cst_87 = arith.constant 0.353553385 : f32
    %196 = vector.broadcast %cst_87 : f32 to vector<16x32xf32>
    %197 = arith.mulf %195, %196 : vector<16x32xf32>
    %198 = vector.extract_strided_slice %194 {offsets = [0, 32], sizes = [16, 32], strides = [1, 1]} : vector<16x96xf32> to vector<16x32xf32>
    %199 = vector.extract_strided_slice %194 {offsets = [0, 64], sizes = [16, 32], strides = [1, 1]} : vector<16x96xf32> to vector<16x32xf32>
    %c1_88 = arith.constant 1 : index
    %c0_89 = arith.constant 0 : index
    %c0_90 = arith.constant 0 : index
    %200 = vector.load %arg7[%c1_88, %c0_89, %c0_90] : memref<2x32x32xf32, #tpu.memory_space<vmem>>, vector<1x32x32xf32>
    %201 = vector.shape_cast %200 : vector<1x32x32xf32> to vector<32x32xf32>
    %c1_91 = arith.constant 1 : index
    %c0_92 = arith.constant 0 : index
    %c0_93 = arith.constant 0 : index
    %202 = vector.load %arg8[%c1_91, %c0_92, %c0_93] : memref<2x1x32xf32, #tpu.memory_space<vmem>>, vector<1x1x32xf32>
    %203 = vector.shape_cast %202 : vector<1x1x32xf32> to vector<1x32xf32>
    %204 = vector.extract_strided_slice %197 {offsets = [0, 0], sizes = [16, 8], strides = [1, 1]} : vector<16x32xf32> to vector<16x8xf32>
    %205 = vector.shape_cast %204 : vector<16x8xf32> to vector<2x8x8xf32>
    %206 = vector.extract_strided_slice %198 {offsets = [0, 0], sizes = [16, 8], strides = [1, 1]} : vector<16x32xf32> to vector<16x8xf32>
    %207 = vector.shape_cast %206 : vector<16x8xf32> to vector<2x8x8xf32>
    %208 = vector.extract_strided_slice %199 {offsets = [0, 0], sizes = [16, 8], strides = [1, 1]} : vector<16x32xf32> to vector<16x8xf32>
    %209 = vector.shape_cast %208 : vector<16x8xf32> to vector<2x8x8xf32>
    "tpu.trace_start"() <{level = 10 : i32, message = "bqd,bkd->bqk"}> : () -> ()
    %cst_94 = arith.constant dense<0.000000e+00> : vector<2x8x8xf32>
    %210 = tpu.matmul %205, %207, %cst_94 {dimension_numbers = #tpu.dot_dimension_numbers<[2], [2], [1], [1], [0, 0, 0, 1, 1, 1], [0], [0]>} : vector<2x8x8xf32>, vector<2x8x8xf32>, vector<2x8x8xf32> -> vector<2x8x8xf32>
    "tpu.trace_stop"() : () -> ()
    %211 = arith.addf %210, %16 : vector<2x8x8xf32>
    %cst_95 = arith.constant dense<0xFF800000> : vector<2x8xf32>
    %212 = vector.multi_reduction <maximumf>, %211, %cst_95 [2] : vector<2x8x8xf32> to vector<2x8xf32>
    %213 = vector.shape_cast %212 : vector<2x8xf32> to vector<2x8x1xf32>
    %214 = vector.broadcast %213 : vector<2x8x1xf32> to vector<2x8x8xf32>
    %215 = arith.subf %211, %214 : vector<2x8x8xf32>
    %216 = math.exp %215 : vector<2x8x8xf32>
    %cst_96 = arith.constant dense<0.000000e+00> : vector<2x8xf32>
    %217 = vector.multi_reduction <add>, %216, %cst_96 [2] : vector<2x8x8xf32> to vector<2x8xf32>
    %218 = vector.shape_cast %217 : vector<2x8xf32> to vector<2x8x1xf32>
    %219 = vector.broadcast %218 : vector<2x8x1xf32> to vector<2x8x8xf32>
    %220 = arith.divf %216, %219 : vector<2x8x8xf32>
    "tpu.trace_start"() <{level = 10 : i32, message = "bqk,bkd->bqd"}> : () -> ()
    %cst_97 = arith.constant dense<0.000000e+00> : vector<2x8x8xf32>
    %221 = tpu.matmul %220, %209, %cst_97 {dimension_numbers = #tpu.dot_dimension_numbers<[2], [1], [1], [2], [0, 0, 0, 1, 1, 2], [0], [0]>} : vector<2x8x8xf32>, vector<2x8x8xf32>, vector<2x8x8xf32> -> vector<2x8x8xf32>
    "tpu.trace_stop"() : () -> ()
    %222 = vector.shape_cast %221 : vector<2x8x8xf32> to vector<16x8xf32>
    %223 = vector.extract_strided_slice %201 {offsets = [0, 0], sizes = [8, 32], strides = [1, 1]} : vector<32x32xf32> to vector<8x32xf32>
    %cst_98 = arith.constant dense<0.000000e+00> : vector<16x32xf32>
    %224 = tpu.matmul %222, %223, %cst_98 {dimension_numbers = #tpu.dot_dimension_numbers<[1], [0], [0], [1], [0, 0, 1, 1], [], []>} : vector<16x8xf32>, vector<8x32xf32>, vector<16x32xf32> -> vector<16x32xf32>
    %225 = vector.broadcast %203 : vector<1x32xf32> to vector<16x32xf32>
    %226 = arith.addf %225, %224 : vector<16x32xf32>
    %227 = vector.extract_strided_slice %197 {offsets = [0, 8], sizes = [16, 8], strides = [1, 1]} : vector<16x32xf32> to vector<16x8xf32>
    %228 = vector.shape_cast %227 : vector<16x8xf32> to vector<2x8x8xf32>
    %229 = vector.extract_strided_slice %198 {offsets = [0, 8], sizes = [16, 8], strides = [1, 1]} : vector<16x32xf32> to vector<16x8xf32>
    %230 = vector.shape_cast %229 : vector<16x8xf32> to vector<2x8x8xf32>
    %231 = vector.extract_strided_slice %199 {offsets = [0, 8], sizes = [16, 8], strides = [1, 1]} : vector<16x32xf32> to vector<16x8xf32>
    %232 = vector.shape_cast %231 : vector<16x8xf32> to vector<2x8x8xf32>
    "tpu.trace_start"() <{level = 10 : i32, message = "bqd,bkd->bqk"}> : () -> ()
    %cst_99 = arith.constant dense<0.000000e+00> : vector<2x8x8xf32>
    %233 = tpu.matmul %228, %230, %cst_99 {dimension_numbers = #tpu.dot_dimension_numbers<[2], [2], [1], [1], [0, 0, 0, 1, 1, 1], [0], [0]>} : vector<2x8x8xf32>, vector<2x8x8xf32>, vector<2x8x8xf32> -> vector<2x8x8xf32>
    "tpu.trace_stop"() : () -> ()
    %234 = arith.addf %233, %16 : vector<2x8x8xf32>
    %cst_100 = arith.constant dense<0xFF800000> : vector<2x8xf32>
    %235 = vector.multi_reduction <maximumf>, %234, %cst_100 [2] : vector<2x8x8xf32> to vector<2x8xf32>
    %236 = vector.shape_cast %235 : vector<2x8xf32> to vector<2x8x1xf32>
    %237 = vector.broadcast %236 : vector<2x8x1xf32> to vector<2x8x8xf32>
    %238 = arith.subf %234, %237 : vector<2x8x8xf32>
    %239 = math.exp %238 : vector<2x8x8xf32>
    %cst_101 = arith.constant dense<0.000000e+00> : vector<2x8xf32>
    %240 = vector.multi_reduction <add>, %239, %cst_101 [2] : vector<2x8x8xf32> to vector<2x8xf32>
    %241 = vector.shape_cast %240 : vector<2x8xf32> to vector<2x8x1xf32>
    %242 = vector.broadcast %241 : vector<2x8x1xf32> to vector<2x8x8xf32>
    %243 = arith.divf %239, %242 : vector<2x8x8xf32>
    "tpu.trace_start"() <{level = 10 : i32, message = "bqk,bkd->bqd"}> : () -> ()
    %cst_102 = arith.constant dense<0.000000e+00> : vector<2x8x8xf32>
    %244 = tpu.matmul %243, %232, %cst_102 {dimension_numbers = #tpu.dot_dimension_numbers<[2], [1], [1], [2], [0, 0, 0, 1, 1, 2], [0], [0]>} : vector<2x8x8xf32>, vector<2x8x8xf32>, vector<2x8x8xf32> -> vector<2x8x8xf32>
    "tpu.trace_stop"() : () -> ()
    %245 = vector.shape_cast %244 : vector<2x8x8xf32> to vector<16x8xf32>
    %246 = vector.extract_strided_slice %201 {offsets = [8, 0], sizes = [8, 32], strides = [1, 1]} : vector<32x32xf32> to vector<8x32xf32>
    %cst_103 = arith.constant dense<0.000000e+00> : vector<16x32xf32>
    %247 = tpu.matmul %245, %246, %cst_103 {dimension_numbers = #tpu.dot_dimension_numbers<[1], [0], [0], [1], [0, 0, 1, 1], [], []>} : vector<16x8xf32>, vector<8x32xf32>, vector<16x32xf32> -> vector<16x32xf32>
    %248 = arith.addf %226, %247 : vector<16x32xf32>
    %249 = vector.extract_strided_slice %197 {offsets = [0, 16], sizes = [16, 8], strides = [1, 1]} : vector<16x32xf32> to vector<16x8xf32>
    %250 = vector.shape_cast %249 : vector<16x8xf32> to vector<2x8x8xf32>
    %251 = vector.extract_strided_slice %198 {offsets = [0, 16], sizes = [16, 8], strides = [1, 1]} : vector<16x32xf32> to vector<16x8xf32>
    %252 = vector.shape_cast %251 : vector<16x8xf32> to vector<2x8x8xf32>
    %253 = vector.extract_strided_slice %199 {offsets = [0, 16], sizes = [16, 8], strides = [1, 1]} : vector<16x32xf32> to vector<16x8xf32>
    %254 = vector.shape_cast %253 : vector<16x8xf32> to vector<2x8x8xf32>
    "tpu.trace_start"() <{level = 10 : i32, message = "bqd,bkd->bqk"}> : () -> ()
    %cst_104 = arith.constant dense<0.000000e+00> : vector<2x8x8xf32>
    %255 = tpu.matmul %250, %252, %cst_104 {dimension_numbers = #tpu.dot_dimension_numbers<[2], [2], [1], [1], [0, 0, 0, 1, 1, 1], [0], [0]>} : vector<2x8x8xf32>, vector<2x8x8xf32>, vector<2x8x8xf32> -> vector<2x8x8xf32>
    "tpu.trace_stop"() : () -> ()
    %256 = arith.addf %255, %16 : vector<2x8x8xf32>
    %cst_105 = arith.constant dense<0xFF800000> : vector<2x8xf32>
    %257 = vector.multi_reduction <maximumf>, %256, %cst_105 [2] : vector<2x8x8xf32> to vector<2x8xf32>
    %258 = vector.shape_cast %257 : vector<2x8xf32> to vector<2x8x1xf32>
    %259 = vector.broadcast %258 : vector<2x8x1xf32> to vector<2x8x8xf32>
    %260 = arith.subf %256, %259 : vector<2x8x8xf32>
    %261 = math.exp %260 : vector<2x8x8xf32>
    %cst_106 = arith.constant dense<0.000000e+00> : vector<2x8xf32>
    %262 = vector.multi_reduction <add>, %261, %cst_106 [2] : vector<2x8x8xf32> to vector<2x8xf32>
    %263 = vector.shape_cast %262 : vector<2x8xf32> to vector<2x8x1xf32>
    %264 = vector.broadcast %263 : vector<2x8x1xf32> to vector<2x8x8xf32>
    %265 = arith.divf %261, %264 : vector<2x8x8xf32>
    "tpu.trace_start"() <{level = 10 : i32, message = "bqk,bkd->bqd"}> : () -> ()
    %cst_107 = arith.constant dense<0.000000e+00> : vector<2x8x8xf32>
    %266 = tpu.matmul %265, %254, %cst_107 {dimension_numbers = #tpu.dot_dimension_numbers<[2], [1], [1], [2], [0, 0, 0, 1, 1, 2], [0], [0]>} : vector<2x8x8xf32>, vector<2x8x8xf32>, vector<2x8x8xf32> -> vector<2x8x8xf32>
    "tpu.trace_stop"() : () -> ()
    %267 = vector.shape_cast %266 : vector<2x8x8xf32> to vector<16x8xf32>
    %268 = vector.extract_strided_slice %201 {offsets = [16, 0], sizes = [8, 32], strides = [1, 1]} : vector<32x32xf32> to vector<8x32xf32>
    %cst_108 = arith.constant dense<0.000000e+00> : vector<16x32xf32>
    %269 = tpu.matmul %267, %268, %cst_108 {dimension_numbers = #tpu.dot_dimension_numbers<[1], [0], [0], [1], [0, 0, 1, 1], [], []>} : vector<16x8xf32>, vector<8x32xf32>, vector<16x32xf32> -> vector<16x32xf32>
    %270 = arith.addf %248, %269 : vector<16x32xf32>
    %271 = vector.extract_strided_slice %197 {offsets = [0, 24], sizes = [16, 8], strides = [1, 1]} : vector<16x32xf32> to vector<16x8xf32>
    %272 = vector.shape_cast %271 : vector<16x8xf32> to vector<2x8x8xf32>
    %273 = vector.extract_strided_slice %198 {offsets = [0, 24], sizes = [16, 8], strides = [1, 1]} : vector<16x32xf32> to vector<16x8xf32>
    %274 = vector.shape_cast %273 : vector<16x8xf32> to vector<2x8x8xf32>
    %275 = vector.extract_strided_slice %199 {offsets = [0, 24], sizes = [16, 8], strides = [1, 1]} : vector<16x32xf32> to vector<16x8xf32>
    %276 = vector.shape_cast %275 : vector<16x8xf32> to vector<2x8x8xf32>
    "tpu.trace_start"() <{level = 10 : i32, message = "bqd,bkd->bqk"}> : () -> ()
    %cst_109 = arith.constant dense<0.000000e+00> : vector<2x8x8xf32>
    %277 = tpu.matmul %272, %274, %cst_109 {dimension_numbers = #tpu.dot_dimension_numbers<[2], [2], [1], [1], [0, 0, 0, 1, 1, 1], [0], [0]>} : vector<2x8x8xf32>, vector<2x8x8xf32>, vector<2x8x8xf32> -> vector<2x8x8xf32>
    "tpu.trace_stop"() : () -> ()
    %278 = arith.addf %277, %16 : vector<2x8x8xf32>
    %cst_110 = arith.constant dense<0xFF800000> : vector<2x8xf32>
    %279 = vector.multi_reduction <maximumf>, %278, %cst_110 [2] : vector<2x8x8xf32> to vector<2x8xf32>
    %280 = vector.shape_cast %279 : vector<2x8xf32> to vector<2x8x1xf32>
    %281 = vector.broadcast %280 : vector<2x8x1xf32> to vector<2x8x8xf32>
    %282 = arith.subf %278, %281 : vector<2x8x8xf32>
    %283 = math.exp %282 : vector<2x8x8xf32>
    %cst_111 = arith.constant dense<0.000000e+00> : vector<2x8xf32>
    %284 = vector.multi_reduction <add>, %283, %cst_111 [2] : vector<2x8x8xf32> to vector<2x8xf32>
    %285 = vector.shape_cast %284 : vector<2x8xf32> to vector<2x8x1xf32>
    %286 = vector.broadcast %285 : vector<2x8x1xf32> to vector<2x8x8xf32>
    %287 = arith.divf %283, %286 : vector<2x8x8xf32>
    "tpu.trace_start"() <{level = 10 : i32, message = "bqk,bkd->bqd"}> : () -> ()
    %cst_112 = arith.constant dense<0.000000e+00> : vector<2x8x8xf32>
    %288 = tpu.matmul %287, %276, %cst_112 {dimension_numbers = #tpu.dot_dimension_numbers<[2], [1], [1], [2], [0, 0, 0, 1, 1, 2], [0], [0]>} : vector<2x8x8xf32>, vector<2x8x8xf32>, vector<2x8x8xf32> -> vector<2x8x8xf32>
    "tpu.trace_stop"() : () -> ()
    %289 = vector.shape_cast %288 : vector<2x8x8xf32> to vector<16x8xf32>
    %290 = vector.extract_strided_slice %201 {offsets = [24, 0], sizes = [8, 32], strides = [1, 1]} : vector<32x32xf32> to vector<8x32xf32>
    %cst_113 = arith.constant dense<0.000000e+00> : vector<16x32xf32>
    %291 = tpu.matmul %289, %290, %cst_113 {dimension_numbers = #tpu.dot_dimension_numbers<[1], [0], [0], [1], [0, 0, 1, 1], [], []>} : vector<16x8xf32>, vector<8x32xf32>, vector<16x32xf32> -> vector<16x32xf32>
    %292 = arith.addf %270, %291 : vector<16x32xf32>
    %293 = arith.addf %187, %292 : vector<16x32xf32>
    %c1_114 = arith.constant 1 : index
    %c0_115 = arith.constant 0 : index
    %c0_116 = arith.constant 0 : index
    %294 = vector.load %arg9[%c1_114, %c0_115, %c0_116] : memref<2x1x32xf32, #tpu.memory_space<vmem>>, vector<1x1x32xf32>
    %295 = vector.shape_cast %294 : vector<1x1x32xf32> to vector<1x32xf32>
    %c1_117 = arith.constant 1 : index
    %c0_118 = arith.constant 0 : index
    %c0_119 = arith.constant 0 : index
    %296 = vector.load %arg10[%c1_117, %c0_118, %c0_119] : memref<2x1x32xf32, #tpu.memory_space<vmem>>, vector<1x1x32xf32>
    %297 = vector.shape_cast %296 : vector<1x1x32xf32> to vector<1x32xf32>
    %cst_120 = arith.constant dense<0.000000e+00> : vector<16xf32>
    %298 = vector.multi_reduction <add>, %293, %cst_120 [1] : vector<16x32xf32> to vector<16xf32>
    %299 = vector.shape_cast %298 : vector<16xf32> to vector<16x1xf32>
    %cst_121 = arith.constant 3.200000e+01 : f32
    %300 = vector.broadcast %cst_121 : f32 to vector<16x1xf32>
    %301 = arith.divf %299, %300 : vector<16x1xf32>
    %302 = vector.broadcast %301 : vector<16x1xf32> to vector<16x32xf32>
    %303 = arith.subf %293, %302 : vector<16x32xf32>
    %304 = arith.mulf %303, %303 : vector<16x32xf32>
    %cst_122 = arith.constant dense<0.000000e+00> : vector<16xf32>
    %305 = vector.multi_reduction <add>, %304, %cst_122 [1] : vector<16x32xf32> to vector<16xf32>
    %306 = vector.shape_cast %305 : vector<16xf32> to vector<16x1xf32>
    %cst_123 = arith.constant 3.200000e+01 : f32
    %307 = vector.broadcast %cst_123 : f32 to vector<16x1xf32>
    %308 = arith.divf %306, %307 : vector<16x1xf32>
    %cst_124 = arith.constant 9.99999974E-6 : f32
    %309 = vector.broadcast %cst_124 : f32 to vector<16x1xf32>
    %310 = arith.addf %308, %309 : vector<16x1xf32>
    %311 = math.rsqrt %310 : vector<16x1xf32>
    %312 = vector.broadcast %311 : vector<16x1xf32> to vector<16x32xf32>
    %313 = arith.mulf %303, %312 : vector<16x32xf32>
    %314 = vector.broadcast %295 : vector<1x32xf32> to vector<16x32xf32>
    %315 = arith.mulf %313, %314 : vector<16x32xf32>
    %316 = vector.broadcast %297 : vector<1x32xf32> to vector<16x32xf32>
    %317 = arith.addf %315, %316 : vector<16x32xf32>
    %c1_125 = arith.constant 1 : index
    %c0_126 = arith.constant 0 : index
    %c0_127 = arith.constant 0 : index
    %318 = vector.load %arg11[%c1_125, %c0_126, %c0_127] : memref<2x32x64xf32, #tpu.memory_space<vmem>>, vector<1x32x64xf32>
    %319 = vector.shape_cast %318 : vector<1x32x64xf32> to vector<32x64xf32>
    %cst_128 = arith.constant dense<0.000000e+00> : vector<16x64xf32>
    %320 = tpu.matmul %317, %319, %cst_128 {dimension_numbers = #tpu.dot_dimension_numbers<[1], [0], [0], [1], [0, 0, 1, 1], [], []>} : vector<16x32xf32>, vector<32x64xf32>, vector<16x64xf32> -> vector<16x64xf32>
    %c1_129 = arith.constant 1 : index
    %c0_130 = arith.constant 0 : index
    %c0_131 = arith.constant 0 : index
    %321 = vector.load %arg12[%c1_129, %c0_130, %c0_131] : memref<2x1x64xf32, #tpu.memory_space<vmem>>, vector<1x1x64xf32>
    %322 = vector.shape_cast %321 : vector<1x1x64xf32> to vector<1x64xf32>
    %323 = vector.broadcast %322 : vector<1x64xf32> to vector<16x64xf32>
    %324 = arith.addf %320, %323 : vector<16x64xf32>
    %cst_132 = arith.constant 0.000000e+00 : f32
    %325 = vector.broadcast %cst_132 : f32 to vector<16x64xf32>
    %326 = arith.maximumf %324, %325 : vector<16x64xf32>
    %c1_133 = arith.constant 1 : index
    %c0_134 = arith.constant 0 : index
    %c0_135 = arith.constant 0 : index
    %327 = vector.load %arg13[%c1_133, %c0_134, %c0_135] : memref<2x64x32xf32, #tpu.memory_space<vmem>>, vector<1x64x32xf32>
    %328 = vector.shape_cast %327 : vector<1x64x32xf32> to vector<64x32xf32>
    %cst_136 = arith.constant dense<0.000000e+00> : vector<16x32xf32>
    %329 = tpu.matmul %326, %328, %cst_136 {dimension_numbers = #tpu.dot_dimension_numbers<[1], [0], [0], [1], [0, 0, 1, 1], [], []>} : vector<16x64xf32>, vector<64x32xf32>, vector<16x32xf32> -> vector<16x32xf32>
    %c1_137 = arith.constant 1 : index
    %c0_138 = arith.constant 0 : index
    %c0_139 = arith.constant 0 : index
    %330 = vector.load %arg14[%c1_137, %c0_138, %c0_139] : memref<2x1x32xf32, #tpu.memory_space<vmem>>, vector<1x1x32xf32>
    %331 = vector.shape_cast %330 : vector<1x1x32xf32> to vector<1x32xf32>
    %332 = vector.broadcast %331 : vector<1x32xf32> to vector<16x32xf32>
    %333 = arith.addf %329, %332 : vector<16x32xf32>
    %334 = arith.addf %317, %333 : vector<16x32xf32>
    %c1_140 = arith.constant 1 : index
    %c0_141 = arith.constant 0 : index
    %c0_142 = arith.constant 0 : index
    %335 = vector.load %arg15[%c1_140, %c0_141, %c0_142] : memref<2x1x32xf32, #tpu.memory_space<vmem>>, vector<1x1x32xf32>
    %336 = vector.shape_cast %335 : vector<1x1x32xf32> to vector<1x32xf32>
    %c1_143 = arith.constant 1 : index
    %c0_144 = arith.constant 0 : index
    %c0_145 = arith.constant 0 : index
    %337 = vector.load %arg16[%c1_143, %c0_144, %c0_145] : memref<2x1x32xf32, #tpu.memory_space<vmem>>, vector<1x1x32xf32>
    %338 = vector.shape_cast %337 : vector<1x1x32xf32> to vector<1x32xf32>
    %cst_146 = arith.constant dense<0.000000e+00> : vector<16xf32>
    %339 = vector.multi_reduction <add>, %334, %cst_146 [1] : vector<16x32xf32> to vector<16xf32>
    %340 = vector.shape_cast %339 : vector<16xf32> to vector<16x1xf32>
    %cst_147 = arith.constant 3.200000e+01 : f32
    %341 = vector.broadcast %cst_147 : f32 to vector<16x1xf32>
    %342 = arith.divf %340, %341 : vector<16x1xf32>
    %343 = vector.broadcast %342 : vector<16x1xf32> to vector<16x32xf32>
    %344 = arith.subf %334, %343 : vector<16x32xf32>
    %345 = arith.mulf %344, %344 : vector<16x32xf32>
    %cst_148 = arith.constant dense<0.000000e+00> : vector<16xf32>
    %346 = vector.multi_reduction <add>, %345, %cst_148 [1] : vector<16x32xf32> to vector<16xf32>
    %347 = vector.shape_cast %346 : vector<16xf32> to vector<16x1xf32>
    %cst_149 = arith.constant 3.200000e+01 : f32
    %348 = vector.broadcast %cst_149 : f32 to vector<16x1xf32>
    %349 = arith.divf %347, %348 : vector<16x1xf32>
    %cst_150 = arith.constant 9.99999974E-6 : f32
    %350 = vector.broadcast %cst_150 : f32 to vector<16x1xf32>
    %351 = arith.addf %349, %350 : vector<16x1xf32>
    %352 = math.rsqrt %351 : vector<16x1xf32>
    %353 = vector.broadcast %352 : vector<16x1xf32> to vector<16x32xf32>
    %354 = arith.mulf %344, %353 : vector<16x32xf32>
    %355 = vector.broadcast %336 : vector<1x32xf32> to vector<16x32xf32>
    %356 = arith.mulf %354, %355 : vector<16x32xf32>
    %357 = vector.broadcast %338 : vector<1x32xf32> to vector<16x32xf32>
    %358 = arith.addf %356, %357 : vector<16x32xf32>
    %359 = vector.shape_cast %358 : vector<16x32xf32> to vector<2x8x32xf32>
    %c0_151 = arith.constant 0 : index
    %c0_152 = arith.constant 0 : index
    %360 = vector.load %arg18[%c0_151, %c0_152] : memref<1x512xf32, #tpu.memory_space<vmem>>, vector<1x512xf32>
    %361 = vector.extract_strided_slice %359 {offsets = [0, 0, 0], sizes = [2, 1, 32], strides = [1, 1, 1]} : vector<2x8x32xf32> to vector<2x1x32xf32>
    %362 = vector.shape_cast %361 : vector<2x1x32xf32> to vector<2x32xf32>
    %c0_153 = arith.constant 0 : index
    %c0_154 = arith.constant 0 : index
    %c0_155 = arith.constant 0 : index
    %363 = vector.load %arg17[%c0_153, %c0_154, %c0_155] : memref<8x32x512xf32, #tpu.memory_space<vmem>>, vector<1x32x512xf32>
    %364 = vector.shape_cast %363 : vector<1x32x512xf32> to vector<32x512xf32>
    %cst_156 = arith.constant dense<0.000000e+00> : vector<2x512xf32>
    %365 = tpu.matmul %362, %364, %cst_156 {dimension_numbers = #tpu.dot_dimension_numbers<[1], [0], [0], [1], [0, 0, 1, 1], [], []>} : vector<2x32xf32>, vector<32x512xf32>, vector<2x512xf32> -> vector<2x512xf32>
    %366 = vector.broadcast %360 : vector<1x512xf32> to vector<2x512xf32>
    %367 = arith.addf %366, %365 : vector<2x512xf32>
    %368 = vector.extract_strided_slice %359 {offsets = [0, 1, 0], sizes = [2, 1, 32], strides = [1, 1, 1]} : vector<2x8x32xf32> to vector<2x1x32xf32>
    %369 = vector.shape_cast %368 : vector<2x1x32xf32> to vector<2x32xf32>
    %c1_157 = arith.constant 1 : index
    %c0_158 = arith.constant 0 : index
    %c0_159 = arith.constant 0 : index
    %370 = vector.load %arg17[%c1_157, %c0_158, %c0_159] : memref<8x32x512xf32, #tpu.memory_space<vmem>>, vector<1x32x512xf32>
    %371 = vector.shape_cast %370 : vector<1x32x512xf32> to vector<32x512xf32>
    %cst_160 = arith.constant dense<0.000000e+00> : vector<2x512xf32>
    %372 = tpu.matmul %369, %371, %cst_160 {dimension_numbers = #tpu.dot_dimension_numbers<[1], [0], [0], [1], [0, 0, 1, 1], [], []>} : vector<2x32xf32>, vector<32x512xf32>, vector<2x512xf32> -> vector<2x512xf32>
    %373 = arith.addf %367, %372 : vector<2x512xf32>
    %374 = vector.extract_strided_slice %359 {offsets = [0, 2, 0], sizes = [2, 1, 32], strides = [1, 1, 1]} : vector<2x8x32xf32> to vector<2x1x32xf32>
    %375 = vector.shape_cast %374 : vector<2x1x32xf32> to vector<2x32xf32>
    %c2 = arith.constant 2 : index
    %c0_161 = arith.constant 0 : index
    %c0_162 = arith.constant 0 : index
    %376 = vector.load %arg17[%c2, %c0_161, %c0_162] : memref<8x32x512xf32, #tpu.memory_space<vmem>>, vector<1x32x512xf32>
    %377 = vector.shape_cast %376 : vector<1x32x512xf32> to vector<32x512xf32>
    %cst_163 = arith.constant dense<0.000000e+00> : vector<2x512xf32>
    %378 = tpu.matmul %375, %377, %cst_163 {dimension_numbers = #tpu.dot_dimension_numbers<[1], [0], [0], [1], [0, 0, 1, 1], [], []>} : vector<2x32xf32>, vector<32x512xf32>, vector<2x512xf32> -> vector<2x512xf32>
    %379 = arith.addf %373, %378 : vector<2x512xf32>
    %380 = vector.extract_strided_slice %359 {offsets = [0, 3, 0], sizes = [2, 1, 32], strides = [1, 1, 1]} : vector<2x8x32xf32> to vector<2x1x32xf32>
    %381 = vector.shape_cast %380 : vector<2x1x32xf32> to vector<2x32xf32>
    %c3 = arith.constant 3 : index
    %c0_164 = arith.constant 0 : index
    %c0_165 = arith.constant 0 : index
    %382 = vector.load %arg17[%c3, %c0_164, %c0_165] : memref<8x32x512xf32, #tpu.memory_space<vmem>>, vector<1x32x512xf32>
    %383 = vector.shape_cast %382 : vector<1x32x512xf32> to vector<32x512xf32>
    %cst_166 = arith.constant dense<0.000000e+00> : vector<2x512xf32>
    %384 = tpu.matmul %381, %383, %cst_166 {dimension_numbers = #tpu.dot_dimension_numbers<[1], [0], [0], [1], [0, 0, 1, 1], [], []>} : vector<2x32xf32>, vector<32x512xf32>, vector<2x512xf32> -> vector<2x512xf32>
    %385 = arith.addf %379, %384 : vector<2x512xf32>
    %386 = vector.extract_strided_slice %359 {offsets = [0, 4, 0], sizes = [2, 1, 32], strides = [1, 1, 1]} : vector<2x8x32xf32> to vector<2x1x32xf32>
    %387 = vector.shape_cast %386 : vector<2x1x32xf32> to vector<2x32xf32>
    %c4 = arith.constant 4 : index
    %c0_167 = arith.constant 0 : index
    %c0_168 = arith.constant 0 : index
    %388 = vector.load %arg17[%c4, %c0_167, %c0_168] : memref<8x32x512xf32, #tpu.memory_space<vmem>>, vector<1x32x512xf32>
    %389 = vector.shape_cast %388 : vector<1x32x512xf32> to vector<32x512xf32>
    %cst_169 = arith.constant dense<0.000000e+00> : vector<2x512xf32>
    %390 = tpu.matmul %387, %389, %cst_169 {dimension_numbers = #tpu.dot_dimension_numbers<[1], [0], [0], [1], [0, 0, 1, 1], [], []>} : vector<2x32xf32>, vector<32x512xf32>, vector<2x512xf32> -> vector<2x512xf32>
    %391 = arith.addf %385, %390 : vector<2x512xf32>
    %392 = vector.extract_strided_slice %359 {offsets = [0, 5, 0], sizes = [2, 1, 32], strides = [1, 1, 1]} : vector<2x8x32xf32> to vector<2x1x32xf32>
    %393 = vector.shape_cast %392 : vector<2x1x32xf32> to vector<2x32xf32>
    %c5 = arith.constant 5 : index
    %c0_170 = arith.constant 0 : index
    %c0_171 = arith.constant 0 : index
    %394 = vector.load %arg17[%c5, %c0_170, %c0_171] : memref<8x32x512xf32, #tpu.memory_space<vmem>>, vector<1x32x512xf32>
    %395 = vector.shape_cast %394 : vector<1x32x512xf32> to vector<32x512xf32>
    %cst_172 = arith.constant dense<0.000000e+00> : vector<2x512xf32>
    %396 = tpu.matmul %393, %395, %cst_172 {dimension_numbers = #tpu.dot_dimension_numbers<[1], [0], [0], [1], [0, 0, 1, 1], [], []>} : vector<2x32xf32>, vector<32x512xf32>, vector<2x512xf32> -> vector<2x512xf32>
    %397 = arith.addf %391, %396 : vector<2x512xf32>
    %398 = vector.extract_strided_slice %359 {offsets = [0, 6, 0], sizes = [2, 1, 32], strides = [1, 1, 1]} : vector<2x8x32xf32> to vector<2x1x32xf32>
    %399 = vector.shape_cast %398 : vector<2x1x32xf32> to vector<2x32xf32>
    %c6 = arith.constant 6 : index
    %c0_173 = arith.constant 0 : index
    %c0_174 = arith.constant 0 : index
    %400 = vector.load %arg17[%c6, %c0_173, %c0_174] : memref<8x32x512xf32, #tpu.memory_space<vmem>>, vector<1x32x512xf32>
    %401 = vector.shape_cast %400 : vector<1x32x512xf32> to vector<32x512xf32>
    %cst_175 = arith.constant dense<0.000000e+00> : vector<2x512xf32>
    %402 = tpu.matmul %399, %401, %cst_175 {dimension_numbers = #tpu.dot_dimension_numbers<[1], [0], [0], [1], [0, 0, 1, 1], [], []>} : vector<2x32xf32>, vector<32x512xf32>, vector<2x512xf32> -> vector<2x512xf32>
    %403 = arith.addf %397, %402 : vector<2x512xf32>
    %404 = vector.extract_strided_slice %359 {offsets = [0, 7, 0], sizes = [2, 1, 32], strides = [1, 1, 1]} : vector<2x8x32xf32> to vector<2x1x32xf32>
    %405 = vector.shape_cast %404 : vector<2x1x32xf32> to vector<2x32xf32>
    %c7 = arith.constant 7 : index
    %c0_176 = arith.constant 0 : index
    %c0_177 = arith.constant 0 : index
    %406 = vector.load %arg17[%c7, %c0_176, %c0_177] : memref<8x32x512xf32, #tpu.memory_space<vmem>>, vector<1x32x512xf32>
    %407 = vector.shape_cast %406 : vector<1x32x512xf32> to vector<32x512xf32>
    %cst_178 = arith.constant dense<0.000000e+00> : vector<2x512xf32>
    %408 = tpu.matmul %405, %407, %cst_178 {dimension_numbers = #tpu.dot_dimension_numbers<[1], [0], [0], [1], [0, 0, 1, 1], [], []>} : vector<2x32xf32>, vector<32x512xf32>, vector<2x512xf32> -> vector<2x512xf32>
    %409 = arith.addf %403, %408 : vector<2x512xf32>
    %c0_179 = arith.constant 0 : index
    %c0_180 = arith.constant 0 : index
    %410 = vector.load %arg19[%c0_179, %c0_180] : memref<512x64xf32, #tpu.memory_space<vmem>>, vector<512x64xf32>
    %cst_181 = arith.constant dense<0.000000e+00> : vector<2x64xf32>
    %411 = tpu.matmul %409, %410, %cst_181 {dimension_numbers = #tpu.dot_dimension_numbers<[1], [0], [0], [1], [0, 0, 1, 1], [], []>} : vector<2x512xf32>, vector<512x64xf32>, vector<2x64xf32> -> vector<2x64xf32>
    %c0_182 = arith.constant 0 : index
    %c0_183 = arith.constant 0 : index
    %412 = vector.load %arg20[%c0_182, %c0_183] : memref<1x64xf32, #tpu.memory_space<vmem>>, vector<1x64xf32>
    %413 = vector.broadcast %412 : vector<1x64xf32> to vector<2x64xf32>
    %414 = arith.addf %411, %413 : vector<2x64xf32>
    %c0_184 = arith.constant 0 : index
    %c0_185 = arith.constant 0 : index
    %415 = vector.load %arg21[%c0_184, %c0_185] : memref<64x128xf32, #tpu.memory_space<vmem>>, vector<64x128xf32>
    %cst_186 = arith.constant dense<0.000000e+00> : vector<2x128xf32>
    %416 = tpu.matmul %414, %415, %cst_186 {dimension_numbers = #tpu.dot_dimension_numbers<[1], [0], [0], [1], [0, 0, 1, 1], [], []>} : vector<2x64xf32>, vector<64x128xf32>, vector<2x128xf32> -> vector<2x128xf32>
    %c0_187 = arith.constant 0 : index
    %c0_188 = arith.constant 0 : index
    %417 = vector.load %arg22[%c0_187, %c0_188] : memref<1x128xf32, #tpu.memory_space<vmem>>, vector<1x128xf32>
    %418 = vector.broadcast %417 : vector<1x128xf32> to vector<2x128xf32>
    %419 = arith.addf %416, %418 : vector<2x128xf32>
    %c0_189 = arith.constant 0 : index
    %c0_190 = arith.constant 0 : index
    %420 = vector.load %arg23[%c0_189, %c0_190] : memref<2x128xf32, #tpu.memory_space<vmem>>, vector<2x128xf32>
    tpu.vector_store %arg23[%c0_189, %c0_190], %419 {strides = array<i32>} : memref<2x128xf32, #tpu.memory_space<vmem>>, vector<2x128xf32>,
    return
  }
}

</mosaic_0001>

<bundles_post_ra>
// kernel: forward.1
= control target key start
LH: loop header
LB: loop body
LE: loop exit
PB: predicated region body
PF: predicated region fallthrough
CT: control target
= control target key end

     0   :  { %s8149_s0 = inlined_call_operand.vmem [shape: f32[16,16], index: 0, kind: input, shape index: {}]   ;;  %s8150_s1 = inlined_call_operand.vmem [shape: f32[16,64], index: 1, kind: input, shape index: {}]   ;;  %s8151_s2 = inlined_call_operand.vmem [shape: f32[1,64], index: 2, kind: input, shape index: {}]   ;;  %s8152_s3 = inlined_call_operand.vmem [shape: f32[16,32], index: 3, kind: input, shape index: {}]   ;;  %s8153_s4 = inlined_call_operand.vmem [shape: f32[8,8], index: 4, kind: input, shape index: {}]   ;;  %s8154_s5 = inlined_call_operand.vmem [shape: f32[2,32,96], index: 5, kind: input, shape index: {}]   ;;  %s8155_s6 = inlined_call_operand.vmem [shape: f32[2,1,96], index: 6, kind: input, shape index: {}]   ;;  %s8156_s7 = inlined_call_operand.vmem [shape: f32[2,32,32], index: 7, kind: input, shape index: {}]   ;;  %s8157_s8 = inlined_call_operand.vmem [shape: f32[2,1,32], index: 8, kind: input, shape index: {}]   ;;  %s8158_s9 = inlined_call_operand.vmem [shape: f32[2,1,32], index: 9, kind: input, shape index: {}]   ;;  %s8159_s10 = inlined_call_operand.vmem [shape: f32[2,1,32], index: 10, kind: input, shape index: {}]   ;;  %s8160_s11 = inlined_call_operand.vmem [shape: f32[2,32,64], index: 11, kind: input, shape index: {}]   ;;  %s8161_s12 = inlined_call_operand.vmem [shape: f32[2,1,64], index: 12, kind: input, shape index: {}]   ;;  %s8162_s13 = inlined_call_operand.vmem [shape: f32[2,64,32], index: 13, kind: input, shape index: {}]   ;;  %s8163_s14 = inlined_call_operand.vmem [shape: f32[2,1,32], index: 14, kind: input, shape index: {}]   ;;  %s8164_s15 = inlined_call_operand.vmem [shape: f32[2,1,32], index: 15, kind: input, shape index: {}]   ;;  %s8165_s16 = inlined_call_operand.vmem [shape: f32[2,1,32], index: 16, kind: input, shape index: {}]   ;;  %s8166_s17 = inlined_call_operand.hbm [shape: f32[8,32,512], index: 17, kind: input, shape index: {}]   ;;  %s8167_s18 = inlined_call_operand.vmem [shape: f32[1,512], index: 18, kind: input, shape index: {}]   ;;  %s8168_s19 = inlined_call_operand.vmem [shape: f32[512,64], index: 19, kind: input, shape index: {}]   ;;  %s8169_s20 = inlined_call_operand.vmem [shape: f32[1,64], index: 20, kind: input, shape index: {}]   ;;  %s8170_s21 = inlined_call_operand.vmem [shape: f32[64,128], index: 21, kind: input, shape index: {}]   ;;  %s8171_s22 = inlined_call_operand.vmem [shape: f32[1,128], index: 22, kind: input, shape index: {}]   ;;  %s8172_s23 = inlined_call_operand.hbm [shape: f32[2,128], index: 23, kind: output, shape index: {}]  }
   0x1   :  { %8194 = sst [smem:[#allocation8_spill]] %s8149_s0 }
   0x2   :  { %8195 = sst [smem:[#allocation9_spill]] %s8150_s1 }
   0x3   :  { %8196 = sst [smem:[#allocation10_spill]] %s8151_s2 }
   0x4   :  { %8197 = sst [smem:[#allocation11_spill]] %s8152_s3 }
   0x5   :  { %8198 = sst [smem:[#allocation12_spill]] %s8153_s4 }
   0x6   :  { %8199 = sst [smem:[#allocation13_spill]] %s8154_s5 }
   0x7   :  { %8200 = sst [smem:[#allocation14_spill]] %s8155_s6 }
   0x8   :  { %8201 = sst [smem:[#allocation15_spill]] %s8156_s7 }
   0x9   :  { %28 = vsyncpa [#allocation3], 0 }
   0xa   :  { %29 = vsyncpa [#allocation4], 0  ;;  %s7106_s4 = smov [#allocation2]   ;;  %s7058_s5 = scalar_lea.hbm %s8166_s17, 16384 }
   0xb   :  { %s69_s30 = sshll.u32 %s7106_s4, 4  ;;  %p7059_p0 = scmp.ne.s32.totalorder %s8166_s17, %s7058_s5  ;;  %s70_s30 = int_to_ptr.vmem [resolvable:$true] %s69_s30 }
   0xc   :  { %p7062_p1 = scmp.lt.u32.totalorder %s7058_s5, %s8166_s17 }
   0xe   :  { %p7064_p2 = pnand %p7062_p1, %p7059_p0 }
  0x10   :  { %7067 = shalt.err (!%p7064_p2)
}
  0x11   :  { %s7068_s27 = scalar_lea.vmem %s70_s30, 16384  ;;  %p7073_p4 = scmp.lt.s32.totalorder %s70_s30, %s70_s30 }
  0x12   :  { %p7069_p3 = scmp.ne.s32.totalorder %s70_s30, %s7068_s27  ;;  %p7074_p5 = scmp.lt.s32.totalorder %s7068_s27, %s7068_s27 }
  0x14   :  { %p7075_p6 = por %p7074_p5, %p7073_p4 }
  0x16   :  { %p7076_p7 = pnand %p7075_p6, %p7069_p3 }
  0x18   :  { %7079 = shalt.err (!%p7076_p7)
}
  0x19   :  { %s7107_s7 = smov 512   ;;  %s7108_s28 = smov 32  }
  0x1a   :  { %75 = dma.hbm_to_vmem [thread:$0]  %s8166_s17, 16384, %s70_s30, [#allocation3], %s7107_s7, %s7107_s7, %s7108_s28  }
  0x1b   :  { %7102 = dma.done.wait [#allocation3], 16384  }
  0x1c   :  { %7103 = vsyncadd [#allocation3], 4294950912  ;;  %vm100_vm0 = vcmask 130048   ;;  %s8202_s24 = sld [smem:[#allocation9_spill]]  ;;  %s8203_s2 = sld [smem:[#allocation8_spill]]  ;;  %vm210_vm1 = vcmask 261120  }
  0x1d   :  { %s8204_s7 = sld [smem:[#allocation13_spill]]  ;;  %s8205_s1 = sld [smem:[#allocation10_spill]]  ;;  %v7110_v26 = vmov 0.0   ;;  %vm7111_vm2 = vmmov 0   ;;  %vm302_vm3 = vcmask 64512   ;;  %vm2114_vm4 = vcmask 523264  }
  0x1e   :  { %s7109_s26 = smov 96   ;;  %s8206_s30 = sld [smem:[#allocation11_spill]]  ;;  %vm4313_vm5 = vcmask 1041409  }
  0x1f   :  { %s8207_s3 = sld [smem:[#allocation14_spill]]  ;;  %s7112_s25 = smov 64  }
  0x20   :  { %s7113_s5 = smov 88   ;;  %s8209_s6 = sld [smem:[#allocation15_spill]] }
  0x21   :  { %s8190_s27 = smov 56   ;;  %s8188_s28 = smov 112  }
  0x22   :  { %v91_v0 = vld [vmem:[%s8202_s24] sm:$0xff]  ;;  %v92_v1 = vld [vmem:[%s8202_s24 + $0x8] sm:$0xff]  ;;  %s8208_s24 = sld [smem:[#allocation12_spill]]  ;;  %s8186_s29 = smov 48  }
  0x23   :  { %v89_v2 = vld [vmem:[%s8203_s2] sm:$0xff]  ;;  %v6639_v3 = vpack.c.bf16 %v92_v1, %v91_v0  ;;  %v90_v4 = vld [vmem:[%s8203_s2 + $0x8] sm:$0xff]  ;;  %v201_v8 = vld [vmem:[%s8204_s7 + $0x10] sm:$0xff]  ;;  %s8192_s2 = smov 80   ;;  %s8184_s0 = smov 72  }
  0x24   :  { %6335 = vmatprep.mubr.msk.f32.mxu0 %vm100_vm0, %v89_v2  ;;  %v199_v5 = vld [vmem:[%s8204_s7] sm:$0xff]  ;;  %v200_v6 = vld [vmem:[%s8204_s7 + $0x8] sm:$0xff]  ;;  %v202_v9 = vld [vmem:[%s8204_s7 + $0x18] sm:$0xff]  ;;  %s8180_s4 = smov 104   ;;  %s8182_s17 = smov 40  }
  0x25   :  { %6640 = vmatprep.subr.bf16.mxu0 %v6639_v3  ;;  %v6643_v7 = vpack.c.bf16 %v200_v6, %v199_v5  ;;  %v6647_v10 = vpack.c.bf16 %v202_v9, %v201_v8  ;;  %v5974_v11 = vld [vmem:[%s8205_s1] ss:$0 sm:$0xff]  ;;  %v195_v22 = vld [vmem:[%s8206_s30 + $0x8] sm:$0xff]  ;;  %s7114_s1 = smov 120  }
  0x26   :  { %6642 = vmatpush3.bf16.msra.mxu0 %v6639_v3  ;;  %v194_v19 = vld [vmem:[%s8206_s30] sm:$0xff] }
  0x27   :  { %6644 = vmatprep.subr.bf16.mxu1 %v6643_v7  ;;  %6349 = vmatprep.subr.mxu0 %v7110_v26  ;;  %v5977_v27 = vld [vmem:[%s8207_s3] ss:$0 sm:$0xff] }
  0x28   :  { %6646 = vmatpush3.bf16.msra.mxu1 %v6643_v7  ;;  %v7337_v36 = vld [vmem:[%s8208_s24] sm:$0xff] }
  0x29   :  { %6336 = vmatmul.mubr.msk.f32.vlgmr.msra.gmra.mrb[0].mxu0 %vm100_vm0, %v90_v4  ;;  %6648 = vmatprep.subr.bf16.mxu1 %v6647_v10  ;;  %v294_v56 = vld [vmem:[%s8209_s6] sm:$0xff] }
  0x2a   :  { %6351 = vmatprep.mubr.msk.f32.mxu0 %vm7111_vm2, %v7110_v26 }
  0x2c   :  { %6650 = vmatpush3.bf16.msra.mxu1 %v6647_v10 }
  0x2d   :  { %6359 = vmatprep.subr.mxu1 %v7110_v26 }
  0xfc   :  { %v6337_v12 = vpop.f32.mrb[0].mxu0 }
  0xfd   :  { %v173_v13 = vpop.f32.mrb[1].mxu0  ;;  %v179_v15 = vadd.f32 %v6337_v12, %v5974_v11 }
  0xfe   :  { %v174_v14 = vadd.f32 %v5974_v11, %v173_v13 }
  0xff   :  { %v183_v17 = vmax.f32 %v179_v15, 0.0 }
 0x100   :  { %v182_v16 = vmax.f32 %v174_v14, 0.0 }
 0x102   :  { %186 = vrot.lane.b32.xlu0 %v182_v16, %s7109_s26 }
 0x106   :  { %188 = vrot.lane.b32.xlu0 %v183_v17, %s7109_s26 }
 0x174   :  { %v187_v18 = vpop.permute.xlu0 %186 }
 0x175   :  { %v192_v20 = vmax.f32 %v182_v16, %v187_v18 }
 0x177   :  { %v7288_v21 = vadd.f32 %v194_v19, %v192_v20 }
 0x178   :  { %v189_v23 = vpop.permute.xlu0 %188 }
 0x179   :  { %v193_v24 = vmax.f32 %v183_v17, %v189_v23  ;;  %6346 = vmatprep.mubr.msk.f32.mxu1 %vm210_vm1, %v7288_v21 }
 0x17b   :  { %v7295_v25 = vadd.f32 %v195_v22, %v193_v24 }
 0x17d   :  { %6347 = vmatmul.mubr.msk.f32.vlgmr.msra.gmra.mrb[0].mxu1 %vm210_vm1, %v7295_v25 }
 0x17e   :  { %6361 = vmatprep.mubr.msk.f32.mxu1 %vm7111_vm2, %v7110_v26 }
 0x250   :  { %v6348_v28 = vpop.f32.mrb[0].mxu1 }
 0x251   :  { %v283_v29 = vpop.f32.mrb[1].mxu1  ;;  %v7312_v31 = vadd.f32 %v6348_v28, %v5977_v27 }
 0x252   :  { %v7308_v30 = vadd.f32 %v5977_v27, %v283_v29 }
 0x253   :  { %v7327_v35 = vmul.f32 0.35355338, %v7312_v31 }
 0x254   :  { %300 = vrot.lane.b32.xlu1 %v7308_v30, %s7109_s26  ;;  %v7319_v33 = vmul.f32 0.35355338, %v7308_v30 }
 0x258   :  { %379 = vrot.lane.b32.xlu1 %v7312_v31, %s7109_s26 }
 0x2c6   :  { %v301_v32 = vpop.permute.xlu1 %300 }
 0x2c7   :  { %6350 = vmatpush3.xpose.msk.msra.mxu0 %vm302_vm3, %v301_v32 }
 0x2c8   :  { %6354 = vmatprep.subr.mxu0 %v7110_v26 }
 0x2ca   :  { %v380_v34 = vpop.permute.xlu1 %379  ;;  %6352 = vmatmul.mubr.msk.f32.vlgmr.msra.gmra.mrb[2].mxu0 %vm302_vm3, %v7319_v33 }
 0x2cb   :  { %6355 = vmatpush3.xpose.msk.msra.mxu0 %vm302_vm3, %v380_v34  ;;  %6356 = vmatprep.mubr.msk.f32.mxu0 %vm7111_vm2, %v7110_v26 }
 0x2cc   :  { %6364 = vmatprep.subr.mxu0 %v7110_v26 }
 0x2ce   :  { %6357 = vmatmul.mubr.msk.f32.vlgmr.msra.gmra.mrb[4].mxu0 %vm302_vm3, %v7327_v35 }
 0x2cf   :  { %6366 = vmatprep.mubr.msk.f32.mxu0 %vm7111_vm2, %v7110_v26 }
 0x39d   :  { %v374_v37 = vpop.f32.mrb[2].mxu0 }
 0x39e   :  { %v375_v38 = vadd.f32 %v374_v37, %v7337_v36  ;;  %v6353_v39 = vpop.f32.mrb[3].mxu0 }
 0x3a0   :  { %v456_v40 = vsel %vm302_vm3, %v375_v38, -inf }
 0x3a1   :  { %457 = vmax.xlane.f32.xlu0 %v456_v40  ;;  %v452_v41 = vpop.f32.mrb[4].mxu0 }
 0x3a2   :  { %v453_v42 = vadd.f32 %v452_v41, %v7337_v36  ;;  %v6358_v43 = vpop.f32.mrb[5].mxu0 }
 0x3a4   :  { %v459_v44 = vsel %vm302_vm3, %v453_v42, -inf }
 0x3a5   :  { %460 = vmax.xlane.f32.xlu1 %v459_v44 }
 0x3b6   :  { %478 = vrot.lane.b32.xlu1 %v7308_v30, %s7112_s25 }
 0x3ba   :  { %721 = vrot.lane.b32.xlu1 %v7308_v30, %s7113_s5 }
 0x3be   :  { %719 = vrot.lane.b32.xlu1 %v7319_v33, %s7114_s1 }
 0x3c2   :  { %797 = vrot.lane.b32.xlu1 %v7327_v35, %s7114_s1 }
 0x3c6   :  { %1134 = vrot.lane.b32.xlu1 %v7308_v30, %s8192_s2 }
 0x42e   :  { %v458_v45 = vpop.xlane.xlu0 %457 }
 0x42f   :  { %v462_v46 = vsub.f32 %v375_v38, %v458_v45 }
 0x431   :  { %v464_v47 = vmul.f32 1.442695, %v462_v46 }
 0x432   :  { %v461_v48 = vpop.xlane.xlu1 %460 }
 0x433   :  { %6977 = vpow2.f32 %v464_v47  ;;  %v463_v49 = vsub.f32 %v453_v42, %v461_v48 }
 0x435   :  { %v466_v50 = vmul.f32 1.442695, %v463_v49 }
 0x436   :  { %v479_v51 = vpop.permute.xlu1 %478 }
 0x437   :  { %6979 = vpow2.f32 %v466_v50  ;;  %6360 = vmatpush3.msra.mxu1 %v479_v51 }
 0x438   :  { %6369 = vmatprep.subr.mxu1 %v294_v56 }
 0x43a   :  { %v722_v63 = vpop.permute.xlu1 %721 }
 0x43d   :  { %v6978_v52 = vpop.eup %6977 }
 0x43e   :  { %v468_v53 = vsel %vm302_vm3, %v6978_v52, 0.0  ;;  %v720_v1 = vpop.permute.xlu1 %719 }
 0x43f   :  { %469 = vadd.xlane.f32.xlu0 %v468_v53 }
 0x441   :  { %v6980_v54 = vpop.eup %6979 }
 0x442   :  { %v471_v55 = vsel %vm302_vm3, %v6980_v54, 0.0  ;;  %v798_v7 = vpop.permute.xlu1 %797 }
 0x443   :  { %472 = vadd.xlane.f32.xlu0 %v471_v55 }
 0x446   :  { %v1135_v23 = vpop.permute.xlu1 %1134 }
 0x459   :  { %554 = vrot.lane.b32.xlu0 %v7312_v31, %s7112_s25 }
 0x45d   :  { %799 = vrot.lane.b32.xlu0 %v7312_v31, %s7113_s5 }
 0x4cc   :  { %v470_v57 = vpop.xlane.xlu0 %469 }
 0x4cd   :  { %6981 = vrcp.f32 %v470_v57 }
 0x4d0   :  { %v473_v58 = vpop.xlane.xlu0 %472 }
 0x4d1   :  { %6983 = vrcp.f32 %v473_v58 }
 0x4d4   :  { %v555_v59 = vpop.permute.xlu0 %554 }
 0x4d5   :  { %6365 = vmatpush3.msra.mxu0 %v555_v59 }
 0x4d6   :  { %6374 = vmatprep.subr.mxu0 %v7110_v26 }
 0x4d7   :  { %v6982_v60 = vpop.eup %6981 }
 0x4d8   :  { %v475_v61 = vmul.f32 %v6982_v60, %v6978_v52  ;;  %v800_v5 = vpop.permute.xlu0 %799 }
 0x4da   :  { %6362 = vmatmul.mubr.msk.f32.vlgmr.msra.gmra.mrb[2].mxu1 %vm302_vm3, %v475_v61 }
 0x4db   :  { %v6984_v62 = vpop.eup %6983  ;;  %6370 = vmatpush3.msra.mxu1 %v294_v56  ;;  %v295_v56 = vld [vmem:[%s8209_s6 + $0x8] sm:$0xff] }
 0x4dc   :  { %v477_v0 = vmul.f32 %v6984_v62, %v6980_v54  ;;  %6379 = vmatprep.subr.mxu1 %v7110_v26 }
 0x4de   :  { %6367 = vmatmul.mubr.msk.f32.vlgmr.msra.gmra.mrb[6].mxu0 %vm302_vm3, %v477_v0 }
 0x4df   :  { %6375 = vmatpush3.xpose.msk.msra.mxu0 %vm302_vm3, %v722_v63  ;;  %6376 = vmatprep.mubr.msk.f32.mxu0 %vm7111_vm2, %v7110_v26 }
 0x4e0   :  { %6384 = vmatprep.subr.mxu0 %v7110_v26 }
 0x4e2   :  { %6377 = vmatmul.mubr.msk.f32.vlgmr.msra.gmra.mrb[8].mxu0 %vm302_vm3, %v720_v1 }
 0x4e3   :  { %6386 = vmatprep.mubr.msk.f32.mxu0 %vm7111_vm2, %v7110_v26 }
 0x5ad   :  { %v550_v2 = vpop.f32.mrb[2].mxu1 }
 0x5ae   :  { %v6363_v3 = vpop.f32.mrb[3].mxu1  ;;  %6371 = vmatprep.mubr.msk.f32.mxu1 %vm302_vm3, %v550_v2 }
 0x5b1   :  { %v626_v4 = vpop.f32.mrb[6].mxu0 }
 0x5b2   :  { %v6368_v6 = vpop.f32.mrb[7].mxu0  ;;  %6372 = vmatmul.mubr.msk.f32.vlgmr.msra.gmra.mrb[4].mxu1 %vm302_vm3, %v626_v4 }
 0x5b3   :  { %6380 = vmatpush3.xpose.msk.msra.mxu1 %vm302_vm3, %v800_v5  ;;  %6381 = vmatprep.mubr.msk.f32.mxu1 %vm7111_vm2, %v7110_v26 }
 0x5b4   :  { %6389 = vmatprep.subr.mxu1 %v7110_v26 }
 0x5b5   :  { %v793_v8 = vpop.f32.mrb[8].mxu0 }
 0x5b6   :  { %v794_v9 = vadd.f32 %v793_v8, %v7337_v36  ;;  %v6378_v10 = vpop.f32.mrb[9].mxu0  ;;  %6382 = vmatmul.mubr.msk.f32.vlgmr.msra.gmra.mrb[6].mxu1 %vm302_vm3, %v798_v7  ;;  %v296_v7 = vld [vmem:[%s8209_s6 + $0x10] sm:$0xff] }
 0x5b7   :  { %6391 = vmatprep.mubr.msk.f32.mxu1 %vm7111_vm2, %v7110_v26 }
 0x5b8   :  { %v875_v11 = vsel %vm302_vm3, %v794_v9, -inf }
 0x5b9   :  { %876 = vmax.xlane.f32.xlu0 %v875_v11 }
 0x5cf   :  { %897 = vrot.lane.b32.xlu0 %v7308_v30, %s8190_s27 }
 0x5d3   :  { %1132 = vrot.lane.b32.xlu0 %v7319_v33, %s8188_s28 }
 0x5d7   :  { %1210 = vrot.lane.b32.xlu0 %v7327_v35, %s8188_s28 }
 0x646   :  { %v877_v12 = vpop.xlane.xlu0 %876 }
 0x647   :  { %v881_v13 = vsub.f32 %v794_v9, %v877_v12 }
 0x649   :  { %v883_v14 = vmul.f32 1.442695, %v881_v13 }
 0x64a   :  { %v898_v15 = vpop.permute.xlu0 %897 }
 0x64b   :  { %6985 = vpow2.f32 %v883_v14  ;;  %6385 = vmatpush3.msra.mxu0 %v898_v15 }
 0x64c   :  { %6399 = vmatprep.subr.mxu0 %v7110_v26 }
 0x64e   :  { %v1133_v29 = vpop.permute.xlu0 %1132 }
 0x652   :  { %v1211_v34 = vpop.permute.xlu0 %1210 }
 0x655   :  { %v6986_v16 = vpop.eup %6985 }
 0x656   :  { %v887_v17 = vsel %vm302_vm3, %v6986_v16, 0.0 }
 0x657   :  { %888 = vadd.xlane.f32.xlu1 %v887_v17 }
 0x668   :  { %1212 = vrot.lane.b32.xlu1 %v7312_v31, %s8192_s2  ;;  %s8216_s2 = smov 40  }
 0x689   :  { %v871_v18 = vpop.f32.mrb[6].mxu1 }
 0x68a   :  { %v872_v19 = vadd.f32 %v871_v18, %v7337_v36  ;;  %v6383_v20 = vpop.f32.mrb[7].mxu1 }
 0x68c   :  { %v878_v22 = vsel %vm302_vm3, %v872_v19, -inf }
 0x68d   :  { %879 = vmax.xlane.f32.xlu1 %v878_v22 }
 0x6e4   :  { %v889_v24 = vpop.xlane.xlu1 %888 }
 0x6e5   :  { %6987 = vrcp.f32 %v889_v24 }
 0x6e8   :  { %v1213_v32 = vpop.permute.xlu1 %1212 }
 0x6ef   :  { %v6988_v27 = vpop.eup %6987 }
 0x6f0   :  { %v894_v28 = vmul.f32 %v6988_v27, %v6986_v16 }
 0x6f2   :  { %6387 = vmatmul.mubr.msk.f32.vlgmr.msra.gmra.mrb[10].mxu0 %vm302_vm3, %v894_v28 }
 0x6f3   :  { %6400 = vmatpush3.xpose.msk.msra.mxu0 %vm302_vm3, %v1135_v23  ;;  %6401 = vmatprep.mubr.msk.f32.mxu0 %vm7111_vm2, %v7110_v26 }
 0x6f4   :  { %6404 = vmatprep.subr.mxu0 %v7110_v26 }
 0x6f6   :  { %6402 = vmatmul.mubr.msk.f32.vlgmr.msra.gmra.mrb[12].mxu0 %vm302_vm3, %v1133_v29 }
 0x6f7   :  { %6405 = vmatpush3.xpose.msk.msra.mxu0 %vm302_vm3, %v1213_v32  ;;  %6406 = vmatprep.mubr.msk.f32.mxu0 %vm7111_vm2, %v7110_v26 }
 0x6f8   :  { %6414 = vmatprep.subr.mxu0 %v7110_v26 }
 0x6fa   :  { %6407 = vmatmul.mubr.msk.f32.vlgmr.msra.gmra.mrb[14].mxu0 %vm302_vm3, %v1211_v34 }
 0x6fb   :  { %6416 = vmatprep.mubr.msk.f32.mxu0 %vm7111_vm2, %v7110_v26 }
 0x71a   :  { %v880_v37 = vpop.xlane.xlu1 %879 }
 0x71b   :  { %v882_v38 = vsub.f32 %v872_v19, %v880_v37 }
 0x71d   :  { %v885_v39 = vmul.f32 1.442695, %v882_v38 }
 0x71f   :  { %6989 = vpow2.f32 %v885_v39 }
 0x729   :  { %v6990_v40 = vpop.eup %6989 }
 0x72a   :  { %v890_v41 = vsel %vm302_vm3, %v6990_v40, 0.0 }
 0x72b   :  { %891 = vadd.xlane.f32.xlu0 %v890_v41 }
 0x741   :  { %973 = vrot.lane.b32.xlu0 %v7312_v31, %s8190_s27 }
 0x745   :  { %1386 = vrot.lane.b32.xlu0 %v7312_v31, %s8186_s29 }
 0x749   :  { %1547 = vrot.lane.b32.xlu0 %v7308_v30, %s8184_s0 }
 0x74d   :  { %1625 = vrot.lane.b32.xlu0 %v7312_v31, %s8184_s0  ;;  %s8215_s0 = smov 104  }
 0x751   :  { %1545 = vrot.lane.b32.xlu0 %v7319_v33, %s8180_s4 }
 0x7b8   :  { %v892_v42 = vpop.xlane.xlu0 %891 }
 0x7b9   :  { %6991 = vrcp.f32 %v892_v42 }
 0x7bc   :  { %v974_v43 = vpop.permute.xlu0 %973 }
 0x7bd   :  { %6390 = vmatpush3.msra.mxu1 %v974_v43 }
 0x7be   :  { %6394 = vmatprep.subr.mxu1 %v295_v56 }
 0x7c0   :  { %v1387_v44 = vpop.permute.xlu0 %1386 }
 0x7c1   :  { %6415 = vmatpush3.msra.mxu0 %v1387_v44 }
 0x7c2   :  { %6424 = vmatprep.subr.mxu0 %v7110_v26 }
 0x7c3   :  { %v6992_v45 = vpop.eup %6991 }
 0x7c4   :  { %v896_v46 = vmul.f32 %v6992_v45, %v6990_v40  ;;  %v1548_v9 = vpop.permute.xlu0 %1547 }
 0x7c5   :  { %v969_v47 = vpop.f32.mrb[10].mxu0 }
 0x7c6   :  { %v6388_v48 = vpop.f32.mrb[11].mxu0  ;;  %6392 = vmatmul.mubr.msk.f32.vlgmr.msra.gmra.mrb[8].mxu1 %vm302_vm3, %v896_v46 }
 0x7c7   :  { %6396 = vmatprep.mubr.msk.f32.mxu1 %vm302_vm3, %v969_v47  ;;  %6395 = vmatpush3.msra.mxu1 %v295_v56  ;;  %v5988_v56 = vld [vmem:[%s8157_s8] ss:$0 sm:$0xff] }
 0x7c8   :  { %6409 = vmatprep.subr.mxu1 %v7110_v26  ;;  %v1626_v12 = vpop.permute.xlu0 %1625 }
 0x7c9   :  { %v1206_v49 = vpop.f32.mrb[12].mxu0 }
 0x7ca   :  { %v1207_v50 = vadd.f32 %v1206_v49, %v7337_v36  ;;  %v6403_v33 = vpop.f32.mrb[13].mxu0 }
 0x7cc   :  { %v1288_v51 = vsel %vm302_vm3, %v1207_v50, -inf  ;;  %v1546_v14 = vpop.permute.xlu0 %1545 }
 0x7cd   :  { %1289 = vmax.xlane.f32.xlu1 %v1288_v51  ;;  %v1284_v52 = vpop.f32.mrb[14].mxu0 }
 0x7ce   :  { %v1285_v53 = vadd.f32 %v1284_v52, %v7337_v36  ;;  %v6408_v54 = vpop.f32.mrb[15].mxu0 }
 0x7d0   :  { %v1291_v55 = vsel %vm302_vm3, %v1285_v53, -inf }
 0x7d1   :  { %1292 = vmax.xlane.f32.xlu1 %v1291_v55 }
 0x85a   :  { %v1290_v57 = vpop.xlane.xlu1 %1289 }
 0x85b   :  { %v1294_v58 = vsub.f32 %v1207_v50, %v1290_v57  ;;  %v297_v50 = vld [vmem:[%s8209_s6 + $0x18] sm:$0xff] }
 0x85d   :  { %v1296_v59 = vmul.f32 1.442695, %v1294_v58 }
 0x85e   :  { %v1293_v60 = vpop.xlane.xlu1 %1292 }
 0x85f   :  { %6993 = vpow2.f32 %v1296_v59  ;;  %v1295_v61 = vsub.f32 %v1285_v53, %v1293_v60 }
 0x861   :  { %v1298_v62 = vmul.f32 1.442695, %v1295_v61 }
 0x863   :  { %6995 = vpow2.f32 %v1298_v62 }
 0x869   :  { %v6994_v63 = vpop.eup %6993 }
 0x86a   :  { %v1300_v0 = vsel %vm302_vm3, %v6994_v63, 0.0 }
 0x86b   :  { %1301 = vadd.xlane.f32.xlu1 %v1300_v0 }
 0x86d   :  { %v6996_v1 = vpop.eup %6995 }
 0x86e   :  { %v1303_v2 = vsel %vm302_vm3, %v6996_v1, 0.0 }
 0x86f   :  { %1304 = vadd.xlane.f32.xlu1 %v1303_v2 }
 0x880   :  { %1310 = vrot.lane.b32.xlu1 %v7308_v30, %s8186_s29  ;;  %s8214_s29 = smov 72  }
 0x884   :  { %1623 = vrot.lane.b32.xlu1 %v7327_v35, %s8180_s4 }
 0x899   :  { %v1045_v3 = vpop.f32.mrb[8].mxu1 }
 0x89a   :  { %v6393_v4 = vpop.f32.mrb[9].mxu1  ;;  %6397 = vmatmul.mubr.msk.f32.vlgmr.msra.gmra.mrb[4].mxu1 %vm302_vm3, %v1045_v3 }
 0x89b   :  { %6411 = vmatprep.mubr.msk.f32.mxu1 %vm7111_vm2, %v7110_v26 }
 0x8f8   :  { %v1302_v5 = vpop.xlane.xlu1 %1301 }
 0x8f9   :  { %6997 = vrcp.f32 %v1302_v5 }
 0x8fc   :  { %v1305_v6 = vpop.xlane.xlu1 %1304 }
 0x8fd   :  { %6999 = vrcp.f32 %v1305_v6 }
 0x900   :  { %v1311_v8 = vpop.permute.xlu1 %1310 }
 0x901   :  { %6410 = vmatpush3.msra.mxu1 %v1311_v8 }
 0x902   :  { %6419 = vmatprep.subr.mxu1 %v296_v7 }
 0x903   :  { %v6998_v35 = vpop.eup %6997 }
 0x904   :  { %v1307_v10 = vmul.f32 %v6998_v35, %v6994_v63  ;;  %v1624_v19 = vpop.permute.xlu1 %1623  ;;  %v2006_v35 = vld [vmem:[%s8160_s11 + $0x8] sm:$0xff] }
 0x906   :  { %6412 = vmatmul.mubr.msk.f32.vlgmr.msra.gmra.mrb[10].mxu1 %vm302_vm3, %v1307_v10 }
 0x907   :  { %v7000_v11 = vpop.eup %6999  ;;  %6420 = vmatpush3.msra.mxu1 %v296_v7 }
 0x908   :  { %v1309_v13 = vmul.f32 %v7000_v11, %v6996_v1  ;;  %6429 = vmatprep.subr.mxu1 %v7110_v26  ;;  %v2007_v11 = vld [vmem:[%s8160_s11 + $0x10] sm:$0xff] }
 0x90a   :  { %6417 = vmatmul.mubr.msk.f32.vlgmr.msra.gmra.mrb[16].mxu0 %vm302_vm3, %v1309_v13 }
 0x90b   :  { %6425 = vmatpush3.xpose.msk.msra.mxu0 %vm302_vm3, %v1548_v9  ;;  %6426 = vmatprep.mubr.msk.f32.mxu0 %vm7111_vm2, %v7110_v26 }
 0x90c   :  { %6434 = vmatprep.subr.mxu0 %v7110_v26 }
 0x90e   :  { %6427 = vmatmul.mubr.msk.f32.vlgmr.msra.gmra.mrb[18].mxu0 %vm302_vm3, %v1546_v14  ;;  %v2099_v14 = vld [vmem:[%s8162_s13] sm:$0xff] }
 0x90f   :  { %6436 = vmatprep.mubr.msk.f32.mxu0 %vm7111_vm2, %v7110_v26 }
 0x9d9   :  { %v1382_v15 = vpop.f32.mrb[10].mxu1 }
 0x9da   :  { %v6413_v16 = vpop.f32.mrb[11].mxu1  ;;  %6421 = vmatprep.mubr.msk.f32.mxu1 %vm302_vm3, %v1382_v15  ;;  %v2100_v15 = vld [vmem:[%s8162_s13 + $0x8] sm:$0xff] }
 0x9db   :  { %v6659_v16 = vpack.c.bf16 %v2100_v15, %v2099_v14 }
 0x9dd   :  { %v1458_v17 = vpop.f32.mrb[16].mxu0 }
 0x9de   :  { %v6418_v18 = vpop.f32.mrb[17].mxu0  ;;  %6422 = vmatmul.mubr.msk.f32.vlgmr.msra.gmra.mrb[4].mxu1 %vm302_vm3, %v1458_v17 }
 0x9df   :  { %6430 = vmatpush3.xpose.msk.msra.mxu1 %vm302_vm3, %v1626_v12  ;;  %6431 = vmatprep.mubr.msk.f32.mxu1 %vm7111_vm2, %v7110_v26  ;;  %v2008_v12 = vld [vmem:[%s8160_s11 + $0x18] sm:$0xff] }
 0x9e0   :  { %6439 = vmatprep.subr.mxu1 %v7110_v26  ;;  %v6655_v13 = vpack.c.bf16 %v2008_v12, %v2007_v11 }
 0x9e1   :  { %v1619_v20 = vpop.f32.mrb[18].mxu0 }
 0x9e2   :  { %v1620_v22 = vadd.f32 %v1619_v20, %v7337_v36  ;;  %v6428_v23 = vpop.f32.mrb[19].mxu0  ;;  %6432 = vmatmul.mubr.msk.f32.vlgmr.msra.gmra.mrb[12].mxu1 %vm302_vm3, %v1624_v19 }
 0x9e3   :  { %6441 = vmatprep.mubr.msk.f32.mxu1 %vm7111_vm2, %v7110_v26 }
 0x9e4   :  { %v1701_v24 = vsel %vm302_vm3, %v1620_v22, -inf }
 0x9e5   :  { %1702 = vmax.xlane.f32.xlu0 %v1701_v24 }
 0xa72   :  { %v1703_v27 = vpop.xlane.xlu0 %1702 }
 0xa73   :  { %v1707_v28 = vsub.f32 %v1620_v22, %v1703_v27  ;;  %v6013_v27 = vld [vmem:[%s8158_s9] ss:$0 sm:$0xff] }
 0xa75   :  { %v1709_v29 = vmul.f32 1.442695, %v1707_v28 }
 0xa77   :  { %7001 = vpow2.f32 %v1709_v29 }
 0xa81   :  { %v7002_v32 = vpop.eup %7001 }
 0xa82   :  { %v1713_v34 = vsel %vm302_vm3, %v7002_v32, 0.0 }
 0xa83   :  { %1714 = vadd.xlane.f32.xlu0 %v1713_v34  ;;  %v6014_v34 = vld [vmem:[%s8159_s10] ss:$0 sm:$0xff] }
 0xab5   :  { %v1697_v37 = vpop.f32.mrb[12].mxu1 }
 0xab6   :  { %v1698_v38 = vadd.f32 %v1697_v37, %v7337_v36  ;;  %v6433_v39 = vpop.f32.mrb[13].mxu1 }
 0xab7   :  { %v2101_v39 = vld [vmem:[%s8162_s13 + $0x10] sm:$0xff] }
 0xab8   :  { %v1704_v40 = vsel %vm302_vm3, %v1698_v38, -inf }
 0xab9   :  { %1705 = vmax.xlane.f32.xlu1 %v1704_v40  ;;  %v2102_v40 = vld [vmem:[%s8162_s13 + $0x18] sm:$0xff] }
 0xaca   :  { %1723 = vrot.lane.b32.xlu1 %v7308_v30, %s8182_s17 }
 0xb10   :  { %v1715_v41 = vpop.xlane.xlu0 %1714 }
 0xb11   :  { %7003 = vrcp.f32 %v1715_v41 }
 0xb1b   :  { %v7004_v43 = vpop.eup %7003 }
 0xb1c   :  { %v1720_v46 = vmul.f32 %v7004_v43, %v7002_v32  ;;  %v6663_v43 = vpack.c.bf16 %v2102_v40, %v2101_v39 }
 0xb46   :  { %v1706_v42 = vpop.xlane.xlu1 %1705 }
 0xb47   :  { %v1708_v44 = vsub.f32 %v1698_v38, %v1706_v42 }
 0xb49   :  { %v1711_v45 = vmul.f32 1.442695, %v1708_v44  ;;  %v2103_v44 = vld [vmem:[%s8162_s13 + $0x20] sm:$0xff] }
 0xb4a   :  { %v1724_v47 = vpop.permute.xlu1 %1723 }
 0xb4b   :  { %7005 = vpow2.f32 %v1711_v45  ;;  %6435 = vmatpush3.msra.mxu0 %v1724_v47  ;;  %v2104_v45 = vld [vmem:[%s8162_s13 + $0x28] sm:$0xff]  ;;  %v2105_v47 = vld [vmem:[%s8162_s13 + $0x30] sm:$0xff] }
 0xb4c   :  { %6437 = vmatmul.mubr.msk.f32.vlgmr.msra.gmra.mrb[20].mxu0 %vm302_vm3, %v1720_v46  ;;  %6490 = vmatprep.subr.mxu0 %v7110_v26  ;;  %v6667_v46 = vpack.c.bf16 %v2104_v45, %v2103_v44 }
 0xb4d   :  { %6492 = vmatprep.mubr.msk.f32.mxu0 %vm7111_vm2, %v7110_v26 }
 0xb55   :  { %v7006_v48 = vpop.eup %7005 }
 0xb56   :  { %v1716_v30 = vsel %vm302_vm3, %v7006_v48, 0.0 }
 0xb57   :  { %1717 = vadd.xlane.f32.xlu0 %v1716_v30 }
 0xb6d   :  { %1799 = vrot.lane.b32.xlu0 %v7312_v31, %s8182_s17 }
 0xbe4   :  { %v1718_v49 = vpop.xlane.xlu0 %1717 }
 0xbe5   :  { %7007 = vrcp.f32 %v1718_v49  ;;  %v6015_v49 = vld [vmem:[%s8161_s12] ss:$0 sm:$0xff] }
 0xbe8   :  { %v1800_v33 = vpop.permute.xlu0 %1799 }
 0xbe9   :  { %6440 = vmatpush3.msra.mxu1 %v1800_v33 }
 0xbea   :  { %6444 = vmatprep.subr.mxu1 %v297_v50 }
 0xbef   :  { %v7008_v51 = vpop.eup %7007 }
 0xbf0   :  { %v1722_v52 = vmul.f32 %v7008_v51, %v7006_v48  ;;  %v2106_v48 = vld [vmem:[%s8162_s13 + $0x38] sm:$0xff] }
 0xbf1   :  { %v6671_v30 = vpack.c.bf16 %v2106_v48, %v2105_v47 }
 0xbf2   :  { %6442 = vmatmul.mubr.msk.f32.vlgmr.msra.gmra.mrb[14].mxu1 %vm302_vm3, %v1722_v52 }
 0xbf3   :  { %6445 = vmatpush3.msra.mxu1 %v297_v50 }
 0xc1f   :  { %v1795_v53 = vpop.f32.mrb[20].mxu0 }
 0xc20   :  { %v6438_v54 = vpop.f32.mrb[21].mxu0  ;;  %6446 = vmatprep.mubr.msk.f32.mxu1 %vm302_vm3, %v1795_v53 }
 0xcc5   :  { %v1871_v55 = vpop.f32.mrb[14].mxu1 }
 0xcc6   :  { %v6443_v31 = vpop.f32.mrb[15].mxu1  ;;  %6447 = vmatmul.mubr.msk.f32.vlgmr.msra.gmra.mrb[4].mxu1 %vm302_vm3, %v1871_v55  ;;  %v6018_v55 = vld [vmem:[%s8163_s14] ss:$0 sm:$0xff] }
 0xd99   :  { %v6448_v57 = vpop.f32.mrb[4].mxu1 }
 0xd9a   :  { %v6911_v58 = vadd.f32 %v6448_v57, %v5988_v56  ;;  %v1947_v59 = vpop.f32.mrb[5].mxu1 }
 0xd9b   :  { %v6912_v60 = vadd.f32 %v5988_v56, %v1947_v59 }
 0xd9c   :  { %v1959_v61 = vadd.f32 %v6911_v58, %v7295_v25 }
 0xd9d   :  { %v1958_v62 = vadd.f32 %v6912_v60, %v7288_v21  ;;  %v2005_v21 = vld [vmem:[%s8160_s11] sm:$0xff] }
 0xd9e   :  { %v1965_v63 = vsel %vm210_vm1, %v1959_v61, 0.0  ;;  %v6651_v10 = vpack.c.bf16 %v2006_v35, %v2005_v21  ;;  %v6025_v35 = vld [vmem:[%s8204_s7 + $0x30] sm:$0xff] }
 0xd9f   :  { %1966 = vadd.xlane.f32.xlu0 %v1965_v63  ;;  %v1962_v0 = vsel %vm210_vm1, %v1958_v62, 0.0 }
 0xda0   :  { %1963 = vadd.xlane.f32.xlu1 %v1962_v0  ;;  %6652 = vmatprep.subr.bf16.mxu1 %v6651_v10 }
 0xda1   :  { %6654 = vmatpush3.bf16.msra.mxu1 %v6651_v10  ;;  %v6026_v10 = vld [vmem:[%s8204_s7 + $0x38] sm:$0xff] }
 0xda2   :  { %6656 = vmatprep.subr.bf16.mxu1 %v6655_v13  ;;  %v6679_v11 = vpack.c.bf16 %v6026_v10, %v6025_v35 }
 0xda5   :  { %6658 = vmatpush3.bf16.msra.mxu1 %v6655_v13 }
 0xda6   :  { %6660 = vmatprep.subr.bf16.mxu1 %v6659_v16 }
 0xe2c   :  { %v1967_v1 = vpop.xlane.xlu0 %1966 }
 0xe2d   :  { %v1970_v2 = vmul.f32 0.03125, %v1967_v1  ;;  %v1964_v3 = vpop.xlane.xlu1 %1963 }
 0xe2e   :  { %v1969_v4 = vmul.f32 0.03125, %v1964_v3 }
 0xe2f   :  { %v1972_v5 = vsub.f32 %v1959_v61, %v1970_v2 }
 0xe30   :  { %v1971_v6 = vsub.f32 %v1958_v62, %v1969_v4 }
 0xe31   :  { %v1974_v7 = vmul.f32 %v1972_v5, %v1972_v5 }
 0xe32   :  { %v1973_v8 = vmul.f32 %v1971_v6, %v1971_v6 }
 0xe33   :  { %v1978_v9 = vsel %vm210_vm1, %v1974_v7, 0.0 }
 0xe34   :  { %1979 = vadd.xlane.f32.xlu0 %v1978_v9  ;;  %v1975_v25 = vsel %vm210_vm1, %v1973_v8, 0.0  ;;  %v6023_v9 = vld [vmem:[%s8204_s7 + $0x20] sm:$0xff] }
 0xe35   :  { %1976 = vadd.xlane.f32.xlu1 %v1975_v25  ;;  %v6024_v25 = vld [vmem:[%s8204_s7 + $0x28] sm:$0xff] }
 0xe36   :  { %v6675_v21 = vpack.c.bf16 %v6024_v25, %v6023_v9 }
 0xec1   :  { %v1980_v17 = vpop.xlane.xlu0 %1979 }
 0xec2   :  { %v1982_v18 = vmul.f32 0.03125, %v1980_v17  ;;  %v1977_v19 = vpop.xlane.xlu1 %1976 }
 0xec3   :  { %v1981_v20 = vmul.f32 0.03125, %v1977_v19  ;;  %v6021_v19 = vld [vmem:[%s8164_s15] ss:$0 sm:$0xff] }
 0xec4   :  { %v1984_v22 = vadd.f32 1e-05, %v1982_v18 }
 0xec5   :  { %v1983_v23 = vadd.f32 1e-05, %v1981_v20 }
 0xec6   :  { %7009 = vrsqrt.f32 %v1984_v22 }
 0xec7   :  { %7011 = vrsqrt.f32 %v1983_v23 }
 0xed0   :  { %v7010_v24 = vpop.eup %7009 }
 0xed1   :  { %v7012_v28 = vpop.eup %7011  ;;  %v1988_v29 = vmul.f32 %v7010_v24, %v1972_v5  ;;  %v6022_v24 = vld [vmem:[%s8165_s16] ss:$0 sm:$0xff] }
 0xed2   :  { %v1987_v32 = vmul.f32 %v7012_v28, %v1971_v6 }
 0xed3   :  { %v1996_v37 = vmul.f32 %v6013_v27, %v1988_v29 }
 0xed4   :  { %v1995_v38 = vmul.f32 %v6013_v27, %v1987_v32 }
 0xed5   :  { %v2004_v42 = vadd.f32 %v6014_v34, %v1996_v37 }
 0xed6   :  { %v2003_v41 = vadd.f32 %v6014_v34, %v1995_v38  ;;  %v6028_v34 = vld [vmem:[%s8207_s3 + $0x1] ss:$0 sm:$0xff] }
 0xed8   :  { %6457 = vmatprep.mubr.msk.f32.mxu1 %vm210_vm1, %v2003_v41 }
 0xed9   :  { %6458 = vmatmul.mubr.msk.f32.vlgmr.msra.gmra.mrb[16].mxu1 %vm210_vm1, %v2004_v42 }
 0xeda   :  { %6662 = vmatpush3.bf16.msra.mxu1 %v6659_v16 }
 0xedb   :  { %6664 = vmatprep.subr.bf16.mxu1 %v6663_v43 }
 0xede   :  { %6666 = vmatpush3.bf16.msra.mxu1 %v6663_v43 }
 0xedf   :  { %6668 = vmatprep.subr.bf16.mxu1 %v6667_v46 }
 0xee2   :  { %6670 = vmatpush3.bf16.msra.mxu1 %v6667_v46 }
 0xee3   :  { %6672 = vmatprep.subr.bf16.mxu1 %v6671_v30 }
 0xee6   :  { %6674 = vmatpush3.bf16.msra.mxu1 %v6671_v30 }
 0xee7   :  { %6676 = vmatprep.subr.bf16.mxu1 %v6675_v21 }
 0xfac   :  { %v6459_v50 = vpop.f32.mrb[16].mxu1 }
 0xfad   :  { %v2094_v33 = vadd.f32 %v6459_v50, %v6015_v49  ;;  %v2088_v51 = vpop.f32.mrb[17].mxu1 }
 0xfae   :  { %v2089_v52 = vadd.f32 %v6015_v49, %v2088_v51 }
 0xfaf   :  { %v2098_v54 = vmax.f32 %v2094_v33, 0.0 }
 0xfb0   :  { %v2097_v53 = vmax.f32 %v2089_v52, 0.0 }
 0xfb2   :  { %6476 = vmatprep.mubr.msk.f32.mxu1 %vm2114_vm4, %v2097_v53 }
 0xfb3   :  { %6477 = vmatmul.mubr.msk.f32.vlgmr.msra.gmra.mrb[18].mxu1 %vm2114_vm4, %v2098_v54 }
 0xfb4   :  { %6678 = vmatpush3.bf16.msra.mxu1 %v6675_v21 }
 0xfb5   :  { %6680 = vmatprep.subr.bf16.mxu1 %v6679_v11 }
 0xfb8   :  { %6682 = vmatpush3.bf16.msra.mxu1 %v6679_v11 }
 0xfb9   :  { %6500 = vmatprep.subr.mxu1 %v7110_v26 }
0x1086   :  { %v6478_v31 = vpop.f32.mrb[18].mxu1 }
0x1087   :  { %v2193_v56 = vadd.f32 %v6478_v31, %v6018_v55  ;;  %v2187_v57 = vpop.f32.mrb[19].mxu1 }
0x1088   :  { %v2188_v58 = vadd.f32 %v6018_v55, %v2187_v57 }
0x1089   :  { %v2197_v59 = vadd.f32 %v2193_v56, %v2004_v42 }
0x108a   :  { %v2196_v60 = vadd.f32 %v2188_v58, %v2003_v41 }
0x108b   :  { %v2203_v61 = vsel %vm210_vm1, %v2197_v59, 0.0 }
0x108c   :  { %2204 = vadd.xlane.f32.xlu0 %v2203_v61  ;;  %v2200_v62 = vsel %vm210_vm1, %v2196_v60, 0.0  ;;  %v6031_v61 = vld [vmem:[%s8209_s6 + $0x20] sm:$0xff] }
0x108d   :  { %2201 = vadd.xlane.f32.xlu1 %v2200_v62 }
0x1119   :  { %v2205_v63 = vpop.xlane.xlu0 %2204 }
0x111a   :  { %v2207_v0 = vmul.f32 0.03125, %v2205_v63  ;;  %v2202_v1 = vpop.xlane.xlu1 %2201 }
0x111b   :  { %v2206_v2 = vmul.f32 0.03125, %v2202_v1 }
0x111c   :  { %v2209_v3 = vsub.f32 %v2197_v59, %v2207_v0 }
0x111d   :  { %v2208_v4 = vsub.f32 %v2196_v60, %v2206_v2 }
0x111e   :  { %v2211_v5 = vmul.f32 %v2209_v3, %v2209_v3 }
0x111f   :  { %v2210_v6 = vmul.f32 %v2208_v4, %v2208_v4 }
0x1120   :  { %v2215_v7 = vsel %vm210_vm1, %v2211_v5, 0.0 }
0x1121   :  { %2216 = vadd.xlane.f32.xlu0 %v2215_v7  ;;  %v2212_v8 = vsel %vm210_vm1, %v2210_v6, 0.0 }
0x1122   :  { %2213 = vadd.xlane.f32.xlu1 %v2212_v8 }
0x11ae   :  { %v2217_v12 = vpop.xlane.xlu0 %2216 }
0x11af   :  { %v2219_v13 = vmul.f32 0.03125, %v2217_v12  ;;  %v2214_v14 = vpop.xlane.xlu1 %2213 }
0x11b0   :  { %v2218_v15 = vmul.f32 0.03125, %v2214_v14 }
0x11b1   :  { %v2221_v16 = vadd.f32 1e-05, %v2219_v13 }
0x11b2   :  { %v2220_v17 = vadd.f32 1e-05, %v2218_v15 }
0x11b3   :  { %7013 = vrsqrt.f32 %v2221_v16 }
0x11b4   :  { %7015 = vrsqrt.f32 %v2220_v17 }
0x11bd   :  { %v7014_v18 = vpop.eup %7013 }
0x11be   :  { %v7016_v20 = vpop.eup %7015  ;;  %v2225_v22 = vmul.f32 %v7014_v18, %v2209_v3 }
0x11bf   :  { %v2224_v23 = vmul.f32 %v7016_v20, %v2208_v4  ;;  %v7663_v20 = vld [vmem:[%s8208_s24] sm:$0xff]  ;;  %s8213_s24 = smov 48  }
0x11c0   :  { %v2233_v27 = vmul.f32 %v6021_v19, %v2225_v22 }
0x11c1   :  { %v2232_v28 = vmul.f32 %v6021_v19, %v2224_v23 }
0x11c2   :  { %v7568_v32 = vadd.f32 %v6022_v24, %v2233_v27 }
0x11c3   :  { %v7566_v29 = vadd.f32 %v6022_v24, %v2232_v28 }
0x11c5   :  { %6487 = vmatprep.mubr.msk.f32.mxu1 %vm210_vm1, %v7566_v29 }
0x11c6   :  { %6488 = vmatmul.mubr.msk.f32.vlgmr.msra.gmra.mrb[20].mxu1 %vm210_vm1, %v7568_v32 }
0x11c7   :  { %6502 = vmatprep.mubr.msk.f32.mxu1 %vm7111_vm2, %v7110_v26 }
0x1299   :  { %v6489_v37 = vpop.f32.mrb[20].mxu1 }
0x129a   :  { %v7579_v38 = vadd.f32 %v6489_v37, %v6028_v34  ;;  %v2327_v39 = vpop.f32.mrb[21].mxu1 }
0x129b   :  { %v7581_v40 = vadd.f32 %v6028_v34, %v2327_v39 }
0x129c   :  { %2424 = vrot.lane.b32.xlu0 %v7579_v38, %s7109_s26  ;;  %v7598_v44 = vmul.f32 0.35355338, %v7579_v38 }
0x129d   :  { %2346 = vrot.lane.b32.xlu1 %v7581_v40, %s7109_s26  ;;  %v7589_v42 = vmul.f32 0.35355338, %v7581_v40  ;;  %s8210_s26 = smov 80  }
0x130e   :  { %v2425_v43 = vpop.permute.xlu0 %2424 }
0x130f   :  { %v2347_v41 = vpop.permute.xlu1 %2346 }
0x1310   :  { %6491 = vmatpush3.xpose.msk.msra.mxu0 %vm302_vm3, %v2347_v41 }
0x1311   :  { %6495 = vmatprep.subr.mxu0 %v7110_v26 }
0x1313   :  { %6493 = vmatmul.mubr.msk.f32.vlgmr.msra.gmra.mrb[22].mxu0 %vm302_vm3, %v7589_v42 }
0x1314   :  { %6496 = vmatpush3.xpose.msk.msra.mxu0 %vm302_vm3, %v2425_v43  ;;  %6497 = vmatprep.mubr.msk.f32.mxu0 %vm7111_vm2, %v7110_v26 }
0x1315   :  { %6505 = vmatprep.subr.mxu0 %v7110_v26 }
0x1317   :  { %6498 = vmatmul.mubr.msk.f32.vlgmr.msra.gmra.mrb[24].mxu0 %vm302_vm3, %v7598_v44 }
0x1318   :  { %6507 = vmatprep.mubr.msk.f32.mxu0 %vm7111_vm2, %v7110_v26 }
0x13e6   :  { %v2419_v45 = vpop.f32.mrb[22].mxu0 }
0x13e7   :  { %v2420_v46 = vadd.f32 %v2419_v45, %v7337_v36  ;;  %v6494_v47 = vpop.f32.mrb[23].mxu0 }
0x13e9   :  { %v2501_v48 = vsel %vm302_vm3, %v2420_v46, -inf }
0x13ea   :  { %2502 = vmax.xlane.f32.xlu1 %v2501_v48  ;;  %v2497_v30 = vpop.f32.mrb[24].mxu0 }
0x13eb   :  { %v2498_v49 = vadd.f32 %v2497_v30, %v7337_v36  ;;  %v6499_v50 = vpop.f32.mrb[25].mxu0 }
0x13ed   :  { %v2504_v33 = vsel %vm302_vm3, %v2498_v49, -inf }
0x13ee   :  { %2505 = vmax.xlane.f32.xlu0 %v2504_v33 }
0x1477   :  { %v2503_v51 = vpop.xlane.xlu1 %2502 }
0x1478   :  { %v2507_v52 = vsub.f32 %v2420_v46, %v2503_v51 }
0x147a   :  { %v2509_v53 = vmul.f32 1.442695, %v2507_v52 }
0x147b   :  { %v2506_v54 = vpop.xlane.xlu0 %2505 }
0x147c   :  { %7017 = vpow2.f32 %v2509_v53  ;;  %v2508_v55 = vsub.f32 %v2498_v49, %v2506_v54 }
0x147e   :  { %v2511_v31 = vmul.f32 1.442695, %v2508_v55 }
0x1480   :  { %7019 = vpow2.f32 %v2511_v31 }
0x1486   :  { %v7018_v56 = vpop.eup %7017 }
0x1487   :  { %v2513_v57 = vsel %vm302_vm3, %v7018_v56, 0.0 }
0x1488   :  { %2514 = vadd.xlane.f32.xlu1 %v2513_v57 }
0x148a   :  { %v7020_v58 = vpop.eup %7019 }
0x148b   :  { %v2516_v59 = vsel %vm302_vm3, %v7020_v58, 0.0 }
0x148c   :  { %2517 = vadd.xlane.f32.xlu0 %v2516_v59 }
0x1499   :  { %2523 = vrot.lane.b32.xlu1 %v7581_v40, %s7112_s25 }
0x149d   :  { %2766 = vrot.lane.b32.xlu1 %v7581_v40, %s7113_s5 }
0x14a1   :  { %2764 = vrot.lane.b32.xlu1 %v7589_v42, %s7114_s1 }
0x14a2   :  { %2599 = vrot.lane.b32.xlu0 %v7579_v38, %s7112_s25  ;;  %s8211_s25 = smov 56  }
0x14a5   :  { %2842 = vrot.lane.b32.xlu1 %v7598_v44, %s7114_s1 }
0x14a6   :  { %2844 = vrot.lane.b32.xlu0 %v7579_v38, %s7113_s5  ;;  %s8212_s5 = smov 112  }
0x14a9   :  { %3179 = vrot.lane.b32.xlu1 %v7581_v40, %s8210_s26 }
0x1515   :  { %v2515_v60 = vpop.xlane.xlu1 %2514 }
0x1516   :  { %7021 = vrcp.f32 %v2515_v60 }
0x1519   :  { %v2524_v62 = vpop.permute.xlu1 %2523  ;;  %v2518_v63 = vpop.xlane.xlu0 %2517 }
0x151a   :  { %7023 = vrcp.f32 %v2518_v63  ;;  %6501 = vmatpush3.msra.mxu1 %v2524_v62 }
0x151b   :  { %6510 = vmatprep.subr.mxu1 %v6031_v61 }
0x151d   :  { %v2600_v0 = vpop.permute.xlu0 %2599  ;;  %v2767_v4 = vpop.permute.xlu1 %2766 }
0x151e   :  { %6506 = vmatpush3.msra.mxu0 %v2600_v0 }
0x151f   :  { %6515 = vmatprep.subr.mxu0 %v7110_v26 }
0x1520   :  { %v7022_v1 = vpop.eup %7021 }
0x1521   :  { %v2520_v2 = vmul.f32 %v7022_v1, %v7018_v56  ;;  %v2765_v6 = vpop.permute.xlu1 %2764  ;;  %v2845_v25 = vpop.permute.xlu0 %2844 }
0x1523   :  { %6503 = vmatmul.mubr.msk.f32.vlgmr.msra.gmra.mrb[22].mxu1 %vm302_vm3, %v2520_v2 }
0x1524   :  { %v7024_v3 = vpop.eup %7023  ;;  %6511 = vmatpush3.msra.mxu1 %v6031_v61  ;;  %v6032_v61 = vld [vmem:[%s8209_s6 + $0x28] sm:$0xff] }
0x1525   :  { %v2522_v5 = vmul.f32 %v7024_v3, %v7020_v58  ;;  %6520 = vmatprep.subr.mxu1 %v7110_v26  ;;  %v2843_v35 = vpop.permute.xlu1 %2842 }
0x1527   :  { %6508 = vmatmul.mubr.msk.f32.vlgmr.msra.gmra.mrb[26].mxu0 %vm302_vm3, %v2522_v5 }
0x1528   :  { %6516 = vmatpush3.xpose.msk.msra.mxu0 %vm302_vm3, %v2767_v4  ;;  %6517 = vmatprep.mubr.msk.f32.mxu0 %vm7111_vm2, %v7110_v26 }
0x1529   :  { %6525 = vmatprep.subr.mxu0 %v7110_v26  ;;  %v3180_v27 = vpop.permute.xlu1 %3179 }
0x152b   :  { %6518 = vmatmul.mubr.msk.f32.vlgmr.msra.gmra.mrb[28].mxu0 %vm302_vm3, %v2765_v6 }
0x152c   :  { %6527 = vmatprep.mubr.msk.f32.mxu0 %vm7111_vm2, %v7110_v26 }
0x15f6   :  { %v2595_v7 = vpop.f32.mrb[22].mxu1 }
0x15f7   :  { %v6504_v8 = vpop.f32.mrb[23].mxu1  ;;  %6512 = vmatprep.mubr.msk.f32.mxu1 %vm302_vm3, %v2595_v7 }
0x15fa   :  { %v2671_v9 = vpop.f32.mrb[26].mxu0 }
0x15fb   :  { %v6509_v21 = vpop.f32.mrb[27].mxu0  ;;  %6513 = vmatmul.mubr.msk.f32.vlgmr.msra.gmra.mrb[24].mxu1 %vm302_vm3, %v2671_v9 }
0x15fc   :  { %6521 = vmatpush3.xpose.msk.msra.mxu1 %vm302_vm3, %v2845_v25  ;;  %6522 = vmatprep.mubr.msk.f32.mxu1 %vm7111_vm2, %v7110_v26 }
0x15fd   :  { %6530 = vmatprep.subr.mxu1 %v7110_v26 }
0x15fe   :  { %v2838_v10 = vpop.f32.mrb[28].mxu0 }
0x15ff   :  { %v2839_v11 = vadd.f32 %v2838_v10, %v7337_v36  ;;  %v6519_v12 = vpop.f32.mrb[29].mxu0  ;;  %6523 = vmatmul.mubr.msk.f32.vlgmr.msra.gmra.mrb[26].mxu1 %vm302_vm3, %v2843_v35  ;;  %v6033_v35 = vld [vmem:[%s8209_s6 + $0x30] sm:$0xff] }
0x1600   :  { %6532 = vmatprep.mubr.msk.f32.mxu1 %vm7111_vm2, %v7110_v26 }
0x1601   :  { %v2920_v13 = vsel %vm302_vm3, %v2839_v11, -inf }
0x1602   :  { %2921 = vmax.xlane.f32.xlu0 %v2920_v13 }
0x1618   :  { %2942 = vrot.lane.b32.xlu0 %v7581_v40, %s8211_s25 }
0x161c   :  { %3177 = vrot.lane.b32.xlu0 %v7589_v42, %s8212_s5 }
0x1620   :  { %3255 = vrot.lane.b32.xlu0 %v7598_v44, %s8212_s5 }
0x168f   :  { %v2922_v14 = vpop.xlane.xlu0 %2921 }
0x1690   :  { %v2926_v36 = vsub.f32 %v2839_v11, %v2922_v14 }
0x1692   :  { %v2928_v15 = vmul.f32 1.442695, %v2926_v36 }
0x1693   :  { %v2943_v16 = vpop.permute.xlu0 %2942 }
0x1694   :  { %7025 = vpow2.f32 %v2928_v15  ;;  %6526 = vmatpush3.msra.mxu0 %v2943_v16 }
0x1695   :  { %6540 = vmatprep.subr.mxu0 %v7110_v26 }
0x1697   :  { %v3178_v39 = vpop.permute.xlu0 %3177 }
0x169b   :  { %v3256_v43 = vpop.permute.xlu0 %3255 }
0x169e   :  { %v7026_v17 = vpop.eup %7025 }
0x169f   :  { %v2932_v18 = vsel %vm302_vm3, %v7026_v17, 0.0 }
0x16a0   :  { %2933 = vadd.xlane.f32.xlu1 %v2932_v18 }
0x16b1   :  { %3257 = vrot.lane.b32.xlu1 %v7579_v38, %s8210_s26 }
0x16d2   :  { %v2916_v19 = vpop.f32.mrb[26].mxu1 }
0x16d3   :  { %v2917_v22 = vadd.f32 %v7663_v20, %v2916_v19  ;;  %v6524_v23 = vpop.f32.mrb[27].mxu1 }
0x16d5   :  { %v2923_v24 = vsel %vm302_vm3, %v2917_v22, -inf }
0x16d6   :  { %2924 = vmax.xlane.f32.xlu1 %v2923_v24 }
0x172d   :  { %v2934_v28 = vpop.xlane.xlu1 %2933 }
0x172e   :  { %7027 = vrcp.f32 %v2934_v28 }
0x1731   :  { %v3258_v41 = vpop.permute.xlu1 %3257 }
0x1738   :  { %v7028_v34 = vpop.eup %7027 }
0x1739   :  { %v2939_v37 = vmul.f32 %v7028_v34, %v7026_v17 }
0x173b   :  { %6528 = vmatmul.mubr.msk.f32.vlgmr.msra.gmra.mrb[30].mxu0 %vm302_vm3, %v2939_v37 }
0x173c   :  { %6541 = vmatpush3.xpose.msk.msra.mxu0 %vm302_vm3, %v3180_v27  ;;  %6542 = vmatprep.mubr.msk.f32.mxu0 %vm7111_vm2, %v7110_v26 }
0x173d   :  { %6545 = vmatprep.subr.mxu0 %v7110_v26 }
0x173f   :  { %6543 = vmatmul.mubr.msk.f32.vlgmr.msra.gmra.mrb[32].mxu0 %vm302_vm3, %v3178_v39 }
0x1740   :  { %6546 = vmatpush3.xpose.msk.msra.mxu0 %vm302_vm3, %v3258_v41  ;;  %6547 = vmatprep.mubr.msk.f32.mxu0 %vm7111_vm2, %v7110_v26 }
0x1741   :  { %6555 = vmatprep.subr.mxu0 %v7110_v26 }
0x1743   :  { %6548 = vmatmul.mubr.msk.f32.vlgmr.msra.gmra.mrb[34].mxu0 %vm302_vm3, %v3256_v43 }
0x1744   :  { %6557 = vmatprep.mubr.msk.f32.mxu0 %vm7111_vm2, %v7110_v26 }
0x1763   :  { %v2925_v45 = vpop.xlane.xlu1 %2924 }
0x1764   :  { %v2927_v46 = vsub.f32 %v2917_v22, %v2925_v45 }
0x1766   :  { %v2930_v47 = vmul.f32 1.442695, %v2927_v46 }
0x1768   :  { %7029 = vpow2.f32 %v2930_v47 }
0x1772   :  { %v7030_v48 = vpop.eup %7029 }
0x1773   :  { %v2935_v30 = vsel %vm302_vm3, %v7030_v48, 0.0 }
0x1774   :  { %2936 = vadd.xlane.f32.xlu0 %v2935_v30 }
0x178a   :  { %3018 = vrot.lane.b32.xlu0 %v7579_v38, %s8211_s25 }
0x178e   :  { %3431 = vrot.lane.b32.xlu0 %v7579_v38, %s8213_s24 }
0x1792   :  { %3592 = vrot.lane.b32.xlu0 %v7581_v40, %s8214_s29 }
0x1796   :  { %3670 = vrot.lane.b32.xlu0 %v7579_v38, %s8214_s29 }
0x179a   :  { %3590 = vrot.lane.b32.xlu0 %v7589_v42, %s8215_s0 }
0x1801   :  { %v2937_v49 = vpop.xlane.xlu0 %2936 }
0x1802   :  { %7031 = vrcp.f32 %v2937_v49 }
0x1805   :  { %v3019_v50 = vpop.permute.xlu0 %3018 }
0x1806   :  { %6531 = vmatpush3.msra.mxu1 %v3019_v50 }
0x1807   :  { %6535 = vmatprep.subr.mxu1 %v6032_v61 }
0x1809   :  { %v3432_v33 = vpop.permute.xlu0 %3431 }
0x180a   :  { %6556 = vmatpush3.msra.mxu0 %v3432_v33 }
0x180b   :  { %6565 = vmatprep.subr.mxu0 %v7110_v26 }
0x180c   :  { %v7032_v51 = vpop.eup %7031 }
0x180d   :  { %v2941_v52 = vmul.f32 %v7032_v51, %v7030_v48  ;;  %v3593_v11 = vpop.permute.xlu0 %3592 }
0x180e   :  { %v3014_v53 = vpop.f32.mrb[30].mxu0 }
0x180f   :  { %v6529_v54 = vpop.f32.mrb[31].mxu0  ;;  %6533 = vmatmul.mubr.msk.f32.vlgmr.msra.gmra.mrb[28].mxu1 %vm302_vm3, %v2941_v52 }
0x1810   :  { %6537 = vmatprep.mubr.msk.f32.mxu1 %vm302_vm3, %v3014_v53  ;;  %6536 = vmatpush3.msra.mxu1 %v6032_v61 }
0x1811   :  { %6550 = vmatprep.subr.mxu1 %v7110_v26  ;;  %v3671_v14 = vpop.permute.xlu0 %3670 }
0x1812   :  { %v3251_v55 = vpop.f32.mrb[32].mxu0 }
0x1813   :  { %v3252_v31 = vadd.f32 %v7663_v20, %v3251_v55  ;;  %v6544_v42 = vpop.f32.mrb[33].mxu0  ;;  %v6034_v55 = vld [vmem:[%s8209_s6 + $0x38] sm:$0xff] }
0x1815   :  { %v3333_v56 = vsel %vm302_vm3, %v3252_v31, -inf  ;;  %v3591_v15 = vpop.permute.xlu0 %3590 }
0x1816   :  { %3334 = vmax.xlane.f32.xlu1 %v3333_v56  ;;  %v3329_v57 = vpop.f32.mrb[34].mxu0 }
0x1817   :  { %v3330_v58 = vadd.f32 %v7663_v20, %v3329_v57  ;;  %v6549_v59 = vpop.f32.mrb[35].mxu0 }
0x1819   :  { %v3336_v60 = vsel %vm302_vm3, %v3330_v58, -inf }
0x181a   :  { %3337 = vmax.xlane.f32.xlu1 %v3336_v60  ;;  %v6044_v60 = vld [vmem:[%s8157_s8 + $0x1] ss:$0 sm:$0xff] }
0x18a3   :  { %v3335_v62 = vpop.xlane.xlu1 %3334 }
0x18a4   :  { %v3339_v63 = vsub.f32 %v3252_v31, %v3335_v62 }
0x18a6   :  { %v3341_v0 = vmul.f32 1.442695, %v3339_v63 }
0x18a7   :  { %v3338_v1 = vpop.xlane.xlu1 %3337 }
0x18a8   :  { %7033 = vpow2.f32 %v3341_v0  ;;  %v3340_v2 = vsub.f32 %v3330_v58, %v3338_v1 }
0x18aa   :  { %v3343_v3 = vmul.f32 1.442695, %v3340_v2 }
0x18ac   :  { %7035 = vpow2.f32 %v3343_v3 }
0x18b2   :  { %v7034_v4 = vpop.eup %7033 }
0x18b3   :  { %v3345_v5 = vsel %vm302_vm3, %v7034_v4, 0.0 }
0x18b4   :  { %3346 = vadd.xlane.f32.xlu1 %v3345_v5 }
0x18b6   :  { %v7036_v6 = vpop.eup %7035 }
0x18b7   :  { %v3348_v7 = vsel %vm302_vm3, %v7036_v6, 0.0 }
0x18b8   :  { %3349 = vadd.xlane.f32.xlu1 %v3348_v7 }
0x18c9   :  { %3355 = vrot.lane.b32.xlu1 %v7581_v40, %s8213_s24 }
0x18cd   :  { %3668 = vrot.lane.b32.xlu1 %v7598_v44, %s8215_s0 }
0x18e2   :  { %v3090_v8 = vpop.f32.mrb[28].mxu1 }
0x18e3   :  { %v6534_v9 = vpop.f32.mrb[29].mxu1  ;;  %6538 = vmatmul.mubr.msk.f32.vlgmr.msra.gmra.mrb[24].mxu1 %vm302_vm3, %v3090_v8 }
0x18e4   :  { %6552 = vmatprep.mubr.msk.f32.mxu1 %vm7111_vm2, %v7110_v26 }
0x1941   :  { %v3347_v25 = vpop.xlane.xlu1 %3346 }
0x1942   :  { %7037 = vrcp.f32 %v3347_v25 }
0x1945   :  { %v3350_v21 = vpop.xlane.xlu1 %3349 }
0x1946   :  { %7039 = vrcp.f32 %v3350_v21 }
0x1949   :  { %v3356_v10 = vpop.permute.xlu1 %3355 }
0x194a   :  { %6551 = vmatpush3.msra.mxu1 %v3356_v10 }
0x194b   :  { %6560 = vmatprep.subr.mxu1 %v6033_v35 }
0x194c   :  { %v7038_v44 = vpop.eup %7037 }
0x194d   :  { %v3352_v12 = vmul.f32 %v7038_v44, %v7034_v4  ;;  %v3669_v22 = vpop.permute.xlu1 %3668 }
0x194f   :  { %6553 = vmatmul.mubr.msk.f32.vlgmr.msra.gmra.mrb[30].mxu1 %vm302_vm3, %v3352_v12  ;;  %v6075_v12 = vld [vmem:[%s8160_s11 + $0x30] sm:$0xff] }
0x1950   :  { %v7040_v13 = vpop.eup %7039  ;;  %6561 = vmatpush3.msra.mxu1 %v6033_v35 }
0x1951   :  { %v3354_v36 = vmul.f32 %v7040_v13, %v7036_v6  ;;  %6570 = vmatprep.subr.mxu1 %v7110_v26  ;;  %v6076_v13 = vld [vmem:[%s8160_s11 + $0x38] sm:$0xff] }
0x1953   :  { %6558 = vmatmul.mubr.msk.f32.vlgmr.msra.gmra.mrb[36].mxu0 %vm302_vm3, %v3354_v36  ;;  %v6081_v36 = vld [vmem:[%s8162_s13 + $0x40] sm:$0xff] }
0x1954   :  { %6566 = vmatpush3.xpose.msk.msra.mxu0 %vm302_vm3, %v3593_v11  ;;  %6567 = vmatprep.mubr.msk.f32.mxu0 %vm7111_vm2, %v7110_v26  ;;  %v6074_v11 = vld [vmem:[%s8160_s11 + $0x28] sm:$0xff] }
0x1955   :  { %6575 = vmatprep.subr.mxu0 %v7110_v26 }
0x1957   :  { %6568 = vmatmul.mubr.msk.f32.vlgmr.msra.gmra.mrb[38].mxu0 %vm302_vm3, %v3591_v15  ;;  %v6082_v15 = vld [vmem:[%s8162_s13 + $0x48] sm:$0xff] }
0x1958   :  { %6577 = vmatprep.mubr.msk.f32.mxu0 %vm7111_vm2, %v7110_v26 }
0x1a22   :  { %v3427_v16 = vpop.f32.mrb[30].mxu1 }
0x1a23   :  { %v6554_v17 = vpop.f32.mrb[31].mxu1  ;;  %6562 = vmatprep.mubr.msk.f32.mxu1 %vm302_vm3, %v3427_v16  ;;  %v6083_v16 = vld [vmem:[%s8162_s13 + $0x50] sm:$0xff] }
0x1a24   :  { %v6691_v17 = vpack.c.bf16 %v6082_v15, %v6081_v36  ;;  %v4302_v36 = vld [vmem:[#allocation2 + $0x40] sm:$0xff] }
0x1a25   :  { %v4306_v15 = vld [vmem:[#allocation2 + $0x60] sm:$0xff] }
0x1a26   :  { %v3503_v18 = vpop.f32.mrb[36].mxu0 }
0x1a27   :  { %v6559_v19 = vpop.f32.mrb[37].mxu0  ;;  %6563 = vmatmul.mubr.msk.f32.vlgmr.msra.gmra.mrb[24].mxu1 %vm302_vm3, %v3503_v18  ;;  %v6084_v18 = vld [vmem:[%s8162_s13 + $0x58] sm:$0xff] }
0x1a28   :  { %6571 = vmatpush3.xpose.msk.msra.mxu1 %vm302_vm3, %v3671_v14  ;;  %6572 = vmatprep.mubr.msk.f32.mxu1 %vm7111_vm2, %v7110_v26  ;;  %v6687_v14 = vpack.c.bf16 %v6076_v13, %v6075_v12  ;;  %v6695_v19 = vpack.c.bf16 %v6084_v18, %v6083_v16  ;;  %v4303_v12 = vld [vmem:[#allocation2 + $0x48] sm:$0xff]  ;;  %v6713_v16 = vpack.c.bf16 %v4306_v15, %v4302_v36  ;;  %v4301_v18 = vld [vmem:[#allocation2 + $0x38] sm:$0xff] }
0x1a29   :  { %6580 = vmatprep.subr.mxu1 %v7110_v26  ;;  %v4307_v13 = vld [vmem:[#allocation2 + $0x68] sm:$0xff] }
0x1a2a   :  { %v3664_v23 = vpop.f32.mrb[38].mxu0 }
0x1a2b   :  { %v3665_v24 = vadd.f32 %v7663_v20, %v3664_v23  ;;  %v6569_v27 = vpop.f32.mrb[39].mxu0  ;;  %6573 = vmatmul.mubr.msk.f32.vlgmr.msra.gmra.mrb[32].mxu1 %vm302_vm3, %v3669_v22  ;;  %v6085_v22 = vld [vmem:[%s8162_s13 + $0x60] sm:$0xff]  ;;  %v6086_v23 = vld [vmem:[%s8162_s13 + $0x68] sm:$0xff] }
0x1a2c   :  { %6582 = vmatprep.mubr.msk.f32.mxu1 %vm7111_vm2, %v7110_v26 }
0x1a2d   :  { %v3746_v28 = vsel %vm302_vm3, %v3665_v24, -inf }
0x1a2e   :  { %3747 = vmax.xlane.f32.xlu0 %v3746_v28 }
0x1abb   :  { %v3748_v34 = vpop.xlane.xlu0 %3747 }
0x1abc   :  { %v3752_v37 = vsub.f32 %v3665_v24, %v3748_v34  ;;  %v6699_v24 = vpack.c.bf16 %v6086_v23, %v6085_v22 }
0x1abe   :  { %v3754_v39 = vmul.f32 1.442695, %v3752_v37 }
0x1ac0   :  { %7041 = vpow2.f32 %v3754_v39 }
0x1aca   :  { %v7042_v41 = vpop.eup %7041 }
0x1acb   :  { %v3758_v43 = vsel %vm302_vm3, %v7042_v41, 0.0 }
0x1acc   :  { %3759 = vadd.xlane.f32.xlu0 %v3758_v43 }
0x1afe   :  { %v3742_v45 = vpop.f32.mrb[32].mxu1 }
0x1aff   :  { %v3743_v46 = vadd.f32 %v7663_v20, %v3742_v45  ;;  %v6574_v47 = vpop.f32.mrb[33].mxu1  ;;  %v6071_v45 = vld [vmem:[%s8158_s9 + $0x1] ss:$0 sm:$0xff] }
0x1b01   :  { %v3749_v48 = vsel %vm302_vm3, %v3743_v46, -inf }
0x1b02   :  { %3750 = vmax.xlane.f32.xlu1 %v3749_v48 }
0x1b13   :  { %3768 = vrot.lane.b32.xlu1 %v7581_v40, %s8216_s2 }
0x1b59   :  { %v3760_v30 = vpop.xlane.xlu0 %3759 }
0x1b5a   :  { %7043 = vrcp.f32 %v3760_v30  ;;  %v6072_v30 = vld [vmem:[%s8159_s10 + $0x1] ss:$0 sm:$0xff] }
0x1b64   :  { %v7044_v50 = vpop.eup %7043 }
0x1b65   :  { %v3765_v52 = vmul.f32 %v7044_v50, %v7042_v41 }
0x1b8f   :  { %v3751_v49 = vpop.xlane.xlu1 %3750 }
0x1b90   :  { %v3753_v33 = vsub.f32 %v3743_v46, %v3751_v49 }
0x1b92   :  { %v3756_v51 = vmul.f32 1.442695, %v3753_v33 }
0x1b93   :  { %v3769_v53 = vpop.permute.xlu1 %3768 }
0x1b94   :  { %7045 = vpow2.f32 %v3756_v51  ;;  %6576 = vmatpush3.msra.mxu0 %v3769_v53  ;;  %v6088_v53 = vld [vmem:[%s8162_s13 + $0x78] sm:$0xff] }
0x1b95   :  { %6578 = vmatmul.mubr.msk.f32.vlgmr.msra.gmra.mrb[40].mxu0 %vm302_vm3, %v3765_v52  ;;  %v6087_v52 = vld [vmem:[%s8162_s13 + $0x70] sm:$0xff] }
0x1b9e   :  { %v7046_v20 = vpop.eup %7045 }
0x1b9f   :  { %v3761_v54 = vsel %vm302_vm3, %v7046_v20, 0.0 }
0x1ba0   :  { %3762 = vadd.xlane.f32.xlu0 %v3761_v54  ;;  %v6078_v54 = vld [vmem:[%s8161_s12 + $0x1] ss:$0 sm:$0xff] }
0x1bb6   :  { %3844 = vrot.lane.b32.xlu0 %v7579_v38, %s8216_s2 }
0x1c2d   :  { %v3763_v40 = vpop.xlane.xlu0 %3762 }
0x1c2e   :  { %7047 = vrcp.f32 %v3763_v40 }
0x1c31   :  { %v3845_v31 = vpop.permute.xlu0 %3844 }
0x1c32   :  { %6581 = vmatpush3.msra.mxu1 %v3845_v31 }
0x1c33   :  { %6585 = vmatprep.subr.mxu1 %v6034_v55 }
0x1c38   :  { %v7048_v42 = vpop.eup %7047 }
0x1c39   :  { %v3767_v56 = vmul.f32 %v7048_v42, %v7046_v20  ;;  %v6703_v20 = vpack.c.bf16 %v6088_v53, %v6087_v52  ;;  %v5660_v52 = vld [vmem:[%s8168_s19 + $0x8] sm:$0xff]  ;;  %v5677_v53 = vld [vmem:[%s8168_s19 + $0x90] sm:$0xff] }
0x1c3b   :  { %6583 = vmatmul.mubr.msk.f32.vlgmr.msra.gmra.mrb[34].mxu1 %vm302_vm3, %v3767_v56 }
0x1c3c   :  { %6586 = vmatpush3.msra.mxu1 %v6034_v55 }
0x1c3d   :  { %6692 = vmatprep.subr.bf16.mxu1 %v6691_v17 }
0x1c68   :  { %v3840_v57 = vpop.f32.mrb[40].mxu0 }
0x1c69   :  { %v6579_v58 = vpop.f32.mrb[41].mxu0  ;;  %6587 = vmatprep.mubr.msk.f32.mxu1 %vm302_vm3, %v3840_v57 }
0x1c6a   :  { %v6090_v58 = vld [vmem:[%s8163_s14 + $0x1] ss:$0 sm:$0xff] }
0x1d0e   :  { %v3916_v59 = vpop.f32.mrb[34].mxu1 }
0x1d0f   :  { %v6584_v38 = vpop.f32.mrb[35].mxu1  ;;  %6588 = vmatmul.mubr.msk.f32.vlgmr.msra.gmra.mrb[24].mxu1 %vm302_vm3, %v3916_v59 }
0x1d10   :  { %6694 = vmatpush3.bf16.msra.mxu1 %v6691_v17  ;;  %v4297_v17 = vld [vmem:[#allocation2 + $0x18] sm:$0xff] }
0x1d11   :  { %6696 = vmatprep.subr.bf16.mxu1 %v6695_v19 }
0x1d14   :  { %6698 = vmatpush3.bf16.msra.mxu1 %v6695_v19  ;;  %v6715_v19 = vpack.c.bf16 %v4301_v18, %v4297_v17  ;;  %v4489_v17 = vld [vmem:[#allocation2 + $0xa0] sm:$0xff]  ;;  %v4494_v18 = vld [vmem:[#allocation2 + $0xc8] sm:$0xff] }
0x1d15   :  { %6700 = vmatprep.subr.bf16.mxu1 %v6699_v24 }
0x1d18   :  { %6702 = vmatpush3.bf16.msra.mxu1 %v6699_v24 }
0x1d19   :  { %6704 = vmatprep.subr.bf16.mxu1 %v6703_v20 }
0x1d1c   :  { %6706 = vmatpush3.bf16.msra.mxu1 %v6703_v20  ;;  %v5678_v20 = vld [vmem:[%s8168_s19 + $0x98] sm:$0xff] }
0x1de2   :  { %v6589_v61 = vpop.f32.mrb[24].mxu1 }
0x1de3   :  { %v6913_v62 = vadd.f32 %v6589_v61, %v6044_v60  ;;  %v3992_v63 = vpop.f32.mrb[25].mxu1 }
0x1de4   :  { %v6914_v0 = vadd.f32 %v6044_v60, %v3992_v63 }
0x1de5   :  { %v4004_v1 = vadd.f32 %v6913_v62, %v7568_v32 }
0x1de6   :  { %v4003_v2 = vadd.f32 %v6914_v0, %v7566_v29  ;;  %v6073_v29 = vld [vmem:[%s8160_s11 + $0x20] sm:$0xff] }
0x1de7   :  { %v4012_v3 = vsel %vm210_vm1, %v4004_v1, 0.0  ;;  %v6683_v44 = vpack.c.bf16 %v6074_v11, %v6073_v29  ;;  %v4294_v29 = vld [vmem:[#allocation2] sm:$0xff] }
0x1de8   :  { %4013 = vadd.xlane.f32.xlu0 %v4012_v3  ;;  %v4009_v4 = vsel %vm210_vm1, %v4003_v2, 0.0  ;;  %v4298_v11 = vld [vmem:[#allocation2 + $0x20] sm:$0xff] }
0x1de9   :  { %4010 = vadd.xlane.f32.xlu1 %v4009_v4  ;;  %6684 = vmatprep.subr.bf16.mxu0 %v6683_v44 }
0x1dea   :  { %6686 = vmatpush3.bf16.msra.mxu0 %v6683_v44  ;;  %v6709_v44 = vpack.c.bf16 %v4298_v11, %v4294_v29  ;;  %v5681_v11 = vld [vmem:[%s8168_s19 + $0xb0] sm:$0xff] }
0x1deb   :  { %6688 = vmatprep.subr.bf16.mxu0 %v6687_v14 }
0x1dee   :  { %6690 = vmatpush3.bf16.msra.mxu0 %v6687_v14  ;;  %v6711_v14 = vpack.c.bf16 %v4307_v13, %v4303_v12 }
0x1e75   :  { %v4014_v5 = vpop.xlane.xlu0 %4013 }
0x1e76   :  { %v4016_v6 = vmul.f32 0.03125, %v4014_v5  ;;  %v4011_v7 = vpop.xlane.xlu1 %4010 }
0x1e77   :  { %v4015_v8 = vmul.f32 0.03125, %v4011_v7 }
0x1e78   :  { %v4018_v9 = vsub.f32 %v4004_v1, %v4016_v6 }
0x1e79   :  { %v4017_v25 = vsub.f32 %v4003_v2, %v4015_v8 }
0x1e7a   :  { %v4020_v21 = vmul.f32 %v4018_v9, %v4018_v9 }
0x1e7b   :  { %v4019_v35 = vmul.f32 %v4017_v25, %v4017_v25 }
0x1e7c   :  { %v4024_v10 = vsel %vm210_vm1, %v4020_v21, 0.0 }
0x1e7d   :  { %4025 = vadd.xlane.f32.xlu0 %v4024_v10  ;;  %v4021_v32 = vsel %vm210_vm1, %v4019_v35, 0.0  ;;  %v4295_v35 = vld [vmem:[#allocation2 + $0x8] sm:$0xff] }
0x1e7e   :  { %4022 = vadd.xlane.f32.xlu1 %v4021_v32  ;;  %v4299_v10 = vld [vmem:[#allocation2 + $0x28] sm:$0xff] }
0x1e7f   :  { %v6707_v32 = vpack.c.bf16 %v4299_v10, %v4295_v35  ;;  %v5663_v35 = vld [vmem:[%s8168_s19 + $0x20] sm:$0xff]  ;;  %v5664_v10 = vld [vmem:[%s8168_s19 + $0x28] sm:$0xff] }
0x1e81   :  { %6708 = vmatprep.subr.bf16.mxu0 %v6707_v32 }
0x1f0a   :  { %v4026_v27 = vpop.xlane.xlu0 %4025 }
0x1f0b   :  { %v4028_v28 = vmul.f32 0.03125, %v4026_v27  ;;  %v4023_v34 = vpop.xlane.xlu1 %4022 }
0x1f0c   :  { %v4027_v37 = vmul.f32 0.03125, %v4023_v34 }
0x1f0d   :  { %v4030_v39 = vadd.f32 1e-05, %v4028_v28 }
0x1f0e   :  { %v4029_v41 = vadd.f32 1e-05, %v4027_v37 }
0x1f0f   :  { %7049 = vrsqrt.f32 %v4030_v39  ;;  %v6095_v39 = vld [vmem:[%s8164_s15 + $0x1] ss:$0 sm:$0xff] }
0x1f10   :  { %7051 = vrsqrt.f32 %v4029_v41 }
0x1f19   :  { %v7050_v43 = vpop.eup %7049 }
0x1f1a   :  { %v7052_v46 = vpop.eup %7051  ;;  %v4034_v47 = vmul.f32 %v7050_v43, %v4018_v9  ;;  %v6096_v43 = vld [vmem:[%s8165_s16 + $0x1] ss:$0 sm:$0xff] }
0x1f1b   :  { %v4033_v48 = vmul.f32 %v7052_v46, %v4017_v25 }
0x1f1c   :  { %v4042_v49 = vmul.f32 %v6071_v45, %v4034_v47  ;;  %v4296_v47 = vld [vmem:[#allocation2 + $0x10] sm:$0xff] }
0x1f1d   :  { %v4041_v50 = vmul.f32 %v6071_v45, %v4033_v48  ;;  %v4300_v48 = vld [vmem:[#allocation2 + $0x30] sm:$0xff] }
0x1f1e   :  { %v4050_v51 = vadd.f32 %v6072_v30, %v4042_v49  ;;  %v5676_v49 = vld [vmem:[%s8168_s19 + $0x88] sm:$0xff] }
0x1f1f   :  { %v4049_v33 = vadd.f32 %v6072_v30, %v4041_v50  ;;  %v5675_v30 = vld [vmem:[%s8168_s19 + $0x80] sm:$0xff] }
0x1f20   :  { %v5659_v50 = vld [vmem:[%s8168_s19] sm:$0xff] }
0x1f21   :  { %6598 = vmatprep.mubr.msk.f32.mxu0 %vm210_vm1, %v4049_v33 }
0x1f22   :  { %6599 = vmatmul.mubr.msk.f32.vlgmr.msra.gmra.mrb[42].mxu0 %vm210_vm1, %v4050_v51 }
0x1f23   :  { %4381 = vmatprep.mubr.f32.mxu0 %v7110_v26  ;;  %6710 = vmatpush1.bf16.msra.mxu0 %v6709_v44  ;;  %v5682_v44 = vld [vmem:[%s8168_s19 + $0xb8] sm:$0xff] }
0x1f24   :  { %6712 = vmatprep.subr.bf16.mxu0 %v6711_v14 }
0x1f27   :  { %6714 = vmatpush1.bf16.msra.mxu0 %v6713_v16  ;;  %v4485_v16 = vld [vmem:[#allocation2 + $0x80] sm:$0xff] }
0x1f28   :  { %6716 = vmatprep.subr.bf16.mxu0 %v6715_v19  ;;  %v6845_v19 = vpack.c.bf16 %v5664_v10, %v5663_v35  ;;  %v4652_v35 = vld [vmem:[#allocation2 + $0x100] sm:$0xff] }
0x1f29   :  { %v4656_v10 = vld [vmem:[#allocation2 + $0x120] sm:$0xff] }
0x1ff5   :  { %v6600_v40 = vpop.f32.mrb[42].mxu0 }
0x1ff6   :  { %v4142_v55 = vadd.f32 %v6600_v40, %v6078_v54  ;;  %v4136_v31 = vpop.f32.mrb[43].mxu0  ;;  %v4305_v40 = vld [vmem:[#allocation2 + $0x58] sm:$0xff] }
0x1ff7   :  { %v4137_v42 = vadd.f32 %v6078_v54, %v4136_v31  ;;  %v6837_v31 = vpack.c.bf16 %v5660_v52, %v5659_v50  ;;  %v5667_v50 = vld [vmem:[%s8168_s19 + $0x40] sm:$0xff]  ;;  %v5686_v52 = vld [vmem:[%s8168_s19 + $0xd8] sm:$0xff] }
0x1ff8   :  { %v4146_v57 = vmax.f32 %v4142_v55, 0.0  ;;  %v4309_v55 = vld [vmem:[#allocation2 + $0x78] sm:$0xff] }
0x1ff9   :  { %v4145_v56 = vmax.f32 %v4137_v42, 0.0  ;;  %v6839_v42 = vpack.c.bf16 %v5678_v20, %v5677_v53 }
0x1ffb   :  { %6617 = vmatprep.mubr.msk.f32.mxu1 %vm2114_vm4, %v4145_v56  ;;  %v5661_v56 = vld [vmem:[%s8168_s19 + $0x10] sm:$0xff] }
0x1ffc   :  { %6618 = vmatmul.mubr.msk.f32.vlgmr.msra.gmra.mrb[36].mxu1 %vm2114_vm4, %v4146_v57 }
0x20cf   :  { %v6619_v59 = vpop.f32.mrb[36].mxu1 }
0x20d0   :  { %v4242_v38 = vadd.f32 %v6619_v59, %v6090_v58  ;;  %v4236_v60 = vpop.f32.mrb[37].mxu1  ;;  %v5679_v59 = vld [vmem:[%s8168_s19 + $0xa0] sm:$0xff] }
0x20d1   :  { %v4237_v61 = vadd.f32 %v6090_v58, %v4236_v60  ;;  %v5662_v58 = vld [vmem:[%s8168_s19 + $0x18] sm:$0xff] }
0x20d2   :  { %v4246_v62 = vadd.f32 %v4242_v38, %v4050_v51  ;;  %v6835_v51 = vpack.c.bf16 %v5676_v49, %v5675_v30  ;;  %v5680_v38 = vld [vmem:[%s8168_s19 + $0xa8] sm:$0xff]  ;;  %v4492_v30 = vld [vmem:[#allocation2 + $0xb8] sm:$0xff] }
0x20d3   :  { %v4245_v63 = vadd.f32 %v4237_v61, %v4049_v33 }
0x20d4   :  { %v4254_v0 = vsel %vm210_vm1, %v4246_v62, 0.0  ;;  %6836 = vmatprep.subr.bf16.mxu1 %v6835_v51  ;;  %v5685_v51 = vld [vmem:[%s8168_s19 + $0xd0] sm:$0xff] }
0x20d5   :  { %4255 = vadd.xlane.f32.xlu1 %v4254_v0  ;;  %v4251_v1 = vsel %vm210_vm1, %v4245_v63, 0.0  ;;  %6838 = vmatpush3.bf16.msra.mxu1 %v6837_v31  ;;  %v4308_v0 = vld [vmem:[#allocation2 + $0x70] sm:$0xff] }
0x20d6   :  { %4252 = vadd.xlane.f32.xlu0 %v4251_v1  ;;  %6840 = vmatprep.subr.bf16.mxu1 %v6839_v42 }
0x2162   :  { %v4256_v2 = vpop.xlane.xlu1 %4255 }
0x2163   :  { %v4258_v3 = vmul.f32 0.03125, %v4256_v2  ;;  %v4253_v4 = vpop.xlane.xlu0 %4252  ;;  %v6719_v2 = vpack.c.bf16 %v4309_v55, %v4305_v40  ;;  %v4491_v40 = vld [vmem:[#allocation2 + $0xb0] sm:$0xff]  ;;  %v4496_v55 = vld [vmem:[#allocation2 + $0xd8] sm:$0xff] }
0x2164   :  { %v4257_v5 = vmul.f32 0.03125, %v4253_v4 }
0x2165   :  { %v4260_v6 = vsub.f32 %v4246_v62, %v4258_v3  ;;  %v6717_v62 = vpack.c.bf16 %v4300_v48, %v4296_v47  ;;  %v4486_v3 = vld [vmem:[#allocation2 + $0x88] sm:$0xff]  ;;  %v4488_v47 = vld [vmem:[#allocation2 + $0x98] sm:$0xff] }
0x2166   :  { %v4259_v7 = vsub.f32 %v4245_v63, %v4257_v5  ;;  %v4304_v63 = vld [vmem:[#allocation2 + $0x50] sm:$0xff]  ;;  %v6841_v5 = vpack.c.bf16 %v5662_v58, %v5661_v56  ;;  %v6731_v20 = vpack.c.bf16 %v4492_v30, %v4488_v47  ;;  %v4500_v56 = vld [vmem:[#allocation2 + $0xf8] sm:$0xff]  ;;  %v6855_v58 = vpack.c.bf16 %v5686_v52, %v5685_v51  ;;  %v4825_v30 = vld [vmem:[#allocation2 + $0x1a8] sm:$0xff] }
0x2167   :  { %v4262_v8 = vmul.f32 %v4260_v6, %v4260_v6  ;;  %v6721_v32 = vpack.c.bf16 %v4308_v0, %v4304_v63  ;;  %v6735_v0 = vpack.c.bf16 %v4500_v56, %v4496_v55  ;;  %v4824_v51 = vld [vmem:[#allocation2 + $0x1a0] sm:$0xff]  ;;  %v4829_v52 = vld [vmem:[#allocation2 + $0x1c8] sm:$0xff] }
0x2168   :  { %v4261_v9 = vmul.f32 %v4259_v7, %v4259_v7  ;;  %6842 = vmatpush3.bf16.msra.mxu1 %v6841_v5  ;;  %v4832_v55 = vld [vmem:[#allocation2 + $0x1e0] sm:$0xff] }
0x2169   :  { %v4266_v25 = vsel %vm210_vm1, %v4262_v8, 0.0  ;;  %v4490_v8 = vld [vmem:[#allocation2 + $0xa8] sm:$0xff] }
0x216a   :  { %4267 = vadd.xlane.f32.xlu1 %v4266_v25  ;;  %v4263_v21 = vsel %vm210_vm1, %v4261_v9, 0.0  ;;  %v6723_v15 = vpack.c.bf16 %v4490_v8, %v4486_v3  ;;  %v4653_v3 = vld [vmem:[#allocation2 + $0x108] sm:$0xff]  ;;  %v5671_v8 = vld [vmem:[%s8168_s19 + $0x60] sm:$0xff] }
0x216b   :  { %4264 = vadd.xlane.f32.xlu0 %v4263_v21 }
0x21f7   :  { %v4268_v22 = vpop.xlane.xlu1 %4267 }
0x21f8   :  { %v4270_v23 = vmul.f32 0.03125, %v4268_v22  ;;  %v4265_v24 = vpop.xlane.xlu0 %4264  ;;  %v4498_v22 = vld [vmem:[#allocation2 + $0xe8] sm:$0xff] }
0x21f9   :  { %v4269_v27 = vmul.f32 0.03125, %v4265_v24 }
0x21fa   :  { %v4272_v28 = vadd.f32 1e-05, %v4270_v23 }
0x21fb   :  { %v4271_v34 = vadd.f32 1e-05, %v4269_v27  ;;  %v6847_v27 = vpack.c.bf16 %v5682_v44, %v5681_v11  ;;  %v4661_v11 = vld [vmem:[#allocation2 + $0x148] sm:$0xff] }
0x21fc   :  { %7053 = vrsqrt.f32 %v4272_v28  ;;  %v5665_v28 = vld [vmem:[%s8168_s19 + $0x30] sm:$0xff]  ;;  %v4665_v44 = vld [vmem:[#allocation2 + $0x168] sm:$0xff] }
0x21fd   :  { %7055 = vrsqrt.f32 %v4271_v34  ;;  %v5666_v34 = vld [vmem:[%s8168_s19 + $0x38] sm:$0xff] }
0x21fe   :  { %v6849_v48 = vpack.c.bf16 %v5666_v34, %v5665_v28 }
0x2206   :  { %v7054_v37 = vpop.eup %7053 }
0x2207   :  { %v7056_v41 = vpop.eup %7055  ;;  %v4276_v45 = vmul.f32 %v7054_v37, %v4260_v6  ;;  %v6843_v6 = vpack.c.bf16 %v5680_v38, %v5679_v59  ;;  %v5683_v37 = vld [vmem:[%s8168_s19 + $0xc0] sm:$0xff]  ;;  %v5669_v59 = vld [vmem:[%s8168_s19 + $0x50] sm:$0xff]  ;;  %v5670_v38 = vld [vmem:[%s8168_s19 + $0x58] sm:$0xff] }
0x2208   :  { %v4275_v46 = vmul.f32 %v7056_v41, %v4259_v7  ;;  %v6725_v41 = vpack.c.bf16 %v4489_v17, %v4485_v16  ;;  %v4655_v16 = vld [vmem:[#allocation2 + $0x118] sm:$0xff] }
0x2209   :  { %v4284_v33 = vmul.f32 %v6095_v39, %v4276_v45  ;;  %6844 = vmatprep.subr.bf16.mxu1 %v6843_v6  ;;  %v4493_v45 = vld [vmem:[#allocation2 + $0xc0] sm:$0xff]  ;;  %v4657_v6 = vld [vmem:[#allocation2 + $0x128] sm:$0xff]  ;;  %v4659_v17 = vld [vmem:[#allocation2 + $0x138] sm:$0xff] }
0x220a   :  { %v4283_v54 = vmul.f32 %v6095_v39, %v4275_v46  ;;  %v5684_v39 = vld [vmem:[%s8168_s19 + $0xc8] sm:$0xff]  ;;  %v4497_v46 = vld [vmem:[#allocation2 + $0xe0] sm:$0xff]  ;;  %6846 = vmatpush3.bf16.msra.mxu1 %v6845_v19  ;;  %v6747_v19 = vpack.c.bf16 %v4659_v17, %v4655_v16  ;;  %v4994_v16 = vld [vmem:[#allocation2 + $0x230] sm:$0xff] }
0x220b   :  { %v7843_v57 = vadd.f32 %v6096_v43, %v4284_v33  ;;  %6848 = vmatprep.subr.bf16.mxu1 %v6847_v27  ;;  %v6851_v49 = vpack.c.bf16 %v5684_v39, %v5683_v37  ;;  %v5668_v33 = vld [vmem:[%s8168_s19 + $0x48] sm:$0xff]  ;;  %v6729_v53 = vpack.c.bf16 %v4497_v46, %v4493_v45  ;;  %v4658_v27 = vld [vmem:[#allocation2 + $0x130] sm:$0xff]  ;;  %v4663_v37 = vld [vmem:[#allocation2 + $0x158] sm:$0xff] }
0x220c   :  { %v7854_v60 = vadd.f32 %v6096_v43, %v4283_v54  ;;  %v6727_v43 = vpack.c.bf16 %v4498_v22, %v4494_v18  ;;  %v4487_v54 = vld [vmem:[#allocation2 + $0x90] sm:$0xff]  ;;  %v6853_v31 = vpack.c.bf16 %v5668_v33, %v5667_v50  ;;  %v4667_v39 = vld [vmem:[#allocation2 + $0x178] sm:$0xff]  ;;  %v4820_v33 = vld [vmem:[#allocation2 + $0x180] sm:$0xff] }
0x220d   :  { %v4312_v61 = vrot.slane %v7843_v57, 7  ;;  %v5005_v1 = vrot.slane %v7843_v57, 3  ;;  %v5173_v25 = vrot.slane %v7843_v57, 4  ;;  %v5341_v13 = vrot.slane %v7843_v57, 5  ;;  %v4654_v22 = vld [vmem:[#allocation2 + $0x110] sm:$0xff]  ;;  %v4999_v17 = vld [vmem:[#allocation2 + $0x258] sm:$0xff] }
0x220e   :  { %v5004_v4 = vrot.slane %v7854_v60, 4  ;;  %v5172_v9 = vrot.slane %v7854_v60, 5  ;;  %v5340_v21 = vrot.slane %v7854_v60, 6  ;;  %v5508_v14 = vrot.slane %v7854_v60, 7  ;;  %6850 = vmatpush3.bf16.msra.mxu1 %v6849_v48  ;;  %v4662_v45 = vld [vmem:[#allocation2 + $0x150] sm:$0xff]  ;;  %v4821_v48 = vld [vmem:[#allocation2 + $0x188] sm:$0xff] }
0x220f   :  { %v4314_v7 = vsel %vm4313_vm5, %v4312_v61, %v7854_v60  ;;  %v5509_v36 = vrot.slane %v7843_v57, 6  ;;  %v4501_v42 = vrot.slane %v7854_v60, 1  ;;  %6852 = vmatprep.subr.bf16.mxu1 %v6851_v49  ;;  %v5687_v61 = vld [vmem:[%s8168_s19 + $0xe0] sm:$0xff]  ;;  %v6733_v63 = vpack.c.bf16 %v4491_v40, %v4487_v54  ;;  %v4666_v46 = vld [vmem:[#allocation2 + $0x170] sm:$0xff] }
0x2210   :  { %6097 = vmatmul.mubr.msk.f32.vlgmr.msra.gmra.mrb[44].mxu0 %vm210_vm1, %v4314_v7  ;;  %v7872_v29 = vsel %vm4313_vm5, %v5005_v1, %v5004_v4  ;;  %v7882_v12 = vsel %vm4313_vm5, %v5173_v25, %v5172_v9  ;;  %v7888_v23 = vsel %vm4313_vm5, %v5341_v13, %v5340_v21  ;;  %v4495_v1 = vld [vmem:[#allocation2 + $0xd0] sm:$0xff]  ;;  %v6857_v4 = vpack.c.bf16 %v5670_v38, %v5669_v59  ;;  %v5672_v9 = vld [vmem:[%s8168_s19 + $0x68] sm:$0xff]  ;;  %v4828_v40 = vld [vmem:[#allocation2 + $0x1c0] sm:$0xff] }
0x2211   :  { %6718 = vmatpush1.bf16.msra.mxu0 %v6717_v62  ;;  %4452 = vmatprep.mubr.f32.mxu0 %v7110_v26  ;;  %v7891_v24 = vsel %vm4313_vm5, %v5509_v36, %v5508_v14  ;;  %v5688_v62 = vld [vmem:[%s8168_s19 + $0xe8] sm:$0xff]  ;;  %v4502_v5 = vsel %vm4313_vm5, %v7843_v57, %v4501_v42  ;;  %v6739_v21 = vpack.c.bf16 %v4657_v6, %v4653_v3  ;;  %v4660_v36 = vld [vmem:[#allocation2 + $0x140] sm:$0xff]  ;;  %v4668_v28 = vrot.slane %v7854_v60, 2  ;;  %v4827_v42 = vld [vmem:[#allocation2 + $0x1b8] sm:$0xff] }
0x2212   :  { %6720 = vmatprep.subr.bf16.mxu0 %v6719_v2  ;;  %v4499_v2 = vld [vmem:[#allocation2 + $0xf0] sm:$0xff]  ;;  %6854 = vmatpush3.bf16.msra.mxu1 %v6853_v31  ;;  %v6741_v13 = vpack.c.bf16 %v4656_v10, %v4652_v35  ;;  %v6743_v14 = vpack.c.bf16 %v4665_v44, %v4661_v11  ;;  %v4669_v34 = vrot.slane %v7843_v57, 1  ;;  %v6753_v49 = vpack.c.bf16 %v4666_v46, %v4662_v45  ;;  %v4823_v31 = vld [vmem:[#allocation2 + $0x198] sm:$0xff]  ;;  %v4989_v6 = vld [vmem:[#allocation2 + $0x208] sm:$0xff] }
0x2213   :  { %6856 = vmatprep.subr.bf16.mxu1 %v6855_v58  ;;  %v6737_v25 = vpack.c.bf16 %v4499_v2, %v4495_v1  ;;  %v6755_v50 = vpack.c.bf16 %v4825_v30, %v4821_v48  ;;  %v6761_v56 = vpack.c.bf16 %v4832_v55, %v4828_v40  ;;  %v6763_v58 = vpack.c.bf16 %v4827_v42, %v4823_v31  ;;  %v4822_v59 = vld [vmem:[#allocation2 + $0x190] sm:$0xff]  ;;  %v5000_v11 = vld [vmem:[#allocation2 + $0x260] sm:$0xff]  ;;  %v4991_v44 = vld [vmem:[#allocation2 + $0x218] sm:$0xff] }
0x2214   :  { %v4670_v47 = vsel %vm4313_vm5, %v4669_v34, %v4668_v28  ;;  %v4826_v38 = vld [vmem:[#allocation2 + $0x1b0] sm:$0xff]  ;;  %v5157_v34 = vld [vmem:[#allocation2 + $0x288] sm:$0xff]  ;;  %v5160_v45 = vld [vmem:[#allocation2 + $0x2a0] sm:$0xff] }
0x2215   :  { %6722 = vmatpush1.bf16.msra.mxu0 %v6721_v32  ;;  %v6861_v32 = vpack.c.bf16 %v5672_v9, %v5671_v8  ;;  %v6765_v1 = vpack.c.bf16 %v4826_v38, %v4822_v59  ;;  %v4830_v3 = vld [vmem:[#allocation2 + $0x1d0] sm:$0xff]  ;;  %v4992_v9 = vld [vmem:[#allocation2 + $0x220] sm:$0xff]  ;;  %v5165_v46 = vld [vmem:[#allocation2 + $0x2c8] sm:$0xff] }
0x2216   :  { %6724 = vmatprep.subr.bf16.mxu0 %v6723_v15  ;;  %6858 = vmatpush3.bf16.msra.mxu1 %v6857_v4  ;;  %v4664_v15 = vld [vmem:[#allocation2 + $0x160] sm:$0xff]  ;;  %v4834_v4 = vld [vmem:[#allocation2 + $0x1f0] sm:$0xff]  ;;  %v5167_v40 = vld [vmem:[#allocation2 + $0x2d8] sm:$0xff] }
0x2217   :  { %v6745_v18 = vpack.c.bf16 %v4664_v15, %v4660_v36  ;;  %v6769_v8 = vpack.c.bf16 %v4834_v4, %v4830_v3  ;;  %v4990_v15 = vld [vmem:[#allocation2 + $0x210] sm:$0xff]  ;;  %v5171_v55 = vld [vmem:[#allocation2 + $0x2f8] sm:$0xff]  ;;  %v5325_v59 = vld [vmem:[#allocation2 + $0x308] sm:$0xff] }
0x2218   :  { %6098 = vmatmul.mubr.msk.f32.vlgmr.msra.gmra.mrb[46].mxu0 %vm210_vm1, %v4314_v7  ;;  %v6859_v7 = vpack.c.bf16 %v5688_v62, %v5687_v61  ;;  %v4836_v61 = vrot.slane %v7854_v60, 3  ;;  %v4837_v62 = vrot.slane %v7843_v57, 2  ;;  %v4988_v60 = vld [vmem:[#allocation2 + $0x200] sm:$0xff]  ;;  %v5002_v28 = vld [vmem:[#allocation2 + $0x270] sm:$0xff]  ;;  %v6799_v42 = vpack.c.bf16 %v5171_v55, %v5167_v40  ;;  %v5329_v38 = vld [vmem:[#allocation2 + $0x328] sm:$0xff] }
0x2219   :  { %6726 = vmatpush1.bf16.msra.mxu0 %v6725_v41  ;;  %4569 = vmatprep.mubr.f32.mxu0 %v7110_v26  ;;  %v6749_v41 = vpack.c.bf16 %v4658_v27, %v4654_v22  ;;  %v6773_v35 = vpack.c.bf16 %v4992_v9, %v4988_v60  ;;  %v4998_v27 = vld [vmem:[#allocation2 + $0x250] sm:$0xff]  ;;  %v5332_v4 = vld [vmem:[#allocation2 + $0x340] sm:$0xff]  ;;  %v4460_v55 = vlaneseq }
0x221a   :  { %6728 = vmatprep.subr.bf16.mxu0 %v6727_v43  ;;  %6860 = vmatprep.subr.bf16.mxu1 %v6859_v7  ;;  %v6751_v43 = vpack.c.bf16 %v4667_v39, %v4663_v37  ;;  %v4993_v7 = vld [vmem:[#allocation2 + $0x228] sm:$0xff]  ;;  %v6785_v39 = vpack.c.bf16 %v5002_v28, %v4998_v27  ;;  %v5326_v60 = vld [vmem:[#allocation2 + $0x310] sm:$0xff]  ;;  %v5504_v27 = vld [vmem:[#allocation2 + $0x3e0] sm:$0xff] }
0x221b   :  { %6862 = vmatpush3.bf16.msra.mxu1 %v6861_v32  ;;  %v6771_v57 = vpack.c.bf16 %v4993_v7, %v4989_v6  ;;  %v4996_v32 = vld [vmem:[#allocation2 + $0x240] sm:$0xff]  ;;  %v5161_v37 = vld [vmem:[#allocation2 + $0x2a8] sm:$0xff]  ;;  %v5327_v6 = vld [vmem:[#allocation2 + $0x318] sm:$0xff] }
0x221c   :  { %v5331_v7 = vld [vmem:[#allocation2 + $0x338] sm:$0xff]  ;;  %v5330_v9 = vld [vmem:[#allocation2 + $0x330] sm:$0xff] }
0x221d   :  { %6730 = vmatpush1.bf16.msra.mxu0 %v6729_v53  ;;  %v4833_v53 = vld [vmem:[#allocation2 + $0x1e8] sm:$0xff]  ;;  %v5495_v28 = vld [vmem:[#allocation2 + $0x398] sm:$0xff] }
0x221e   :  { %6732 = vmatprep.subr.bf16.mxu0 %v6731_v20  ;;  %v6757_v20 = vpack.c.bf16 %v4824_v51, %v4820_v33  ;;  %v6759_v54 = vpack.c.bf16 %v4833_v53, %v4829_v52  ;;  %v5159_v33 = vld [vmem:[#allocation2 + $0x298] sm:$0xff] }
0x221f   :  { %v5163_v51 = vld [vmem:[#allocation2 + $0x2b8] sm:$0xff] }
0x2220   :  { %6099 = vmatmul.mubr.msk.f32.vlgmr.msra.gmra.mrb[44].mxu0 %vm210_vm1, %v4502_v5  ;;  %v6795_v53 = vpack.c.bf16 %v5163_v51, %v5159_v33  ;;  %v5690_v33 = vld [vmem:[%s8168_s19 + $0xf8] sm:$0xff] }
0x2221   :  { %6734 = vmatpush1.bf16.msra.mxu0 %v6733_v63  ;;  %4640 = vmatprep.mubr.f32.mxu0 %v7110_v26  ;;  %v4831_v63 = vld [vmem:[#allocation2 + $0x1d8] sm:$0xff] }
0x2222   :  { %6736 = vmatprep.subr.bf16.mxu0 %v6735_v0  ;;  %v4835_v0 = vld [vmem:[#allocation2 + $0x1f8] sm:$0xff] }
0x2223   :  { %v6767_v2 = vpack.c.bf16 %v4835_v0, %v4831_v63  ;;  %v5328_v63 = vld [vmem:[#allocation2 + $0x320] sm:$0xff]  ;;  %v5333_v0 = vld [vmem:[#allocation2 + $0x348] sm:$0xff] }
0x2225   :  { %6738 = vmatpush1.bf16.msra.mxu0 %v6737_v25  ;;  %v4997_v25 = vld [vmem:[#allocation2 + $0x248] sm:$0xff] }
0x2226   :  { %6740 = vmatprep.subr.bf16.mxu0 %v6739_v21  ;;  %v5001_v21 = vld [vmem:[#allocation2 + $0x268] sm:$0xff] }
0x2227   :  { %v6775_v10 = vpack.c.bf16 %v5001_v21, %v4997_v25  ;;  %v5335_v25 = vld [vmem:[#allocation2 + $0x358] sm:$0xff] }
0x2228   :  { %6100 = vmatmul.mubr.msk.f32.vlgmr.msra.gmra.mrb[46].mxu0 %vm210_vm1, %v4502_v5  ;;  %v4838_v5 = vsel %vm4313_vm5, %v4837_v62, %v4836_v61  ;;  %v6803_v61 = vpack.c.bf16 %v5329_v38, %v5325_v59  ;;  %v5324_v62 = vld [vmem:[#allocation2 + $0x300] sm:$0xff]  ;;  %v5339_v21 = vld [vmem:[#allocation2 + $0x378] sm:$0xff] }
0x2229   :  { %6742 = vmatpush1.bf16.msra.mxu0 %v6741_v13  ;;  %4737 = vmatprep.mubr.f32.mxu0 %v7110_v26  ;;  %v4995_v13 = vld [vmem:[#allocation2 + $0x238] sm:$0xff] }
0x222a   :  { %6744 = vmatprep.subr.bf16.mxu0 %v6743_v14  ;;  %v6777_v14 = vpack.c.bf16 %v5000_v11, %v4996_v32  ;;  %v6779_v36 = vpack.c.bf16 %v4995_v13, %v4991_v44  ;;  %v5334_v32 = vld [vmem:[#allocation2 + $0x350] sm:$0xff]  ;;  %v5493_v44 = vld [vmem:[#allocation2 + $0x388] sm:$0xff] }
0x222b   :  { %v5338_v11 = vld [vmem:[#allocation2 + $0x370] sm:$0xff]  ;;  %v5497_v13 = vld [vmem:[#allocation2 + $0x3a8] sm:$0xff] }
0x222d   :  { %6746 = vmatpush1.bf16.msra.mxu0 %v6745_v18  ;;  %v5003_v18 = vld [vmem:[#allocation2 + $0x278] sm:$0xff] }
0x222e   :  { %6748 = vmatprep.subr.bf16.mxu0 %v6747_v19  ;;  %v6781_v19 = vpack.c.bf16 %v4994_v16, %v4990_v15  ;;  %v6783_v22 = vpack.c.bf16 %v5003_v18, %v4999_v17  ;;  %v5496_v15 = vld [vmem:[#allocation2 + $0x3a0] sm:$0xff]  ;;  %v5501_v16 = vld [vmem:[#allocation2 + $0x3c8] sm:$0xff] }
0x222f   :  { %v5505_v17 = vld [vmem:[#allocation2 + $0x3e8] sm:$0xff] }
0x2230   :  { %6101 = vmatmul.mubr.msk.f32.vlgmr.msra.gmra.mrb[44].mxu0 %vm210_vm1, %v4670_v47 }
0x2231   :  { %6750 = vmatpush1.bf16.msra.mxu0 %v6749_v41  ;;  %4808 = vmatprep.mubr.f32.mxu0 %v7110_v26  ;;  %v6787_v41 = vpack.c.bf16 %v5161_v37, %v5157_v34  ;;  %v5499_v34 = vld [vmem:[#allocation2 + $0x3b8] sm:$0xff] }
0x2232   :  { %6752 = vmatprep.subr.bf16.mxu0 %v6751_v43  ;;  %v5156_v43 = vld [vmem:[#allocation2 + $0x280] sm:$0xff] }
0x2233   :  { %v6789_v48 = vpack.c.bf16 %v5160_v45, %v5156_v43  ;;  %v5498_v43 = vld [vmem:[#allocation2 + $0x3b0] sm:$0xff]  ;;  %v5503_v45 = vld [vmem:[#allocation2 + $0x3d8] sm:$0xff] }
0x2235   :  { %6754 = vmatpush1.bf16.msra.mxu0 %v6753_v49  ;;  %v5164_v49 = vld [vmem:[#allocation2 + $0x2c0] sm:$0xff] }
0x2236   :  { %6756 = vmatprep.subr.bf16.mxu0 %v6755_v50  ;;  %v5168_v50 = vld [vmem:[#allocation2 + $0x2e0] sm:$0xff] }
0x2237   :  { %v6793_v52 = vpack.c.bf16 %v5168_v50, %v5164_v49  ;;  %v5506_v49 = vld [vmem:[#allocation2 + $0x3f0] sm:$0xff] }
0x2238   :  { %6102 = vmatmul.mubr.msk.f32.vlgmr.msra.gmra.mrb[46].mxu0 %vm210_vm1, %v4670_v47  ;;  %v5169_v47 = vld [vmem:[#allocation2 + $0x2e8] sm:$0xff]  ;;  %v5689_v50 = vld [vmem:[%s8168_s19 + $0xf0] sm:$0xff] }
0x2239   :  { %6758 = vmatpush1.bf16.msra.mxu0 %v6757_v20  ;;  %4905 = vmatprep.mubr.f32.mxu0 %v7110_v26  ;;  %v6791_v30 = vpack.c.bf16 %v5169_v47, %v5165_v46  ;;  %v5158_v20 = vld [vmem:[#allocation2 + $0x290] sm:$0xff]  ;;  %v5507_v46 = vld [vmem:[#allocation2 + $0x3f8] sm:$0xff]  ;;  %v6863_v51 = vpack.c.bf16 %v5690_v33, %v5689_v50 }
0x223a   :  { %6760 = vmatprep.subr.bf16.mxu0 %v6759_v54  ;;  %v5162_v54 = vld [vmem:[#allocation2 + $0x2b0] sm:$0xff]  ;;  %v5722_v33 = vld [vmem:[%s8168_s19 + $0x1f8] sm:$0xff] }
0x223b   :  { %v6797_v31 = vpack.c.bf16 %v5162_v54, %v5158_v20  ;;  %6864 = vmatprep.subr.bf16.mxu1 %v6863_v51  ;;  %v5708_v54 = vld [vmem:[%s8168_s19 + $0x188] sm:$0xff]  ;;  %v5721_v50 = vld [vmem:[%s8168_s19 + $0x1f0] sm:$0xff] }
0x223d   :  { %6762 = vmatpush1.bf16.msra.mxu0 %v6761_v56  ;;  %v5166_v56 = vld [vmem:[#allocation2 + $0x2d0] sm:$0xff] }
0x223e   :  { %6764 = vmatprep.subr.bf16.mxu0 %v6763_v58  ;;  %v5170_v58 = vld [vmem:[#allocation2 + $0x2f0] sm:$0xff] }
0x2240   :  { %6103 = vmatmul.mubr.msk.f32.vlgmr.msra.gmra.mrb[44].mxu0 %vm210_vm1, %v4838_v5 }
0x2241   :  { %6766 = vmatpush1.bf16.msra.mxu0 %v6765_v1  ;;  %4976 = vmatprep.mubr.f32.mxu0 %v7110_v26  ;;  %v5337_v1 = vld [vmem:[#allocation2 + $0x368] sm:$0xff] }
0x2242   :  { %6768 = vmatprep.subr.bf16.mxu0 %v6767_v2  ;;  %v6805_v2 = vpack.c.bf16 %v5328_v63, %v5324_v62  ;;  %v6807_v3 = vpack.c.bf16 %v5337_v1, %v5333_v0  ;;  %v5709_v63 = vld [vmem:[%s8168_s19 + $0x190] sm:$0xff]  ;;  %v5710_v0 = vld [vmem:[%s8168_s19 + $0x198] sm:$0xff] }
0x2245   :  { %6770 = vmatpush1.bf16.msra.mxu0 %v6769_v8 }
0x2246   :  { %6772 = vmatprep.subr.bf16.mxu0 %v6771_v57  ;;  %v6811_v57 = vpack.c.bf16 %v5331_v7, %v5327_v6  ;;  %v6871_v6 = vpack.c.bf16 %v5710_v0, %v5709_v63  ;;  %v5693_v7 = vld [vmem:[%s8168_s19 + $0x110] sm:$0xff]  ;;  %v5877_v0 = vld [vmem:[%s8170_s21 + $0x38] sm:$0xff] }
0x2247   :  { %v5876_v63 = vld [vmem:[%s8170_s21 + $0x30] sm:$0xff] }
0x2248   :  { %6104 = vmatmul.mubr.msk.f32.vlgmr.msra.gmra.mrb[46].mxu0 %vm210_vm1, %v4838_v5  ;;  %v5336_v5 = vld [vmem:[#allocation2 + $0x360] sm:$0xff] }
0x2249   :  { %6774 = vmatpush1.bf16.msra.mxu0 %v6773_v35  ;;  %5073 = vmatprep.mubr.f32.mxu0 %v7110_v26  ;;  %v6809_v8 = vpack.c.bf16 %v5336_v5, %v5332_v4  ;;  %v6813_v35 = vpack.c.bf16 %v5330_v9, %v5326_v60  ;;  %v5712_v60 = vld [vmem:[%s8168_s19 + $0x1a8] sm:$0xff] }
0x224a   :  { %6776 = vmatprep.subr.bf16.mxu0 %v6775_v10  ;;  %v6815_v10 = vpack.c.bf16 %v5339_v21, %v5335_v25 }
0x224d   :  { %6778 = vmatpush1.bf16.msra.mxu0 %v6777_v14  ;;  %v6819_v14 = vpack.c.bf16 %v5497_v13, %v5493_v44  ;;  %v5714_v44 = vld [vmem:[%s8168_s19 + $0x1b8] sm:$0xff] }
0x224e   :  { %6780 = vmatprep.subr.bf16.mxu0 %v6779_v36  ;;  %v5492_v36 = vld [vmem:[#allocation2 + $0x380] sm:$0xff] }
0x224f   :  { %v6821_v18 = vpack.c.bf16 %v5496_v15, %v5492_v36  ;;  %v5697_v15 = vld [vmem:[%s8168_s19 + $0x130] sm:$0xff] }
0x2250   :  { %6105 = vmatmul.mubr.msk.f32.vlgmr.msra.gmra.mrb[44].mxu0 %vm210_vm1, %v7872_v29 }
0x2251   :  { %6782 = vmatpush1.bf16.msra.mxu0 %v6781_v19  ;;  %5144 = vmatprep.mubr.f32.mxu0 %v7110_v26  ;;  %v6823_v19 = vpack.c.bf16 %v5505_v17, %v5501_v16  ;;  %v5698_v16 = vld [vmem:[%s8168_s19 + $0x138] sm:$0xff]  ;;  %v5715_v17 = vld [vmem:[%s8168_s19 + $0x1c0] sm:$0xff] }
0x2252   :  { %6784 = vmatprep.subr.bf16.mxu0 %v6783_v22  ;;  %v5500_v22 = vld [vmem:[#allocation2 + $0x3c0] sm:$0xff] }
0x2253   :  { %v6825_v37 = vpack.c.bf16 %v5504_v27, %v5500_v22  ;;  %v5699_v27 = vld [vmem:[%s8168_s19 + $0x140] sm:$0xff] }
0x2255   :  { %6786 = vmatpush1.bf16.msra.mxu0 %v6785_v39  ;;  %v6827_v39 = vpack.c.bf16 %v5499_v34, %v5495_v28  ;;  %v5700_v28 = vld [vmem:[%s8168_s19 + $0x148] sm:$0xff]  ;;  %v5717_v34 = vld [vmem:[%s8168_s19 + $0x1d0] sm:$0xff] }
0x2256   :  { %6788 = vmatprep.subr.bf16.mxu0 %v6787_v41  ;;  %v5494_v41 = vld [vmem:[#allocation2 + $0x390] sm:$0xff] }
0x2257   :  { %v6829_v47 = vpack.c.bf16 %v5498_v43, %v5494_v41  ;;  %v5701_v43 = vld [vmem:[%s8168_s19 + $0x150] sm:$0xff] }
0x2258   :  { %6106 = vmatmul.mubr.msk.f32.vlgmr.msra.gmra.mrb[46].mxu0 %vm210_vm1, %v7872_v29  ;;  %v6801_v29 = vpack.c.bf16 %v5170_v58, %v5166_v56  ;;  %v8005_v56 = vld [vmem:[%s8167_s18] sm:$0xf] }
0x2259   :  { %6790 = vmatpush1.bf16.msra.mxu0 %v6789_v48  ;;  %5241 = vmatprep.mubr.f32.mxu0 %v7110_v26  ;;  %v6831_v48 = vpack.c.bf16 %v5507_v46, %v5503_v45  ;;  %v5702_v45 = vld [vmem:[%s8168_s19 + $0x158] sm:$0xff]  ;;  %v5719_v46 = vld [vmem:[%s8168_s19 + $0x1e0] sm:$0xff] }
0x225a   :  { %6792 = vmatprep.subr.bf16.mxu0 %v6791_v30  ;;  %v5502_v30 = vld [vmem:[#allocation2 + $0x3d0] sm:$0xff] }
0x225d   :  { %6794 = vmatpush1.bf16.msra.mxu0 %v6793_v52  ;;  %v5673_v52 = vld [vmem:[%s8168_s19 + $0x70] sm:$0xff] }
0x225e   :  { %6796 = vmatprep.subr.bf16.mxu0 %v6795_v53  ;;  %v5674_v53 = vld [vmem:[%s8168_s19 + $0x78] sm:$0xff] }
0x225f   :  { %v6865_v20 = vpack.c.bf16 %v5674_v53, %v5673_v52  ;;  %v6895_v53 = vpack.c.bf16 %v5722_v33, %v5721_v50 }
0x2260   :  { %6107 = vmatmul.mubr.msk.f32.vlgmr.msra.gmra.mrb[44].mxu0 %vm210_vm1, %v7882_v12 }
0x2261   :  { %6798 = vmatpush1.bf16.msra.mxu0 %v6797_v31  ;;  %5312 = vmatprep.mubr.f32.mxu0 %v7110_v26  ;;  %v7999_v31 = vshrl.u32 %v4460_v55, 7 }
0x2262   :  { %6800 = vmatprep.subr.bf16.mxu0 %v6799_v42  ;;  %6866 = vmatpush3.bf16.msra.mxu1 %v6865_v20  ;;  %v5705_v20 = vld [vmem:[%s8168_s19 + $0x170] sm:$0xff] }
0x2263   :  { %v4466_v42 = vsub.s32 1, %v7999_v31  ;;  %v4462_v58 = vsub.s32 0, %v7999_v31  ;;  %v4474_v4 = vsub.s32 3, %v7999_v31  ;;  %v4470_v52 = vsub.s32 2, %v7999_v31  ;;  %v5870_v31 = vld [vmem:[%s8170_s21] sm:$0xff] }
0x2265   :  { %6802 = vmatpush1.bf16.msra.mxu0 %v6801_v29  ;;  %v4467_v59 = vrot.slane %v8005_v56, %v4466_v42  ;;  %v4463_v38 = vrot.slane %v8005_v56, %v4462_v58  ;;  %v5691_v29 = vld [vmem:[%s8168_s19 + $0x100] sm:$0xff]  ;;  %v4475_v9 = vrot.slane %v8005_v56, %v4474_v4  ;;  %v5871_v42 = vld [vmem:[%s8170_s21 + $0x8] sm:$0xff]  ;;  %v5872_v58 = vld [vmem:[%s8170_s21 + $0x10] sm:$0xff] }
0x2266   :  { %6804 = vmatprep.subr.bf16.mxu0 %v6803_v61  ;;  %v5692_v61 = vld [vmem:[%s8168_s19 + $0x108] sm:$0xff] }
0x2268   :  { %6108 = vmatmul.mubr.msk.f32.vlgmr.msra.gmra.mrb[46].mxu0 %vm210_vm1, %v7882_v12  ;;  %v6817_v12 = vpack.c.bf16 %v5338_v11, %v5334_v32  ;;  %v5713_v11 = vld [vmem:[%s8168_s19 + $0x1b0] sm:$0xff] }
0x2269   :  { %6806 = vmatpush1.bf16.msra.mxu0 %v6805_v2  ;;  %5409 = vmatprep.mubr.f32.mxu0 %v7110_v26  ;;  %v6879_v36 = vpack.c.bf16 %v5714_v44, %v5713_v11 }
0x226a   :  { %6808 = vmatprep.subr.bf16.mxu0 %v6807_v3  ;;  %v6869_v3 = vpack.c.bf16 %v5692_v61, %v5691_v29  ;;  %v5874_v29 = vld [vmem:[%s8170_s21 + $0x20] sm:$0xff]  ;;  %v5875_v61 = vld [vmem:[%s8170_s21 + $0x28] sm:$0xff] }
0x226d   :  { %6810 = vmatpush1.bf16.msra.mxu0 %v6809_v8  ;;  %v5694_v8 = vld [vmem:[%s8168_s19 + $0x118] sm:$0xff] }
0x226e   :  { %6812 = vmatprep.subr.bf16.mxu0 %v6811_v57  ;;  %v5711_v57 = vld [vmem:[%s8168_s19 + $0x1a0] sm:$0xff]  ;;  %v6873_v25 = vpack.c.bf16 %v5694_v8, %v5693_v7 }
0x226f   :  { %v6875_v21 = vpack.c.bf16 %v5712_v60, %v5711_v57 }
0x2270   :  { %6109 = vmatmul.mubr.msk.f32.vlgmr.msra.gmra.mrb[44].mxu0 %vm210_vm1, %v7888_v23 }
0x2271   :  { %6814 = vmatpush1.bf16.msra.mxu0 %v6813_v35  ;;  %5480 = vmatprep.mubr.f32.mxu0 %v7110_v26  ;;  %v5695_v35 = vld [vmem:[%s8168_s19 + $0x120] sm:$0xff] }
0x2272   :  { %6816 = vmatprep.subr.bf16.mxu0 %v6815_v10  ;;  %v5696_v10 = vld [vmem:[%s8168_s19 + $0x128] sm:$0xff] }
0x2275   :  { %6818 = vmatpush1.bf16.msra.mxu0 %v6817_v12 }
0x2276   :  { %6820 = vmatprep.subr.bf16.mxu0 %v6819_v14  ;;  %v6877_v14 = vpack.c.bf16 %v5696_v10, %v5695_v35 }
0x2278   :  { %6110 = vmatmul.mubr.msk.f32.vlgmr.msra.gmra.mrb[46].mxu0 %vm210_vm1, %v7888_v23  ;;  %v6833_v23 = vpack.c.bf16 %v5506_v49, %v5502_v30  ;;  %v5703_v49 = vld [vmem:[%s8168_s19 + $0x160] sm:$0xff] }
0x2279   :  { %6822 = vmatpush1.bf16.msra.mxu0 %v6821_v18  ;;  %5577 = vmatprep.mubr.f32.mxu0 %v7110_v26  ;;  %v5716_v18 = vld [vmem:[%s8168_s19 + $0x1c8] sm:$0xff] }
0x227a   :  { %6824 = vmatprep.subr.bf16.mxu0 %v6823_v19  ;;  %v6881_v19 = vpack.c.bf16 %v5698_v16, %v5697_v15  ;;  %v6883_v22 = vpack.c.bf16 %v5716_v18, %v5715_v17 }
0x227d   :  { %6826 = vmatpush1.bf16.msra.mxu0 %v6825_v37  ;;  %v5718_v37 = vld [vmem:[%s8168_s19 + $0x1d8] sm:$0xff] }
0x227e   :  { %6828 = vmatprep.subr.bf16.mxu0 %v6827_v39  ;;  %v6885_v39 = vpack.c.bf16 %v5700_v28, %v5699_v27  ;;  %v6887_v41 = vpack.c.bf16 %v5718_v37, %v5717_v34 }
0x2280   :  { %6111 = vmatmul.mubr.msk.f32.vlgmr.msra.gmra.mrb[44].mxu0 %vm210_vm1, %v7891_v24 }
0x2281   :  { %6830 = vmatpush1.bf16.msra.mxu0 %v6829_v47  ;;  %5648 = vmatprep.mubr.f32.mxu0 %v7110_v26  ;;  %v5720_v47 = vld [vmem:[%s8168_s19 + $0x1e8] sm:$0xff] }
0x2282   :  { %6832 = vmatprep.subr.bf16.mxu0 %v6831_v48  ;;  %v6889_v48 = vpack.c.bf16 %v5702_v45, %v5701_v43  ;;  %v6891_v30 = vpack.c.bf16 %v5720_v47, %v5719_v46 }
0x2285   :  { %6834 = vmatpush1.bf16.msra.mxu0 %v6833_v23  ;;  %v5704_v23 = vld [vmem:[%s8168_s19 + $0x168] sm:$0xff] }
0x2286   :  { %v6893_v51 = vpack.c.bf16 %v5704_v23, %v5703_v49 }
0x2288   :  { %6112 = vmatmul.mubr.msk.f32.vlgmr.msra.gmra.mrb[46].mxu0 %vm210_vm1, %v7891_v24  ;;  %v5707_v24 = vld [vmem:[%s8168_s19 + $0x180] sm:$0xff] }
0x2289   :  { %v6867_v40 = vpack.c.bf16 %v5708_v54, %v5707_v24  ;;  %v5706_v24 = vld [vmem:[%s8168_s19 + $0x178] sm:$0xff] }
0x228a   :  { %v6897_v54 = vpack.c.bf16 %v5706_v24, %v5705_v20 }
0x228b   :  { %6868 = vmatprep.subr.bf16.mxu1 %v6867_v40  ;;  %v4471_v40 = vrot.slane %v8005_v56, %v4470_v52  ;;  %v7122_v56 = vmov 0.0|0.0  }
0x2353   :  { %v5579_v62 = vpop.f32.mrb[44].mxu0 }
0x2354   :  { %v5581_v1 = vpop.f32.mrb[45].mxu0  ;;  %v6915_v5 = vadd.f32 %v5579_v62, %v4463_v38  ;;  %v5873_v38 = vld [vmem:[%s8170_s21 + $0x18] sm:$0xff]  ;;  %v6906_v62 = vpack.c.bf16 %v5875_v61, %v5874_v29  ;;  %s7123_s21 = smov [#allocation5]  }
0x2355   :  { %v6916_v2 = vadd.f32 %v5581_v1, %v4467_v59  ;;  %v6900_v59 = vpack.c.bf16 %v5871_v42, %v5870_v31  ;;  %v6909_v1 = vpack.c.bf16 %v5877_v0, %v5876_v63  ;;  %s5965_s12 = sshll.u32 %s7123_s21, 4  ;;  %s5966_s12 = int_to_ptr.vmem [resolvable:$true] %s5965_s12 }
0x2356   :  { %s7080_s13 = scalar_lea.vmem %s5966_s12, 32  ;;  %p7085_p9 = scmp.lt.s32.totalorder %s5966_s12, %s5966_s12 }
0x2357   :  { %5794 = vmatprep.mubr.f32.mxu1 %v6916_v2  ;;  %p7081_p8 = scmp.ne.s32.totalorder %s5966_s12, %s7080_s13  ;;  %p7086_p10 = scmp.lt.s32.totalorder %s7080_s13, %s7080_s13 }
0x2358   :  { %5795 = vmatmul.mubr.f32.vlgmr.msra.gmra.mrb[38].mxu1 %v6915_v5  ;;  %v6113_v5 = vld [vmem:[%s8169_s20] ss:$0 sm:$0xff] }
0x2359   :  { %6870 = vmatpush3.bf16.msra.mxu1 %v6869_v3  ;;  %p7087_p11 = por %p7086_p10, %p7085_p9 }
0x235a   :  { %6872 = vmatprep.subr.bf16.mxu1 %v6871_v6 }
0x235b   :  { %v5650_v32 = vpop.f32.mrb[46].mxu0  ;;  %p7088_p12 = pnand %p7087_p11, %p7081_p8 }
0x235c   :  { %v5652_v13 = vpop.f32.mrb[47].mxu0  ;;  %v6917_v55 = vadd.f32 %v5650_v32, %v4471_v40 }
0x235d   :  { %v6918_v12 = vadd.f32 %v5652_v13, %v4475_v9  ;;  %6874 = vmatpush3.bf16.msra.mxu1 %v6873_v25  ;;  %v6114_v9 = vld [vmem:[%s8171_s22] ss:$0 sm:$0xff] }
0x235e   :  { %6876 = vmatprep.subr.bf16.mxu1 %v6875_v21 }
0x235f   :  { %5864 = vmatprep.mubr.f32.mxu1 %v6918_v12 }
0x2361   :  { %6878 = vmatpush3.bf16.msra.mxu1 %v6877_v14 }
0x2362   :  { %6880 = vmatprep.subr.bf16.mxu1 %v6879_v36 }
0x2365   :  { %6882 = vmatpush3.bf16.msra.mxu1 %v6881_v19 }
0x2366   :  { %6884 = vmatprep.subr.bf16.mxu1 %v6883_v22 }
0x2369   :  { %6886 = vmatpush3.bf16.msra.mxu1 %v6885_v39 }
0x236a   :  { %6888 = vmatprep.subr.bf16.mxu1 %v6887_v41 }
0x236d   :  { %6890 = vmatpush3.bf16.msra.mxu1 %v6889_v48 }
0x236e   :  { %6892 = vmatprep.subr.bf16.mxu1 %v6891_v30 }
0x2371   :  { %6894 = vmatpush3.bf16.msra.mxu1 %v6893_v51 }
0x2372   :  { %6896 = vmatprep.subr.bf16.mxu1 %v6895_v53 }
0x2375   :  { %6898 = vmatpush3.bf16.msra.mxu1 %v6897_v54 }
0x2376   :  { %6899 = vmatprep.subr.bf16.mxu1 %v7122_v56 }
0x2378   :  { %5865 = vmatmul.mubr.f32.vlgmr.msra.gmra.mrb[40].mxu1 %v6917_v55 }
0x2379   :  { %6636 = vmatprep.mubr.msk.f32.mxu1 %vm7111_vm2, %v7110_v26  ;;  %6901 = vmatpush3.bf16.msra.mxu1 %v6900_v59  ;;  %v6903_v26 = vpack.c.bf16 %v5873_v38, %v5872_v58 }
0x237a   :  { %6902 = vmatprep.subr.bf16.mxu1 %v7122_v56 }
0x237d   :  { %6904 = vmatpush3.bf16.msra.mxu1 %v6903_v26 }
0x237e   :  { %6905 = vmatprep.subr.bf16.mxu1 %v7122_v56 }
0x2381   :  { %6907 = vmatpush3.bf16.msra.mxu1 %v6906_v62 }
0x2382   :  { %6908 = vmatprep.subr.bf16.mxu1 %v7122_v56 }
0x2385   :  { %6910 = vmatpush3.bf16.msra.mxu1 %v6909_v1 }
0x242b   :  { %v6284_v2 = vpop.f32.mrb[38].mxu1 }
0x242c   :  { %v6285_v3 = vpop.f32.mrb[39].mxu1 }
0x242d   :  { %v6286_v4 = vadd.f32 %v6285_v3, %v6284_v2 }
0x242f   :  { %v5797_v8 = vadd.f32 %v6286_v4, %v6113_v5 }
0x244b   :  { %v6319_v6 = vpop.f32.mrb[40].mxu1 }
0x244c   :  { %v6320_v7 = vpop.f32.mrb[41].mxu1 }
0x244d   :  { %v6321_v57 = vadd.f32 %v6320_v7, %v6319_v6 }
0x244f   :  { %v5867_v60 = vadd.f32 %v6321_v57, %v5797_v8 }
0x2451   :  { %6637 = vmatmul.mubr.msk.f32.vlgmr.msra.gmra.mrb[42].mxu1 %vm2114_vm4, %v5867_v60 }
0x2524   :  { %v5954_v25 = vpop.f32.mrb[42].mxu1 }
0x2525   :  { %v5955_v21 = vadd.f32 %v6114_v9, %v5954_v25  ;;  %v6638_v35 = vpop.f32.mrb[43].mxu1 }
0x2527   :  { %5958 = vst [vmem:[#allocation5] sm:$0x3] %v5955_v21 }
0x2528   :  { %7091 = shalt.err (!%p7088_p12)
}
0x2529   :  { %s7092_s2 = scalar_lea.hbm %s8172_s23, 32 }
0x252a   :  { %p7093_p13 = scmp.ne.s32.totalorder %s8172_s23, %s7092_s2  ;;  %p7096_p0 = scmp.lt.u32.totalorder %s7092_s2, %s8172_s23 }
0x252c   :  { %p7098_p1 = pnand %p7096_p0, %p7093_p13 }
0x252e   :  { %7101 = shalt.err (!%p7098_p1)
}
0x252f   :  { %5968 = dma.vmem_to_hbm [thread:$0]  %s5966_s12, 32, %s8172_s23, [#allocation4]  }
0x2530   :  { %7104 = dma.done.wait [#allocation4], 32  }
0x2531   :  { %7105 = vsyncadd [#allocation4], 4294967264 }
0x2532   :  { %5972 = vsyncpa [#allocation3], 1 }
0x2533   :  { %5973 = vsyncpa [#allocation4], 1 }

</bundles_post_ra>
